<compile_context>
chip_gen: v6e
topology: v6e:2x2x1
jax: 0.10.0
libtpu: 0.0.40
codegen_flags: <defaults>
</compile_context>

<pallas_src>
import functools

import jax
import jax.numpy as jnp
from jax.experimental import pallas as pl
from jax.experimental.pallas import tpu as pltpu

# ----------------------- small synthetic config -----------------------
B = 2            # batch
C = 3            # image channels
IMG = 16         # image size
P = 4            # patch size
N_PATCH = (IMG // P) ** 2
S_IMG = N_PATCH + 1          # +1 cls token
D = 32           # real embed dim (vision_width == bert hidden for simplicity)
DP = 128         # lane-padded embed dim (MXU / vreg friendly)
VIT_DEPTH = 2
VIT_HEADS = 4
MLP = 4 * D                  # == 128 == DP at this synthetic size

VOCAB = 64
MAX_POS = 77     # tokenizer max_length in the reference code
TXT_SEQ = 8
BERT_LAYERS = 2
BERT_HEADS = 4
INTER = 4 * D                # == 128 == DP at this synthetic size
ENC_TOKEN_ID = 1             # stands in for tokenizer.enc_token_id

KPATCH = C * P * P           # 48
KPATCH_PAD = 128             # lane-padded patch feature dim
PAR = 2                      # 2-way batch split marked "parallel" (v7x: 1 per TC)

DH_V = D // VIT_HEADS        # real per-head dim (8)
DHP_V = DP // VIT_HEADS      # head-blocked per-head slot (32)
DH_B = D // BERT_HEADS
DHP_B = DP // BERT_HEADS

NV_VIT = 10                  # coalesced per-layer vector rows (ViT)
NV_BERT = 16                 # coalesced per-layer vector rows (BERT)

BF = jnp.bfloat16
F32 = jnp.float32


# ----------------------- in-kernel helpers -----------------------
def _ln_pad(x, g, b, eps, d_real):
    """LayerNorm over the real `d_real` features of a lane-padded activation.

    Padded lanes of x are exactly zero, so sum(x)/d_real and sum(x*x)/d_real are
    the real-feature moments; gamma/beta are zero in the padding so it stays zero.
    """
    s1 = jnp.sum(x, axis=-1, keepdims=True)
    s2 = jnp.sum(x * x, axis=-1, keepdims=True)
    mu = s1 / d_real
    var = jnp.maximum(s2 / d_real - mu * mu, 0.0)
    return (x - mu) * jax.lax.rsqrt(var + eps) * g + b


def _mm(a16, w16):
    """[..., K] @ [K, N] -> [..., N] f32 (bf16 MXU operands, f32 accumulate)."""
    lead = a16.shape[:-1]
    out = jnp.dot(a16.reshape(-1, a16.shape[-1]), w16,
                  preferred_element_type=F32)
    return out.reshape(lead + (w16.shape[-1],))


def _attention(xq16, xkv16, qkv_w_ref, qkv_b, o_w_ref, o_b, heads, dh_real,
               mask_row=None):
    """Multi-head attention on lane-padded, head-blocked activations.

    xq16/xkv16: [Bh, Sq/Sk, DP] bf16.  qkv_w_ref: [3, DP, DP] ref (bf16), output
    columns head-blocked (head h's real dims at lanes [h*DHP, h*DHP+dh_real)).
    qkv_b: [3, DP] f32 same layout.  o_w_ref: [DP, DP] ref, input rows head-blocked.
    Per-head scores contract over the 32-lane head slot (true per-head matmuls).
    """
    dp = xq16.shape[-1]
    dhp = dp // heads
    scale = dh_real ** -0.5
    q = _mm(xq16, qkv_w_ref[0]) + qkv_b[0]
    k = _mm(xkv16, qkv_w_ref[1]) + qkv_b[1]
    v = _mm(xkv16, qkv_w_ref[2]) + qkv_b[2]
    heads_out = []
    for h in range(heads):
        sl = slice(h * dhp, (h + 1) * dhp)
        qh = q[:, :, sl].astype(BF)
        kh = k[:, :, sl].astype(BF)
        vh = v[:, :, sl].astype(BF)
        s = jnp.einsum('bqe,bke->bqk', qh, kh,
                       preferred_element_type=F32) * scale
        if mask_row is not None:
            s = s + mask_row
        s = s - jnp.max(s, axis=-1, keepdims=True)
        p = jnp.exp(s)
        p = p * pl.reciprocal(jnp.sum(p, axis=-1, keepdims=True), approx=True)
        heads_out.append(jnp.einsum('bqk,bke->bqe', p.astype(BF), vh,
                                    preferred_element_type=F32))
    o = jnp.concatenate(heads_out, axis=-1).astype(BF)   # [Bh, Sq, DP] head-blocked
    return _mm(o, o_w_ref[...]) + o_b


# ----------------------- fused ViT-layers kernel -----------------------
def _vit_layers_kernel(patch_ref, patch_w_ref, pos_ref,
                       qkv_w_ref, proj_w_ref, fc1_w_ref, fc2_w_ref,
                       vec_ref, fin_ref,
                       o_ref, x_sc, *, heads, dh_real, d_real, eps):
    l = pl.program_id(1)
    bh, s, dp = x_sc.shape

    @pl.when(l == 0)
    def _():
        # Patch-embed conv (kernel == stride == P) as a matmul, fused into the
        # first layer step.  cls token and patch bias are pre-folded into pos_ref.
        emb = _mm(patch_ref[...], patch_w_ref[...])          # [bh, N_PATCH, DP]
        x0 = jnp.concatenate([jnp.zeros((bh, 1, dp), F32), emb], axis=1)
        x_sc[...] = x0 + pos_ref[...][None]

    x = x_sc[...]
    vec = vec_ref[...]

    # --- pre-LN multi-head self-attention (no mask in ViT) ---
    h16 = _ln_pad(x, vec[0], vec[1], eps, d_real).astype(BF)
    x = x + _attention(h16, h16, qkv_w_ref, vec[2:5],
                       proj_w_ref, vec[5], heads, dh_real)

    # --- pre-LN MLP ---
    # TODO(synk): PyTorch nn.GELU() uses exact erf; tanh-approx (EUP-friendly) here.
    h16 = _ln_pad(x, vec[6], vec[7], eps, d_real).astype(BF)
    mid = jax.nn.gelu(_mm(h16, fc1_w_ref[...]) + vec[8], approximate=True)
    x = x + _mm(mid.astype(BF), fc2_w_ref[...]) + vec[9]

    x_sc[...] = x

    @pl.when(l == pl.num_programs(1) - 1)
    def _():
        fin = fin_ref[...]
        o_ref[...] = _ln_pad(x, fin[0], fin[1], eps, d_real).astype(o_ref.dtype)


def vit_layers(patches, w):
    b = patches.shape[0]
    assert b % PAR == 0
    bh = b // PAR

    def bmap(p, l): return (p, 0, 0)
    def wmap3(p, l): return (l, 0, 0)
    def wmap4(p, l): return (l, 0, 0, 0)
    def cmap(p, l): return (0, 0)

    return pl.pallas_call(
        functools.partial(_vit_layers_kernel, heads=VIT_HEADS, dh_real=DH_V,
                          d_real=D, eps=1e-6),
        grid=(PAR, VIT_DEPTH),
        in_specs=[
            pl.BlockSpec((bh, N_PATCH, KPATCH_PAD), bmap),   # patches (bf16)
            pl.BlockSpec((KPATCH_PAD, DP), cmap),            # patch-embed weight
            pl.BlockSpec((S_IMG, DP), cmap),                 # pos (+cls, +patch bias)
            pl.BlockSpec((None, 3, DP, DP), wmap4),          # q/k/v weights
            pl.BlockSpec((None, DP, DP), wmap3),             # attn out weight
            pl.BlockSpec((None, DP, MLP), wmap3),            # fc1
            pl.BlockSpec((None, MLP, DP), wmap3),            # fc2
            pl.BlockSpec((None, NV_VIT, DP), wmap3),         # coalesced LN/bias rows
            pl.BlockSpec((2, DP), cmap),                     # final LN gamma/beta
        ],
        out_specs=pl.BlockSpec((bh, S_IMG, DP), bmap),
        out_shape=jax.ShapeDtypeStruct((b, S_IMG, DP), jnp.bfloat16),
        scratch_shapes=[pltpu.VMEM((bh, S_IMG, DP), jnp.float32)],
        compiler_params=pltpu.CompilerParams(
            dimension_semantics=("parallel", "arbitrary"),
            vmem_limit_bytes=32 * 1024 * 1024),
    )(patches, w["patch_w"], w["pos_cls"], w["qkv_w"], w["proj_w"],
      w["fc1_w"], w["fc2_w"], w["vec"], w["final"])


# ----------------------- fused BERT-layers kernel -----------------------
def _bert_layers_kernel(x_ref, enc_ref, mask_ref, embln_ref,
                        s_qkv_w_ref, s_o_w_ref, c_qkv_w_ref, c_o_w_ref,
                        i_w_ref, o_w_ref, vec_ref,
                        out_ref, x_sc, *, heads, dh_real, d_real, eps):
    l = pl.program_id(1)

    # Embedding LayerNorm fused into the first layer step.
    @pl.when(l == 0)
    def _():
        e = embln_ref[...]
        x_sc[...] = _ln_pad(x_ref[...], e[0], e[1], eps, d_real)

    x = x_sc[...]
    vec = vec_ref[...]
    enc16 = enc_ref[...]          # [bh, S_IMG, DP] bf16 image features
    mrow = mask_ref[...]          # [bh, 1, S] additive self-attention mask row

    # --- self-attention (post-LN residual) ---
    x16 = x.astype(BF)
    a = _attention(x16, x16, s_qkv_w_ref, vec[0:3],
                   s_o_w_ref, vec[3], heads, dh_real, mask_row=mrow)
    x = _ln_pad(a + x, vec[4], vec[5], eps, d_real)

    # --- cross-attention over image features (all-ones encoder mask -> none) ---
    a = _attention(x.astype(BF), enc16, c_qkv_w_ref, vec[6:9],
                   c_o_w_ref, vec[9], heads, dh_real)
    x = _ln_pad(a + x, vec[10], vec[11], eps, d_real)

    # --- FFN (post-LN residual) ---
    mid = jax.nn.gelu(_mm(x.astype(BF), i_w_ref[...]) + vec[12], approximate=True)
    a = _mm(mid.astype(BF), o_w_ref[...]) + vec[13]
    x = _ln_pad(a + x, vec[14], vec[15], eps, d_real)

    x_sc[...] = x

    @pl.when(l == pl.num_programs(1) - 1)
    def _():
        out_ref[...] = x


def bert_layers(x0, enc16, self_mask, w):
    b = x0.shape[0]
    assert b % PAR == 0
    bh = b // PAR

    def bmap(p, l): return (p, 0, 0)
    def wmap3(p, l): return (l, 0, 0)
    def wmap4(p, l): return (l, 0, 0, 0)
    def cmap(p, l): return (0, 0)

    return pl.pallas_call(
        functools.partial(_bert_layers_kernel, heads=BERT_HEADS, dh_real=DH_B,
                          d_real=D, eps=1e-12),
        grid=(PAR, BERT_LAYERS),
        in_specs=[
            pl.BlockSpec((bh, TXT_SEQ, DP), bmap),    # token embeddings (f32)
            pl.BlockSpec((bh, S_IMG, DP), bmap),      # image features (bf16)
            pl.BlockSpec((bh, 1, TXT_SEQ), bmap),     # additive self-attn mask row
            pl.BlockSpec((2, DP), cmap),              # embedding LN
            pl.BlockSpec((None, 3, DP, DP), wmap4),   # self q/k/v weights
            pl.BlockSpec((None, DP, DP), wmap3),      # self out weight
            pl.BlockSpec((None, 3, DP, DP), wmap4),   # cross q/k/v weights
            pl.BlockSpec((None, DP, DP), wmap3),      # cross out weight
            pl.BlockSpec((None, DP, INTER), wmap3),   # FFN in
            pl.BlockSpec((None, INTER, DP), wmap3),   # FFN out
            pl.BlockSpec((None, NV_BERT, DP), wmap3), # coalesced LN/bias rows
        ],
        out_specs=pl.BlockSpec((bh, TXT_SEQ, DP), bmap),
        out_shape=jax.ShapeDtypeStruct((b, TXT_SEQ, DP), jnp.float32),
        scratch_shapes=[pltpu.VMEM((bh, TXT_SEQ, DP), jnp.float32)],
        compiler_params=pltpu.CompilerParams(
            dimension_semantics=("parallel", "arbitrary"),
            vmem_limit_bytes=32 * 1024 * 1024),
    )(x0, enc16, self_mask, w["emb_ln"], w["s_qkv_w"], w["s_o_w"],
      w["c_qkv_w"], w["c_o_w"], w["i_w"], w["o_w"], w["vec"])


# ----------------------- padding / layout helpers (JAX glue) -----------------------
def _pad_vec(v, to=DP):
    return jnp.pad(v, (0, to - v.shape[0]))


def _pad_in(w, to=DP):      # zero-pad the input (row) dim
    return jnp.pad(w, ((0, to - w.shape[0]), (0, 0)))


def _pad_out(w, to=DP):     # zero-pad the output (col) dim
    return jnp.pad(w, ((0, 0), (0, to - w.shape[1])))


def _head_cols(w, heads, dhp):
    # [in, heads*dh] -> [in, heads*dhp]: per-head zero padding of output columns
    i, o = w.shape
    dh = o // heads
    w = w.reshape(i, heads, dh)
    w = jnp.pad(w, ((0, 0), (0, 0), (0, dhp - dh)))
    return w.reshape(i, heads * dhp)


def _head_rows(w, heads, dhp):
    # [heads*dh, out] -> [heads*dhp, out]: per-head zero padding of input rows
    i, o = w.shape
    dh = i // heads
    w = w.reshape(heads, dh, o)
    w = jnp.pad(w, ((0, 0), (0, dhp - dh), (0, 0)))
    return w.reshape(heads * dhp, o)


def _head_vec(b, heads, dhp):
    dh = b.shape[0] // heads
    return jnp.pad(b.reshape(heads, dh), ((0, 0), (0, dhp - dh))).reshape(heads * dhp)


# ----------------------- parameter init (deterministic, synthetic) -----------------------
def init_params(key):
    keys = iter(jax.random.split(key, 128))

    def nrm(shape):
        return 0.02 * jax.random.normal(next(keys), shape, jnp.float32)

    one_d = _pad_vec(jnp.ones((D,), jnp.float32))
    zero = jnp.zeros((DP,), jnp.float32)

    # --- ViT patch embed / cls / pos ---
    patch_w = jnp.pad(nrm((KPATCH, D)), ((0, KPATCH_PAD - KPATCH), (0, DP - D)))
    cls = nrm((D,))
    pos = nrm((S_IMG, D))
    patch_b = nrm((D,))
    pos_cls = pos.at[0].add(cls).at[1:].add(patch_b)     # fold cls + patch bias into pos
    pos_cls = jnp.pad(pos_cls, ((0, 0), (0, DP - D)))

    # --- ViT layer stacks ---
    qkv_w, proj_w, fc1_w, fc2_w, vit_vec = [], [], [], [], []
    for _ in range(VIT_DEPTH):
        qkv_w.append(jnp.stack(
            [_pad_in(_head_cols(nrm((D, D)), VIT_HEADS, DHP_V)) for _ in range(3)]))
        proj_w.append(_pad_out(_head_rows(nrm((D, D)), VIT_HEADS, DHP_V)))
        fc1_w.append(_pad_in(nrm((D, MLP))))
        fc2_w.append(_pad_out(nrm((MLP, D))))
        vit_vec.append(jnp.stack([
            one_d, zero,                                   # ln1 gamma / beta
            _head_vec(nrm((D,)), VIT_HEADS, DHP_V),        # q bias (head-blocked)
            _head_vec(nrm((D,)), VIT_HEADS, DHP_V),        # k bias
            _head_vec(nrm((D,)), VIT_HEADS, DHP_V),        # v bias
            _pad_vec(nrm((D,))),                           # proj bias
            one_d, zero,                                   # ln2 gamma / beta
            nrm((MLP,)),                                   # fc1 bias (MLP == DP here)
            _pad_vec(nrm((D,))),                           # fc2 bias
        ]))
    vit = {
        "patch_w": patch_w.astype(BF),
        "pos_cls": pos_cls,
        "qkv_w": jnp.stack(qkv_w).astype(BF),
        "proj_w": jnp.stack(proj_w).astype(BF),
        "fc1_w": jnp.stack(fc1_w).astype(BF),
        "fc2_w": jnp.stack(fc2_w).astype(BF),
        "vec": jnp.stack(vit_vec),
        "final": jnp.stack([one_d, zero]),
    }

    # --- BERT embeddings ---
    word_emb = jnp.pad(nrm((VOCAB, D)), ((0, 0), (0, DP - D)))
    pos_emb = jnp.pad(nrm((MAX_POS, D)), ((0, 0), (0, DP - D)))
    type_emb = jnp.pad(nrm((2, D)), ((0, 0), (0, DP - D)))

    # --- BERT layer stacks ---
    s_qkv, s_o, c_qkv, c_o, i_w, o_w, bvec = [], [], [], [], [], [], []
    for _ in range(BERT_LAYERS):
        s_qkv.append(jnp.stack(
            [_pad_in(_head_cols(nrm((D, D)), BERT_HEADS, DHP_B)) for _ in range(3)]))
        s_o.append(_pad_out(_head_rows(nrm((D, D)), BERT_HEADS, DHP_B)))
        c_qkv.append(jnp.stack(
            [_pad_in(_head_cols(nrm((D, D)), BERT_HEADS, DHP_B)) for _ in range(3)]))
        c_o.append(_pad_out(_head_rows(nrm((D, D)), BERT_HEADS, DHP_B)))
        i_w.append(_pad_in(nrm((D, INTER))))
        o_w.append(_pad_out(nrm((INTER, D))))
        bvec.append(jnp.stack([
            _head_vec(nrm((D,)), BERT_HEADS, DHP_B),       # self q bias
            _head_vec(nrm((D,)), BERT_HEADS, DHP_B),       # self k bias
            _head_vec(nrm((D,)), BERT_HEADS, DHP_B),       # self v bias
            _pad_vec(nrm((D,))),                           # self out bias
            one_d, zero,                                   # self-out LN
            _head_vec(nrm((D,)), BERT_HEADS, DHP_B),       # cross q bias
            _head_vec(nrm((D,)), BERT_HEADS, DHP_B),       # cross k bias
            _head_vec(nrm((D,)), BERT_HEADS, DHP_B),       # cross v bias
            _pad_vec(nrm((D,))),                           # cross out bias
            one_d, zero,                                   # cross-out LN
            nrm((INTER,)),                                 # FFN in bias (INTER == DP here)
            _pad_vec(nrm((D,))),                           # FFN out bias
            one_d, zero,                                   # output LN
        ]))
    bert = {
        "word_emb": word_emb, "pos_emb": pos_emb, "type_emb": type_emb,
        "emb_ln": jnp.stack([one_d, zero]),
        "s_qkv_w": jnp.stack(s_qkv).astype(BF),
        "s_o_w": jnp.stack(s_o).astype(BF),
        "c_qkv_w": jnp.stack(c_qkv).astype(BF),
        "c_o_w": jnp.stack(c_o).astype(BF),
        "i_w": jnp.stack(i_w).astype(BF),
        "o_w": jnp.stack(o_w).astype(BF),
        "vec": jnp.stack(bvec),
    }
    return {"vit": vit, "bert": bert}


# ----------------------- model forward (glue around Pallas kernels) -----------------------
def vit_forward(params, image):
    b = image.shape[0]
    nh, nw = IMG // P, IMG // P
    # patch-embed conv (kernel=stride=P) rewritten as patch extraction; the matmul
    # itself is fused into the l==0 step of the ViT layer kernel.
    patches = (image.reshape(b, C, nh, P, nw, P)
               .transpose(0, 2, 4, 1, 3, 5)
               .reshape(b, nh * nw, KPATCH))
    patches = jnp.pad(patches, ((0, 0), (0, 0), (0, KPATCH_PAD - KPATCH)))
    return vit_layers(patches.astype(BF), params["vit"])   # [B, S_IMG, DP] bf16


def bert_forward(params, input_ids, attention_mask, enc16):
    s = input_ids.shape[1]
    bw = params["bert"]
    # TODO(synk): embedding row-gather has no tidy Pallas equivalent at this size; jnp.take glue.
    x0 = (jnp.take(bw["word_emb"], input_ids, axis=0)
          + bw["pos_emb"][:s][None]
          + bw["type_emb"][0][None, None])
    # additive self-attention mask, one row per batch element, broadcast in-kernel
    self_mask = ((1.0 - attention_mask.astype(jnp.float32)) * -10000.0)[:, None, :]
    return bert_layers(x0, enc16, self_mask, bw)


def blip_forward(params, image, input_ids, attention_mask):
    # TODO(synk): BertTokenizer has no Pallas/JAX equivalent; token ids arrive pre-tokenized.
    input_ids = input_ids.at[:, 0].set(ENC_TOKEN_ID)   # text.input_ids[:, 0] = enc_token_id
    image_feats = vit_forward(params, image)           # [B, S_IMG, DP] bf16, lane-padded
    # image_mask is all-ones in the reference -> additive cross mask is zero, dropped in-kernel.
    hidden = bert_forward(params, input_ids, attention_mask, image_feats)
    return hidden[:, :, :D]                            # strip lane padding -> last_hidden_state


if __name__ == "__main__":
    key = jax.random.PRNGKey(0)
    pkey, ikey, tkey = jax.random.split(key, 3)

    params = init_params(pkey)
    image = jax.random.normal(ikey, (B, C, IMG, IMG), jnp.float32)          # NCHW
    input_ids = jax.random.randint(tkey, (B, TXT_SEQ), 0, VOCAB, dtype=jnp.int32)
    attention_mask = jnp.ones((B, TXT_SEQ), jnp.int32)

    out = jax.jit(blip_forward)(params, image, input_ids, attention_mask)
    out = jax.block_until_ready(out)
    assert out.shape == (B, TXT_SEQ, D) and out.dtype == jnp.float32
    print("KERNEL_OK")
</pallas_src>

<mosaic_0001>
module attributes {stable_mosaic.version = 11 : i64} {
  func.func @_vit_layers_kernel(%arg0: i32, %arg1: i32, %arg2: memref<1x16x128xbf16, #tpu.memory_space<vmem>>, %arg3: memref<128x128xbf16, #tpu.memory_space<vmem>>, %arg4: memref<17x128xf32, #tpu.memory_space<vmem>>, %arg5: memref<1x3x128x128xbf16, #tpu.memory_space<vmem>>, %arg6: memref<1x128x128xbf16, #tpu.memory_space<vmem>>, %arg7: memref<1x128x128xbf16, #tpu.memory_space<vmem>>, %arg8: memref<1x128x128xbf16, #tpu.memory_space<vmem>>, %arg9: memref<1x10x128xf32, #tpu.memory_space<vmem>>, %arg10: memref<2x128xf32, #tpu.memory_space<vmem>>, %arg11: memref<1x17x128xbf16, #tpu.memory_space<vmem>>, %arg12: memref<1x17x128xf32, #tpu.memory_space<vmem>>) attributes {dimension_semantics = [#tpu.dimension_semantics<parallel>, #tpu.dimension_semantics<arbitrary>], iteration_bounds = array<i64: 2, 2>, scalar_prefetch = 0 : i64, scratch_operands = 1 : i64, tpu.core_type = #tpu.core_type<tc>, window_params = [{transform_indices = @transform_0, window_bounds = array<i64: 1, 16, 128>}, {pipeline_mode = #tpu.pipeline_mode<synchronous>, transform_indices = @transform_1, window_bounds = array<i64: 128, 128>}, {pipeline_mode = #tpu.pipeline_mode<synchronous>, transform_indices = @transform_2, window_bounds = array<i64: 17, 128>}, {transform_indices = @transform_3, window_bounds = array<i64: 1, 3, 128, 128>}, {transform_indices = @transform_4, window_bounds = array<i64: 1, 128, 128>}, {transform_indices = @transform_5, window_bounds = array<i64: 1, 128, 128>}, {transform_indices = @transform_6, window_bounds = array<i64: 1, 128, 128>}, {transform_indices = @transform_7, window_bounds = array<i64: 1, 10, 128>}, {pipeline_mode = #tpu.pipeline_mode<synchronous>, transform_indices = @transform_8, window_bounds = array<i64: 2, 128>}, {transform_indices = @transform_9, window_bounds = array<i64: 1, 17, 128>}]} {
    %c0_i32 = arith.constant 0 : i32
    %0 = arith.cmpi eq, %arg1, %c0_i32 : i32
    %1 = arith.extui %0 : i1 to i32
    %c0_i32_0 = arith.constant 0 : i32
    %2 = arith.cmpi ne, %1, %c0_i32_0 : i32
    scf.if %2 {
      %c0_70 = arith.constant 0 : index
      %c0_71 = arith.constant 0 : index
      %c0_72 = arith.constant 0 : index
      %235 = vector.load %arg2[%c0_70, %c0_71, %c0_72] : memref<1x16x128xbf16, #tpu.memory_space<vmem>>, vector<1x16x128xbf16>
      %c0_73 = arith.constant 0 : index
      %c0_74 = arith.constant 0 : index
      %236 = vector.load %arg3[%c0_73, %c0_74] : memref<128x128xbf16, #tpu.memory_space<vmem>>, vector<128x128xbf16>
      %237 = vector.shape_cast %235 : vector<1x16x128xbf16> to vector<16x128xbf16>
      %cst_75 = arith.constant dense<0.000000e+00> : vector<16x128xf32>
      %238 = tpu.matmul %237, %236, %cst_75 {dimension_numbers = #tpu.dot_dimension_numbers<[1], [0], [0], [1], [0, 0, 1, 1], [], []>} : vector<16x128xbf16>, vector<128x128xbf16>, vector<16x128xf32> -> vector<16x128xf32>
      %239 = vector.shape_cast %238 : vector<16x128xf32> to vector<1x16x128xf32>
      %cst_76 = arith.constant 0.000000e+00 : f32
      %240 = vector.broadcast %cst_76 : f32 to vector<1x1x128xf32>
      %241 = tpu.concatenate %240, %239 in 1 : vector<1x1x128xf32>, vector<1x16x128xf32> -> vector<1x17x128xf32>
      %c0_77 = arith.constant 0 : index
      %c0_78 = arith.constant 0 : index
      %242 = vector.load %arg4[%c0_77, %c0_78] : memref<17x128xf32, #tpu.memory_space<vmem>>, vector<17x128xf32>
      %243 = vector.shape_cast %242 : vector<17x128xf32> to vector<1x17x128xf32>
      %244 = arith.addf %241, %243 : vector<1x17x128xf32>
      %c0_79 = arith.constant 0 : index
      %c0_80 = arith.constant 0 : index
      %c0_81 = arith.constant 0 : index
      %245 = vector.load %arg12[%c0_79, %c0_80, %c0_81] : memref<1x17x128xf32, #tpu.memory_space<vmem>>, vector<1x17x128xf32>
      tpu.vector_store %arg12[%c0_79, %c0_80, %c0_81], %244 {strides = array<i32>} : memref<1x17x128xf32, #tpu.memory_space<vmem>>, vector<1x17x128xf32>,
    } else {
    }
    %c0 = arith.constant 0 : index
    %c0_1 = arith.constant 0 : index
    %c0_2 = arith.constant 0 : index
    %3 = vector.load %arg12[%c0, %c0_1, %c0_2] : memref<1x17x128xf32, #tpu.memory_space<vmem>>, vector<1x17x128xf32>
    %c0_3 = arith.constant 0 : index
    %c0_4 = arith.constant 0 : index
    %c0_5 = arith.constant 0 : index
    %4 = vector.load %arg9[%c0_3, %c0_4, %c0_5] : memref<1x10x128xf32, #tpu.memory_space<vmem>>, vector<1x10x128xf32>
    %5 = vector.shape_cast %4 : vector<1x10x128xf32> to vector<10x128xf32>
    %6 = vector.extract_strided_slice %5 {offsets = [0, 0], sizes = [1, 128], strides = [1, 1]} : vector<10x128xf32> to vector<1x128xf32>
    %7 = vector.shape_cast %6 : vector<1x128xf32> to vector<128xf32>
    %8 = vector.extract_strided_slice %5 {offsets = [1, 0], sizes = [1, 128], strides = [1, 1]} : vector<10x128xf32> to vector<1x128xf32>
    %9 = vector.shape_cast %8 : vector<1x128xf32> to vector<128xf32>
    %cst = arith.constant dense<0.000000e+00> : vector<1x17xf32>
    %10 = vector.multi_reduction <add>, %3, %cst [2] : vector<1x17x128xf32> to vector<1x17xf32>
    %11 = vector.shape_cast %10 : vector<1x17xf32> to vector<1x17x1xf32>
    %12 = arith.mulf %3, %3 : vector<1x17x128xf32>
    %cst_6 = arith.constant dense<0.000000e+00> : vector<1x17xf32>
    %13 = vector.multi_reduction <add>, %12, %cst_6 [2] : vector<1x17x128xf32> to vector<1x17xf32>
    %14 = vector.shape_cast %13 : vector<1x17xf32> to vector<1x17x1xf32>
    %cst_7 = arith.constant 3.200000e+01 : f32
    %15 = vector.broadcast %cst_7 : f32 to vector<1x17x1xf32>
    %16 = arith.divf %11, %15 : vector<1x17x1xf32>
    %cst_8 = arith.constant 3.200000e+01 : f32
    %17 = vector.broadcast %cst_8 : f32 to vector<1x17x1xf32>
    %18 = arith.divf %14, %17 : vector<1x17x1xf32>
    %19 = arith.mulf %16, %16 : vector<1x17x1xf32>
    %20 = arith.subf %18, %19 : vector<1x17x1xf32>
    %cst_9 = arith.constant 0.000000e+00 : f32
    %21 = vector.broadcast %cst_9 : f32 to vector<1x17x1xf32>
    %22 = arith.maximumf %20, %21 : vector<1x17x1xf32>
    %23 = vector.broadcast %16 : vector<1x17x1xf32> to vector<1x17x128xf32>
    %24 = arith.subf %3, %23 : vector<1x17x128xf32>
    %cst_10 = arith.constant 9.99999997E-7 : f32
    %25 = vector.broadcast %cst_10 : f32 to vector<1x17x1xf32>
    %26 = arith.addf %22, %25 : vector<1x17x1xf32>
    %27 = math.rsqrt %26 : vector<1x17x1xf32>
    %28 = vector.broadcast %27 : vector<1x17x1xf32> to vector<1x17x128xf32>
    %29 = arith.mulf %24, %28 : vector<1x17x128xf32>
    %30 = vector.shape_cast %7 : vector<128xf32> to vector<1x1x128xf32>
    %31 = vector.broadcast %30 : vector<1x1x128xf32> to vector<1x17x128xf32>
    %32 = arith.mulf %29, %31 : vector<1x17x128xf32>
    %33 = vector.shape_cast %9 : vector<128xf32> to vector<1x1x128xf32>
    %34 = vector.broadcast %33 : vector<1x1x128xf32> to vector<1x17x128xf32>
    %35 = arith.addf %32, %34 : vector<1x17x128xf32>
    %36 = arith.truncf %35 : vector<1x17x128xf32> to vector<1x17x128xbf16>
    %37 = vector.extract_strided_slice %5 {offsets = [2, 0], sizes = [3, 128], strides = [1, 1]} : vector<10x128xf32> to vector<3x128xf32>
    %38 = vector.extract_strided_slice %5 {offsets = [5, 0], sizes = [1, 128], strides = [1, 1]} : vector<10x128xf32> to vector<1x128xf32>
    %39 = vector.shape_cast %38 : vector<1x128xf32> to vector<128xf32>
    %c0_11 = arith.constant 0 : index
    %c0_12 = arith.constant 0 : index
    %c0_13 = arith.constant 0 : index
    %c0_14 = arith.constant 0 : index
    %40 = vector.load %arg5[%c0_11, %c0_12, %c0_13, %c0_14] : memref<1x3x128x128xbf16, #tpu.memory_space<vmem>>, vector<1x1x128x128xbf16>
    %41 = vector.shape_cast %40 : vector<1x1x128x128xbf16> to vector<128x128xbf16>
    %42 = vector.shape_cast %36 : vector<1x17x128xbf16> to vector<17x128xbf16>
    %cst_15 = arith.constant dense<0.000000e+00> : vector<17x128xf32>
    %43 = tpu.matmul %42, %41, %cst_15 {dimension_numbers = #tpu.dot_dimension_numbers<[1], [0], [0], [1], [0, 0, 1, 1], [], []>} : vector<17x128xbf16>, vector<128x128xbf16>, vector<17x128xf32> -> vector<17x128xf32>
    %44 = vector.shape_cast %43 : vector<17x128xf32> to vector<1x17x128xf32>
    %45 = vector.extract_strided_slice %37 {offsets = [0, 0], sizes = [1, 128], strides = [1, 1]} : vector<3x128xf32> to vector<1x128xf32>
    %46 = vector.shape_cast %45 : vector<1x128xf32> to vector<128xf32>
    %47 = vector.shape_cast %46 : vector<128xf32> to vector<1x1x128xf32>
    %48 = vector.broadcast %47 : vector<1x1x128xf32> to vector<1x17x128xf32>
    %49 = arith.addf %44, %48 : vector<1x17x128xf32>
    %c0_16 = arith.constant 0 : index
    %c1 = arith.constant 1 : index
    %c0_17 = arith.constant 0 : index
    %c0_18 = arith.constant 0 : index
    %50 = vector.load %arg5[%c0_16, %c1, %c0_17, %c0_18] : memref<1x3x128x128xbf16, #tpu.memory_space<vmem>>, vector<1x1x128x128xbf16>
    %51 = vector.shape_cast %50 : vector<1x1x128x128xbf16> to vector<128x128xbf16>
    %52 = vector.shape_cast %36 : vector<1x17x128xbf16> to vector<17x128xbf16>
    %cst_19 = arith.constant dense<0.000000e+00> : vector<17x128xf32>
    %53 = tpu.matmul %52, %51, %cst_19 {dimension_numbers = #tpu.dot_dimension_numbers<[1], [0], [0], [1], [0, 0, 1, 1], [], []>} : vector<17x128xbf16>, vector<128x128xbf16>, vector<17x128xf32> -> vector<17x128xf32>
    %54 = vector.shape_cast %53 : vector<17x128xf32> to vector<1x17x128xf32>
    %55 = vector.extract_strided_slice %37 {offsets = [1, 0], sizes = [1, 128], strides = [1, 1]} : vector<3x128xf32> to vector<1x128xf32>
    %56 = vector.shape_cast %55 : vector<1x128xf32> to vector<128xf32>
    %57 = vector.shape_cast %56 : vector<128xf32> to vector<1x1x128xf32>
    %58 = vector.broadcast %57 : vector<1x1x128xf32> to vector<1x17x128xf32>
    %59 = arith.addf %54, %58 : vector<1x17x128xf32>
    %c0_20 = arith.constant 0 : index
    %c2 = arith.constant 2 : index
    %c0_21 = arith.constant 0 : index
    %c0_22 = arith.constant 0 : index
    %60 = vector.load %arg5[%c0_20, %c2, %c0_21, %c0_22] : memref<1x3x128x128xbf16, #tpu.memory_space<vmem>>, vector<1x1x128x128xbf16>
    %61 = vector.shape_cast %60 : vector<1x1x128x128xbf16> to vector<128x128xbf16>
    %62 = vector.shape_cast %36 : vector<1x17x128xbf16> to vector<17x128xbf16>
    %cst_23 = arith.constant dense<0.000000e+00> : vector<17x128xf32>
    %63 = tpu.matmul %62, %61, %cst_23 {dimension_numbers = #tpu.dot_dimension_numbers<[1], [0], [0], [1], [0, 0, 1, 1], [], []>} : vector<17x128xbf16>, vector<128x128xbf16>, vector<17x128xf32> -> vector<17x128xf32>
    %64 = vector.shape_cast %63 : vector<17x128xf32> to vector<1x17x128xf32>
    %65 = vector.extract_strided_slice %37 {offsets = [2, 0], sizes = [1, 128], strides = [1, 1]} : vector<3x128xf32> to vector<1x128xf32>
    %66 = vector.shape_cast %65 : vector<1x128xf32> to vector<128xf32>
    %67 = vector.shape_cast %66 : vector<128xf32> to vector<1x1x128xf32>
    %68 = vector.broadcast %67 : vector<1x1x128xf32> to vector<1x17x128xf32>
    %69 = arith.addf %64, %68 : vector<1x17x128xf32>
    %70 = vector.extract_strided_slice %49 {offsets = [0, 0, 0], sizes = [1, 17, 32], strides = [1, 1, 1]} : vector<1x17x128xf32> to vector<1x17x32xf32>
    %71 = arith.truncf %70 : vector<1x17x32xf32> to vector<1x17x32xbf16>
    %72 = vector.extract_strided_slice %59 {offsets = [0, 0, 0], sizes = [1, 17, 32], strides = [1, 1, 1]} : vector<1x17x128xf32> to vector<1x17x32xf32>
    %73 = arith.truncf %72 : vector<1x17x32xf32> to vector<1x17x32xbf16>
    %74 = vector.extract_strided_slice %69 {offsets = [0, 0, 0], sizes = [1, 17, 32], strides = [1, 1, 1]} : vector<1x17x128xf32> to vector<1x17x32xf32>
    %75 = arith.truncf %74 : vector<1x17x32xf32> to vector<1x17x32xbf16>
    "tpu.trace_start"() <{level = 10 : i32, message = "bqe,bke->bqk"}> : () -> ()
    %cst_24 = arith.constant dense<0.000000e+00> : vector<1x17x17xf32>
    %76 = tpu.matmul %71, %73, %cst_24 {dimension_numbers = #tpu.dot_dimension_numbers<[2], [2], [1], [1], [0, 0, 0, 1, 1, 1], [0], [0]>} : vector<1x17x32xbf16>, vector<1x17x32xbf16>, vector<1x17x17xf32> -> vector<1x17x17xf32>
    "tpu.trace_stop"() : () -> ()
    %cst_25 = arith.constant 0.353553385 : f32
    %77 = vector.broadcast %cst_25 : f32 to vector<1x17x17xf32>
    %78 = arith.mulf %76, %77 : vector<1x17x17xf32>
    %cst_26 = arith.constant dense<0xFF800000> : vector<1x17xf32>
    %79 = vector.multi_reduction <maximumf>, %78, %cst_26 [2] : vector<1x17x17xf32> to vector<1x17xf32>
    %80 = vector.shape_cast %79 : vector<1x17xf32> to vector<1x17x1xf32>
    %81 = vector.broadcast %80 : vector<1x17x1xf32> to vector<1x17x17xf32>
    %82 = arith.subf %78, %81 : vector<1x17x17xf32>
    %83 = math.exp %82 : vector<1x17x17xf32>
    %cst_27 = arith.constant dense<0.000000e+00> : vector<1x17xf32>
    %84 = vector.multi_reduction <add>, %83, %cst_27 [2] : vector<1x17x17xf32> to vector<1x17xf32>
    %85 = vector.shape_cast %84 : vector<1x17xf32> to vector<1x17x1xf32>
    %86 = tpu.reciprocal %85 {approx = true} : vector<1x17x1xf32> -> vector<1x17x1xf32>
    %87 = vector.broadcast %86 : vector<1x17x1xf32> to vector<1x17x17xf32>
    %88 = arith.mulf %83, %87 : vector<1x17x17xf32>
    %89 = arith.truncf %88 : vector<1x17x17xf32> to vector<1x17x17xbf16>
    "tpu.trace_start"() <{level = 10 : i32, message = "bqk,bke->bqe"}> : () -> ()
    %cst_28 = arith.constant dense<0.000000e+00> : vector<1x17x32xf32>
    %90 = tpu.matmul %89, %75, %cst_28 {dimension_numbers = #tpu.dot_dimension_numbers<[2], [1], [1], [2], [0, 0, 0, 1, 1, 2], [0], [0]>} : vector<1x17x17xbf16>, vector<1x17x32xbf16>, vector<1x17x32xf32> -> vector<1x17x32xf32>
    "tpu.trace_stop"() : () -> ()
    %91 = vector.extract_strided_slice %49 {offsets = [0, 0, 32], sizes = [1, 17, 32], strides = [1, 1, 1]} : vector<1x17x128xf32> to vector<1x17x32xf32>
    %92 = arith.truncf %91 : vector<1x17x32xf32> to vector<1x17x32xbf16>
    %93 = vector.extract_strided_slice %59 {offsets = [0, 0, 32], sizes = [1, 17, 32], strides = [1, 1, 1]} : vector<1x17x128xf32> to vector<1x17x32xf32>
    %94 = arith.truncf %93 : vector<1x17x32xf32> to vector<1x17x32xbf16>
    %95 = vector.extract_strided_slice %69 {offsets = [0, 0, 32], sizes = [1, 17, 32], strides = [1, 1, 1]} : vector<1x17x128xf32> to vector<1x17x32xf32>
    %96 = arith.truncf %95 : vector<1x17x32xf32> to vector<1x17x32xbf16>
    "tpu.trace_start"() <{level = 10 : i32, message = "bqe,bke->bqk"}> : () -> ()
    %cst_29 = arith.constant dense<0.000000e+00> : vector<1x17x17xf32>
    %97 = tpu.matmul %92, %94, %cst_29 {dimension_numbers = #tpu.dot_dimension_numbers<[2], [2], [1], [1], [0, 0, 0, 1, 1, 1], [0], [0]>} : vector<1x17x32xbf16>, vector<1x17x32xbf16>, vector<1x17x17xf32> -> vector<1x17x17xf32>
    "tpu.trace_stop"() : () -> ()
    %cst_30 = arith.constant 0.353553385 : f32
    %98 = vector.broadcast %cst_30 : f32 to vector<1x17x17xf32>
    %99 = arith.mulf %97, %98 : vector<1x17x17xf32>
    %cst_31 = arith.constant dense<0xFF800000> : vector<1x17xf32>
    %100 = vector.multi_reduction <maximumf>, %99, %cst_31 [2] : vector<1x17x17xf32> to vector<1x17xf32>
    %101 = vector.shape_cast %100 : vector<1x17xf32> to vector<1x17x1xf32>
    %102 = vector.broadcast %101 : vector<1x17x1xf32> to vector<1x17x17xf32>
    %103 = arith.subf %99, %102 : vector<1x17x17xf32>
    %104 = math.exp %103 : vector<1x17x17xf32>
    %cst_32 = arith.constant dense<0.000000e+00> : vector<1x17xf32>
    %105 = vector.multi_reduction <add>, %104, %cst_32 [2] : vector<1x17x17xf32> to vector<1x17xf32>
    %106 = vector.shape_cast %105 : vector<1x17xf32> to vector<1x17x1xf32>
    %107 = tpu.reciprocal %106 {approx = true} : vector<1x17x1xf32> -> vector<1x17x1xf32>
    %108 = vector.broadcast %107 : vector<1x17x1xf32> to vector<1x17x17xf32>
    %109 = arith.mulf %104, %108 : vector<1x17x17xf32>
    %110 = arith.truncf %109 : vector<1x17x17xf32> to vector<1x17x17xbf16>
    "tpu.trace_start"() <{level = 10 : i32, message = "bqk,bke->bqe"}> : () -> ()
    %cst_33 = arith.constant dense<0.000000e+00> : vector<1x17x32xf32>
    %111 = tpu.matmul %110, %96, %cst_33 {dimension_numbers = #tpu.dot_dimension_numbers<[2], [1], [1], [2], [0, 0, 0, 1, 1, 2], [0], [0]>} : vector<1x17x17xbf16>, vector<1x17x32xbf16>, vector<1x17x32xf32> -> vector<1x17x32xf32>
    "tpu.trace_stop"() : () -> ()
    %112 = vector.extract_strided_slice %49 {offsets = [0, 0, 64], sizes = [1, 17, 32], strides = [1, 1, 1]} : vector<1x17x128xf32> to vector<1x17x32xf32>
    %113 = arith.truncf %112 : vector<1x17x32xf32> to vector<1x17x32xbf16>
    %114 = vector.extract_strided_slice %59 {offsets = [0, 0, 64], sizes = [1, 17, 32], strides = [1, 1, 1]} : vector<1x17x128xf32> to vector<1x17x32xf32>
    %115 = arith.truncf %114 : vector<1x17x32xf32> to vector<1x17x32xbf16>
    %116 = vector.extract_strided_slice %69 {offsets = [0, 0, 64], sizes = [1, 17, 32], strides = [1, 1, 1]} : vector<1x17x128xf32> to vector<1x17x32xf32>
    %117 = arith.truncf %116 : vector<1x17x32xf32> to vector<1x17x32xbf16>
    "tpu.trace_start"() <{level = 10 : i32, message = "bqe,bke->bqk"}> : () -> ()
    %cst_34 = arith.constant dense<0.000000e+00> : vector<1x17x17xf32>
    %118 = tpu.matmul %113, %115, %cst_34 {dimension_numbers = #tpu.dot_dimension_numbers<[2], [2], [1], [1], [0, 0, 0, 1, 1, 1], [0], [0]>} : vector<1x17x32xbf16>, vector<1x17x32xbf16>, vector<1x17x17xf32> -> vector<1x17x17xf32>
    "tpu.trace_stop"() : () -> ()
    %cst_35 = arith.constant 0.353553385 : f32
    %119 = vector.broadcast %cst_35 : f32 to vector<1x17x17xf32>
    %120 = arith.mulf %118, %119 : vector<1x17x17xf32>
    %cst_36 = arith.constant dense<0xFF800000> : vector<1x17xf32>
    %121 = vector.multi_reduction <maximumf>, %120, %cst_36 [2] : vector<1x17x17xf32> to vector<1x17xf32>
    %122 = vector.shape_cast %121 : vector<1x17xf32> to vector<1x17x1xf32>
    %123 = vector.broadcast %122 : vector<1x17x1xf32> to vector<1x17x17xf32>
    %124 = arith.subf %120, %123 : vector<1x17x17xf32>
    %125 = math.exp %124 : vector<1x17x17xf32>
    %cst_37 = arith.constant dense<0.000000e+00> : vector<1x17xf32>
    %126 = vector.multi_reduction <add>, %125, %cst_37 [2] : vector<1x17x17xf32> to vector<1x17xf32>
    %127 = vector.shape_cast %126 : vector<1x17xf32> to vector<1x17x1xf32>
    %128 = tpu.reciprocal %127 {approx = true} : vector<1x17x1xf32> -> vector<1x17x1xf32>
    %129 = vector.broadcast %128 : vector<1x17x1xf32> to vector<1x17x17xf32>
    %130 = arith.mulf %125, %129 : vector<1x17x17xf32>
    %131 = arith.truncf %130 : vector<1x17x17xf32> to vector<1x17x17xbf16>
    "tpu.trace_start"() <{level = 10 : i32, message = "bqk,bke->bqe"}> : () -> ()
    %cst_38 = arith.constant dense<0.000000e+00> : vector<1x17x32xf32>
    %132 = tpu.matmul %131, %117, %cst_38 {dimension_numbers = #tpu.dot_dimension_numbers<[2], [1], [1], [2], [0, 0, 0, 1, 1, 2], [0], [0]>} : vector<1x17x17xbf16>, vector<1x17x32xbf16>, vector<1x17x32xf32> -> vector<1x17x32xf32>
    "tpu.trace_stop"() : () -> ()
    %133 = vector.extract_strided_slice %49 {offsets = [0, 0, 96], sizes = [1, 17, 32], strides = [1, 1, 1]} : vector<1x17x128xf32> to vector<1x17x32xf32>
    %134 = arith.truncf %133 : vector<1x17x32xf32> to vector<1x17x32xbf16>
    %135 = vector.extract_strided_slice %59 {offsets = [0, 0, 96], sizes = [1, 17, 32], strides = [1, 1, 1]} : vector<1x17x128xf32> to vector<1x17x32xf32>
    %136 = arith.truncf %135 : vector<1x17x32xf32> to vector<1x17x32xbf16>
    %137 = vector.extract_strided_slice %69 {offsets = [0, 0, 96], sizes = [1, 17, 32], strides = [1, 1, 1]} : vector<1x17x128xf32> to vector<1x17x32xf32>
    %138 = arith.truncf %137 : vector<1x17x32xf32> to vector<1x17x32xbf16>
    "tpu.trace_start"() <{level = 10 : i32, message = "bqe,bke->bqk"}> : () -> ()
    %cst_39 = arith.constant dense<0.000000e+00> : vector<1x17x17xf32>
    %139 = tpu.matmul %134, %136, %cst_39 {dimension_numbers = #tpu.dot_dimension_numbers<[2], [2], [1], [1], [0, 0, 0, 1, 1, 1], [0], [0]>} : vector<1x17x32xbf16>, vector<1x17x32xbf16>, vector<1x17x17xf32> -> vector<1x17x17xf32>
    "tpu.trace_stop"() : () -> ()
    %cst_40 = arith.constant 0.353553385 : f32
    %140 = vector.broadcast %cst_40 : f32 to vector<1x17x17xf32>
    %141 = arith.mulf %139, %140 : vector<1x17x17xf32>
    %cst_41 = arith.constant dense<0xFF800000> : vector<1x17xf32>
    %142 = vector.multi_reduction <maximumf>, %141, %cst_41 [2] : vector<1x17x17xf32> to vector<1x17xf32>
    %143 = vector.shape_cast %142 : vector<1x17xf32> to vector<1x17x1xf32>
    %144 = vector.broadcast %143 : vector<1x17x1xf32> to vector<1x17x17xf32>
    %145 = arith.subf %141, %144 : vector<1x17x17xf32>
    %146 = math.exp %145 : vector<1x17x17xf32>
    %cst_42 = arith.constant dense<0.000000e+00> : vector<1x17xf32>
    %147 = vector.multi_reduction <add>, %146, %cst_42 [2] : vector<1x17x17xf32> to vector<1x17xf32>
    %148 = vector.shape_cast %147 : vector<1x17xf32> to vector<1x17x1xf32>
    %149 = tpu.reciprocal %148 {approx = true} : vector<1x17x1xf32> -> vector<1x17x1xf32>
    %150 = vector.broadcast %149 : vector<1x17x1xf32> to vector<1x17x17xf32>
    %151 = arith.mulf %146, %150 : vector<1x17x17xf32>
    %152 = arith.truncf %151 : vector<1x17x17xf32> to vector<1x17x17xbf16>
    "tpu.trace_start"() <{level = 10 : i32, message = "bqk,bke->bqe"}> : () -> ()
    %cst_43 = arith.constant dense<0.000000e+00> : vector<1x17x32xf32>
    %153 = tpu.matmul %152, %138, %cst_43 {dimension_numbers = #tpu.dot_dimension_numbers<[2], [1], [1], [2], [0, 0, 0, 1, 1, 2], [0], [0]>} : vector<1x17x17xbf16>, vector<1x17x32xbf16>, vector<1x17x32xf32> -> vector<1x17x32xf32>
    "tpu.trace_stop"() : () -> ()
    %154 = tpu.concatenate %90, %111, %132, %153 in 2 : vector<1x17x32xf32>, vector<1x17x32xf32>, vector<1x17x32xf32>, vector<1x17x32xf32> -> vector<1x17x128xf32>
    %155 = arith.truncf %154 : vector<1x17x128xf32> to vector<1x17x128xbf16>
    %c0_44 = arith.constant 0 : index
    %c0_45 = arith.constant 0 : index
    %c0_46 = arith.constant 0 : index
    %156 = vector.load %arg6[%c0_44, %c0_45, %c0_46] : memref<1x128x128xbf16, #tpu.memory_space<vmem>>, vector<1x128x128xbf16>
    %157 = vector.shape_cast %156 : vector<1x128x128xbf16> to vector<128x128xbf16>
    %158 = vector.shape_cast %155 : vector<1x17x128xbf16> to vector<17x128xbf16>
    %cst_47 = arith.constant dense<0.000000e+00> : vector<17x128xf32>
    %159 = tpu.matmul %158, %157, %cst_47 {dimension_numbers = #tpu.dot_dimension_numbers<[1], [0], [0], [1], [0, 0, 1, 1], [], []>} : vector<17x128xbf16>, vector<128x128xbf16>, vector<17x128xf32> -> vector<17x128xf32>
    %160 = vector.shape_cast %159 : vector<17x128xf32> to vector<1x17x128xf32>
    %161 = vector.shape_cast %39 : vector<128xf32> to vector<1x1x128xf32>
    %162 = vector.broadcast %161 : vector<1x1x128xf32> to vector<1x17x128xf32>
    %163 = arith.addf %160, %162 : vector<1x17x128xf32>
    %164 = arith.addf %3, %163 : vector<1x17x128xf32>
    %165 = vector.extract_strided_slice %5 {offsets = [6, 0], sizes = [1, 128], strides = [1, 1]} : vector<10x128xf32> to vector<1x128xf32>
    %166 = vector.shape_cast %165 : vector<1x128xf32> to vector<128xf32>
    %167 = vector.extract_strided_slice %5 {offsets = [7, 0], sizes = [1, 128], strides = [1, 1]} : vector<10x128xf32> to vector<1x128xf32>
    %168 = vector.shape_cast %167 : vector<1x128xf32> to vector<128xf32>
    %cst_48 = arith.constant dense<0.000000e+00> : vector<1x17xf32>
    %169 = vector.multi_reduction <add>, %164, %cst_48 [2] : vector<1x17x128xf32> to vector<1x17xf32>
    %170 = vector.shape_cast %169 : vector<1x17xf32> to vector<1x17x1xf32>
    %171 = arith.mulf %164, %164 : vector<1x17x128xf32>
    %cst_49 = arith.constant dense<0.000000e+00> : vector<1x17xf32>
    %172 = vector.multi_reduction <add>, %171, %cst_49 [2] : vector<1x17x128xf32> to vector<1x17xf32>
    %173 = vector.shape_cast %172 : vector<1x17xf32> to vector<1x17x1xf32>
    %cst_50 = arith.constant 3.200000e+01 : f32
    %174 = vector.broadcast %cst_50 : f32 to vector<1x17x1xf32>
    %175 = arith.divf %170, %174 : vector<1x17x1xf32>
    %cst_51 = arith.constant 3.200000e+01 : f32
    %176 = vector.broadcast %cst_51 : f32 to vector<1x17x1xf32>
    %177 = arith.divf %173, %176 : vector<1x17x1xf32>
    %178 = arith.mulf %175, %175 : vector<1x17x1xf32>
    %179 = arith.subf %177, %178 : vector<1x17x1xf32>
    %cst_52 = arith.constant 0.000000e+00 : f32
    %180 = vector.broadcast %cst_52 : f32 to vector<1x17x1xf32>
    %181 = arith.maximumf %179, %180 : vector<1x17x1xf32>
    %182 = vector.broadcast %175 : vector<1x17x1xf32> to vector<1x17x128xf32>
    %183 = arith.subf %164, %182 : vector<1x17x128xf32>
    %cst_53 = arith.constant 9.99999997E-7 : f32
    %184 = vector.broadcast %cst_53 : f32 to vector<1x17x1xf32>
    %185 = arith.addf %181, %184 : vector<1x17x1xf32>
    %186 = math.rsqrt %185 : vector<1x17x1xf32>
    %187 = vector.broadcast %186 : vector<1x17x1xf32> to vector<1x17x128xf32>
    %188 = arith.mulf %183, %187 : vector<1x17x128xf32>
    %189 = vector.shape_cast %166 : vector<128xf32> to vector<1x1x128xf32>
    %190 = vector.broadcast %189 : vector<1x1x128xf32> to vector<1x17x128xf32>
    %191 = arith.mulf %188, %190 : vector<1x17x128xf32>
    %192 = vector.shape_cast %168 : vector<128xf32> to vector<1x1x128xf32>
    %193 = vector.broadcast %192 : vector<1x1x128xf32> to vector<1x17x128xf32>
    %194 = arith.addf %191, %193 : vector<1x17x128xf32>
    %195 = arith.truncf %194 : vector<1x17x128xf32> to vector<1x17x128xbf16>
    %c0_54 = arith.constant 0 : index
    %c0_55 = arith.constant 0 : index
    %c0_56 = arith.constant 0 : index
    %196 = vector.load %arg7[%c0_54, %c0_55, %c0_56] : memref<1x128x128xbf16, #tpu.memory_space<vmem>>, vector<1x128x128xbf16>
    %197 = vector.shape_cast %196 : vector<1x128x128xbf16> to vector<128x128xbf16>
    %198 = vector.shape_cast %195 : vector<1x17x128xbf16> to vector<17x128xbf16>
    %cst_57 = arith.constant dense<0.000000e+00> : vector<17x128xf32>
    %199 = tpu.matmul %198, %197, %cst_57 {dimension_numbers = #tpu.dot_dimension_numbers<[1], [0], [0], [1], [0, 0, 1, 1], [], []>} : vector<17x128xbf16>, vector<128x128xbf16>, vector<17x128xf32> -> vector<17x128xf32>
    %200 = vector.shape_cast %199 : vector<17x128xf32> to vector<1x17x128xf32>
    %201 = vector.extract_strided_slice %5 {offsets = [8, 0], sizes = [1, 128], strides = [1, 1]} : vector<10x128xf32> to vector<1x128xf32>
    %202 = vector.shape_cast %201 : vector<1x128xf32> to vector<128xf32>
    %203 = vector.shape_cast %202 : vector<128xf32> to vector<1x1x128xf32>
    %204 = vector.broadcast %203 : vector<1x1x128xf32> to vector<1x17x128xf32>
    %205 = arith.addf %200, %204 : vector<1x17x128xf32>
    %206 = arith.mulf %205, %205 : vector<1x17x128xf32>
    %207 = arith.mulf %205, %206 : vector<1x17x128xf32>
    %cst_58 = arith.constant 4.471500e-02 : f32
    %208 = vector.broadcast %cst_58 : f32 to vector<1x17x128xf32>
    %209 = arith.mulf %208, %207 : vector<1x17x128xf32>
    %210 = arith.addf %205, %209 : vector<1x17x128xf32>
    %cst_59 = arith.constant 0.797884583 : f32
    %211 = vector.broadcast %cst_59 : f32 to vector<1x17x128xf32>
    %212 = arith.mulf %211, %210 : vector<1x17x128xf32>
    %213 = math.tanh %212 : vector<1x17x128xf32>
    %cst_60 = arith.constant 1.000000e+00 : f32
    %214 = vector.broadcast %cst_60 : f32 to vector<1x17x128xf32>
    %215 = arith.addf %214, %213 : vector<1x17x128xf32>
    %cst_61 = arith.constant 5.000000e-01 : f32
    %216 = vector.broadcast %cst_61 : f32 to vector<1x17x128xf32>
    %217 = arith.mulf %216, %215 : vector<1x17x128xf32>
    %218 = arith.mulf %205, %217 : vector<1x17x128xf32>
    %219 = arith.truncf %218 : vector<1x17x128xf32> to vector<1x17x128xbf16>
    %c0_62 = arith.constant 0 : index
    %c0_63 = arith.constant 0 : index
    %c0_64 = arith.constant 0 : index
    %220 = vector.load %arg8[%c0_62, %c0_63, %c0_64] : memref<1x128x128xbf16, #tpu.memory_space<vmem>>, vector<1x128x128xbf16>
    %221 = vector.shape_cast %220 : vector<1x128x128xbf16> to vector<128x128xbf16>
    %222 = vector.shape_cast %219 : vector<1x17x128xbf16> to vector<17x128xbf16>
    %cst_65 = arith.constant dense<0.000000e+00> : vector<17x128xf32>
    %223 = tpu.matmul %222, %221, %cst_65 {dimension_numbers = #tpu.dot_dimension_numbers<[1], [0], [0], [1], [0, 0, 1, 1], [], []>} : vector<17x128xbf16>, vector<128x128xbf16>, vector<17x128xf32> -> vector<17x128xf32>
    %224 = vector.shape_cast %223 : vector<17x128xf32> to vector<1x17x128xf32>
    %225 = arith.addf %164, %224 : vector<1x17x128xf32>
    %226 = vector.extract_strided_slice %5 {offsets = [9, 0], sizes = [1, 128], strides = [1, 1]} : vector<10x128xf32> to vector<1x128xf32>
    %227 = vector.shape_cast %226 : vector<1x128xf32> to vector<128xf32>
    %228 = vector.shape_cast %227 : vector<128xf32> to vector<1x1x128xf32>
    %229 = vector.broadcast %228 : vector<1x1x128xf32> to vector<1x17x128xf32>
    %230 = arith.addf %225, %229 : vector<1x17x128xf32>
    %c0_66 = arith.constant 0 : index
    %c0_67 = arith.constant 0 : index
    %c0_68 = arith.constant 0 : index
    %231 = vector.load %arg12[%c0_66, %c0_67, %c0_68] : memref<1x17x128xf32, #tpu.memory_space<vmem>>, vector<1x17x128xf32>
    tpu.vector_store %arg12[%c0_66, %c0_67, %c0_68], %230 {strides = array<i32>} : memref<1x17x128xf32, #tpu.memory_space<vmem>>, vector<1x17x128xf32>,
    %c1_i32 = arith.constant 1 : i32
    %232 = arith.cmpi eq, %arg1, %c1_i32 : i32
    %233 = arith.extui %232 : i1 to i32
    %c0_i32_69 = arith.constant 0 : i32
    %234 = arith.cmpi ne, %233, %c0_i32_69 : i32
    scf.if %234 {
      %c0_70 = arith.constant 0 : index
      %c0_71 = arith.constant 0 : index
      %235 = vector.load %arg10[%c0_70, %c0_71] : memref<2x128xf32, #tpu.memory_space<vmem>>, vector<2x128xf32>
      %236 = vector.extract_strided_slice %235 {offsets = [0, 0], sizes = [1, 128], strides = [1, 1]} : vector<2x128xf32> to vector<1x128xf32>
      %237 = vector.shape_cast %236 : vector<1x128xf32> to vector<128xf32>
      %238 = vector.extract_strided_slice %235 {offsets = [1, 0], sizes = [1, 128], strides = [1, 1]} : vector<2x128xf32> to vector<1x128xf32>
      %239 = vector.shape_cast %238 : vector<1x128xf32> to vector<128xf32>
      %cst_72 = arith.constant dense<0.000000e+00> : vector<1x17xf32>
      %240 = vector.multi_reduction <add>, %230, %cst_72 [2] : vector<1x17x128xf32> to vector<1x17xf32>
      %241 = vector.shape_cast %240 : vector<1x17xf32> to vector<1x17x1xf32>
      %242 = arith.mulf %230, %230 : vector<1x17x128xf32>
      %cst_73 = arith.constant dense<0.000000e+00> : vector<1x17xf32>
      %243 = vector.multi_reduction <add>, %242, %cst_73 [2] : vector<1x17x128xf32> to vector<1x17xf32>
      %244 = vector.shape_cast %243 : vector<1x17xf32> to vector<1x17x1xf32>
      %cst_74 = arith.constant 3.200000e+01 : f32
      %245 = vector.broadcast %cst_74 : f32 to vector<1x17x1xf32>
      %246 = arith.divf %241, %245 : vector<1x17x1xf32>
      %cst_75 = arith.constant 3.200000e+01 : f32
      %247 = vector.broadcast %cst_75 : f32 to vector<1x17x1xf32>
      %248 = arith.divf %244, %247 : vector<1x17x1xf32>
      %249 = arith.mulf %246, %246 : vector<1x17x1xf32>
      %250 = arith.subf %248, %249 : vector<1x17x1xf32>
      %cst_76 = arith.constant 0.000000e+00 : f32
      %251 = vector.broadcast %cst_76 : f32 to vector<1x17x1xf32>
      %252 = arith.maximumf %250, %251 : vector<1x17x1xf32>
      %253 = vector.broadcast %246 : vector<1x17x1xf32> to vector<1x17x128xf32>
      %254 = arith.subf %230, %253 : vector<1x17x128xf32>
      %cst_77 = arith.constant 9.99999997E-7 : f32
      %255 = vector.broadcast %cst_77 : f32 to vector<1x17x1xf32>
      %256 = arith.addf %252, %255 : vector<1x17x1xf32>
      %257 = math.rsqrt %256 : vector<1x17x1xf32>
      %258 = vector.broadcast %257 : vector<1x17x1xf32> to vector<1x17x128xf32>
      %259 = arith.mulf %254, %258 : vector<1x17x128xf32>
      %260 = vector.shape_cast %237 : vector<128xf32> to vector<1x1x128xf32>
      %261 = vector.broadcast %260 : vector<1x1x128xf32> to vector<1x17x128xf32>
      %262 = arith.mulf %259, %261 : vector<1x17x128xf32>
      %263 = vector.shape_cast %239 : vector<128xf32> to vector<1x1x128xf32>
      %264 = vector.broadcast %263 : vector<1x1x128xf32> to vector<1x17x128xf32>
      %265 = arith.addf %262, %264 : vector<1x17x128xf32>
      %266 = arith.truncf %265 : vector<1x17x128xf32> to vector<1x17x128xbf16>
      %c0_78 = arith.constant 0 : index
      %c0_79 = arith.constant 0 : index
      %c0_80 = arith.constant 0 : index
      %267 = vector.load %arg11[%c0_78, %c0_79, %c0_80] : memref<1x17x128xbf16, #tpu.memory_space<vmem>>, vector<1x17x128xbf16>
      tpu.vector_store %arg11[%c0_78, %c0_79, %c0_80], %266 {strides = array<i32>} : memref<1x17x128xbf16, #tpu.memory_space<vmem>>, vector<1x17x128xbf16>,
    } else {
    }
    return
  }
  func.func @transform_0(%arg0: i32, %arg1: i32) -> (i32, i32, i32) {
    %c0_i32 = arith.constant 0 : i32
    %c0_i32_0 = arith.constant 0 : i32
    %c0_i32_1 = arith.constant 0 : i32
    return %arg0, %c0_i32, %c0_i32_0 : i32, i32, i32
  }
  func.func @transform_1(%arg0: i32, %arg1: i32) -> (i32, i32) {
    %c0_i32 = arith.constant 0 : i32
    %c0_i32_0 = arith.constant 0 : i32
    %c0_i32_1 = arith.constant 0 : i32
    return %c0_i32, %c0_i32_0 : i32, i32
  }
  func.func @transform_2(%arg0: i32, %arg1: i32) -> (i32, i32) {
    %c0_i32 = arith.constant 0 : i32
    %c0_i32_0 = arith.constant 0 : i32
    %c0_i32_1 = arith.constant 0 : i32
    return %c0_i32, %c0_i32_0 : i32, i32
  }
  func.func @transform_3(%arg0: i32, %arg1: i32) -> (i32, i32, i32, i32) {
    %c0_i32 = arith.constant 0 : i32
    %c0_i32_0 = arith.constant 0 : i32
    %c0_i32_1 = arith.constant 0 : i32
    %c0_i32_2 = arith.constant 0 : i32
    return %arg1, %c0_i32, %c0_i32_0, %c0_i32_1 : i32, i32, i32, i32
  }
  func.func @transform_4(%arg0: i32, %arg1: i32) -> (i32, i32, i32) {
    %c0_i32 = arith.constant 0 : i32
    %c0_i32_0 = arith.constant 0 : i32
    %c0_i32_1 = arith.constant 0 : i32
    return %arg1, %c0_i32, %c0_i32_0 : i32, i32, i32
  }
  func.func @transform_5(%arg0: i32, %arg1: i32) -> (i32, i32, i32) {
    %c0_i32 = arith.constant 0 : i32
    %c0_i32_0 = arith.constant 0 : i32
    %c0_i32_1 = arith.constant 0 : i32
    return %arg1, %c0_i32, %c0_i32_0 : i32, i32, i32
  }
  func.func @transform_6(%arg0: i32, %arg1: i32) -> (i32, i32, i32) {
    %c0_i32 = arith.constant 0 : i32
    %c0_i32_0 = arith.constant 0 : i32
    %c0_i32_1 = arith.constant 0 : i32
    return %arg1, %c0_i32, %c0_i32_0 : i32, i32, i32
  }
  func.func @transform_7(%arg0: i32, %arg1: i32) -> (i32, i32, i32) {
    %c0_i32 = arith.constant 0 : i32
    %c0_i32_0 = arith.constant 0 : i32
    %c0_i32_1 = arith.constant 0 : i32
    return %arg1, %c0_i32, %c0_i32_0 : i32, i32, i32
  }
  func.func @transform_8(%arg0: i32, %arg1: i32) -> (i32, i32) {
    %c0_i32 = arith.constant 0 : i32
    %c0_i32_0 = arith.constant 0 : i32
    %c0_i32_1 = arith.constant 0 : i32
    return %c0_i32, %c0_i32_0 : i32, i32
  }
  func.func @transform_9(%arg0: i32, %arg1: i32) -> (i32, i32, i32) {
    %c0_i32 = arith.constant 0 : i32
    %c0_i32_0 = arith.constant 0 : i32
    %c0_i32_1 = arith.constant 0 : i32
    return %arg0, %c0_i32, %c0_i32_0 : i32, i32, i32
  }
}

module attributes {stable_mosaic.version = 11 : i64} {
  func.func @_bert_layers_kernel(%arg0: i32, %arg1: i32, %arg2: memref<1x8x128xf32, #tpu.memory_space<vmem>>, %arg3: memref<1x17x128xbf16, #tpu.memory_space<vmem>>, %arg4: memref<1x1x8xf32, #tpu.memory_space<vmem>>, %arg5: memref<2x128xf32, #tpu.memory_space<vmem>>, %arg6: memref<1x3x128x128xbf16, #tpu.memory_space<vmem>>, %arg7: memref<1x128x128xbf16, #tpu.memory_space<vmem>>, %arg8: memref<1x3x128x128xbf16, #tpu.memory_space<vmem>>, %arg9: memref<1x128x128xbf16, #tpu.memory_space<vmem>>, %arg10: memref<1x128x128xbf16, #tpu.memory_space<vmem>>, %arg11: memref<1x128x128xbf16, #tpu.memory_space<vmem>>, %arg12: memref<1x16x128xf32, #tpu.memory_space<vmem>>, %arg13: memref<1x8x128xf32, #tpu.memory_space<vmem>>, %arg14: memref<1x8x128xf32, #tpu.memory_space<vmem>>) attributes {dimension_semantics = [#tpu.dimension_semantics<parallel>, #tpu.dimension_semantics<arbitrary>], iteration_bounds = array<i64: 2, 2>, scalar_prefetch = 0 : i64, scratch_operands = 1 : i64, tpu.core_type = #tpu.core_type<tc>, window_params = [{transform_indices = @transform_0, window_bounds = array<i64: 1, 8, 128>}, {transform_indices = @transform_1, window_bounds = array<i64: 1, 17, 128>}, {transform_indices = @transform_2, window_bounds = array<i64: 1, 1, 8>}, {pipeline_mode = #tpu.pipeline_mode<synchronous>, transform_indices = @transform_3, window_bounds = array<i64: 2, 128>}, {transform_indices = @transform_4, window_bounds = array<i64: 1, 3, 128, 128>}, {transform_indices = @transform_5, window_bounds = array<i64: 1, 128, 128>}, {transform_indices = @transform_6, window_bounds = array<i64: 1, 3, 128, 128>}, {transform_indices = @transform_7, window_bounds = array<i64: 1, 128, 128>}, {transform_indices = @transform_8, window_bounds = array<i64: 1, 128, 128>}, {transform_indices = @transform_9, window_bounds = array<i64: 1, 128, 128>}, {transform_indices = @transform_10, window_bounds = array<i64: 1, 16, 128>}, {transform_indices = @transform_11, window_bounds = array<i64: 1, 8, 128>}]} {
    %c0_i32 = arith.constant 0 : i32
    %0 = arith.cmpi eq, %arg1, %c0_i32 : i32
    %1 = arith.extui %0 : i1 to i32
    %c0_i32_0 = arith.constant 0 : i32
    %2 = arith.cmpi ne, %1, %c0_i32_0 : i32
    scf.if %2 {
      %c0_121 = arith.constant 0 : index
      %c0_122 = arith.constant 0 : index
      %404 = vector.load %arg5[%c0_121, %c0_122] : memref<2x128xf32, #tpu.memory_space<vmem>>, vector<2x128xf32>
      %c0_123 = arith.constant 0 : index
      %c0_124 = arith.constant 0 : index
      %c0_125 = arith.constant 0 : index
      %405 = vector.load %arg2[%c0_123, %c0_124, %c0_125] : memref<1x8x128xf32, #tpu.memory_space<vmem>>, vector<1x8x128xf32>
      %406 = vector.extract_strided_slice %404 {offsets = [0, 0], sizes = [1, 128], strides = [1, 1]} : vector<2x128xf32> to vector<1x128xf32>
      %407 = vector.shape_cast %406 : vector<1x128xf32> to vector<128xf32>
      %408 = vector.extract_strided_slice %404 {offsets = [1, 0], sizes = [1, 128], strides = [1, 1]} : vector<2x128xf32> to vector<1x128xf32>
      %409 = vector.shape_cast %408 : vector<1x128xf32> to vector<128xf32>
      %cst_126 = arith.constant dense<0.000000e+00> : vector<1x8xf32>
      %410 = vector.multi_reduction <add>, %405, %cst_126 [2] : vector<1x8x128xf32> to vector<1x8xf32>
      %411 = vector.shape_cast %410 : vector<1x8xf32> to vector<1x8x1xf32>
      %412 = arith.mulf %405, %405 : vector<1x8x128xf32>
      %cst_127 = arith.constant dense<0.000000e+00> : vector<1x8xf32>
      %413 = vector.multi_reduction <add>, %412, %cst_127 [2] : vector<1x8x128xf32> to vector<1x8xf32>
      %414 = vector.shape_cast %413 : vector<1x8xf32> to vector<1x8x1xf32>
      %cst_128 = arith.constant 3.200000e+01 : f32
      %415 = vector.broadcast %cst_128 : f32 to vector<1x8x1xf32>
      %416 = arith.divf %411, %415 : vector<1x8x1xf32>
      %cst_129 = arith.constant 3.200000e+01 : f32
      %417 = vector.broadcast %cst_129 : f32 to vector<1x8x1xf32>
      %418 = arith.divf %414, %417 : vector<1x8x1xf32>
      %419 = arith.mulf %416, %416 : vector<1x8x1xf32>
      %420 = arith.subf %418, %419 : vector<1x8x1xf32>
      %cst_130 = arith.constant 0.000000e+00 : f32
      %421 = vector.broadcast %cst_130 : f32 to vector<1x8x1xf32>
      %422 = arith.maximumf %420, %421 : vector<1x8x1xf32>
      %423 = vector.broadcast %416 : vector<1x8x1xf32> to vector<1x8x128xf32>
      %424 = arith.subf %405, %423 : vector<1x8x128xf32>
      %cst_131 = arith.constant 9.99999996E-13 : f32
      %425 = vector.broadcast %cst_131 : f32 to vector<1x8x1xf32>
      %426 = arith.addf %422, %425 : vector<1x8x1xf32>
      %427 = math.rsqrt %426 : vector<1x8x1xf32>
      %428 = vector.broadcast %427 : vector<1x8x1xf32> to vector<1x8x128xf32>
      %429 = arith.mulf %424, %428 : vector<1x8x128xf32>
      %430 = vector.shape_cast %407 : vector<128xf32> to vector<1x1x128xf32>
      %431 = vector.broadcast %430 : vector<1x1x128xf32> to vector<1x8x128xf32>
      %432 = arith.mulf %429, %431 : vector<1x8x128xf32>
      %433 = vector.shape_cast %409 : vector<128xf32> to vector<1x1x128xf32>
      %434 = vector.broadcast %433 : vector<1x1x128xf32> to vector<1x8x128xf32>
      %435 = arith.addf %432, %434 : vector<1x8x128xf32>
      %c0_132 = arith.constant 0 : index
      %c0_133 = arith.constant 0 : index
      %c0_134 = arith.constant 0 : index
      %436 = vector.load %arg14[%c0_132, %c0_133, %c0_134] : memref<1x8x128xf32, #tpu.memory_space<vmem>>, vector<1x8x128xf32>
      tpu.vector_store %arg14[%c0_132, %c0_133, %c0_134], %435 {strides = array<i32>} : memref<1x8x128xf32, #tpu.memory_space<vmem>>, vector<1x8x128xf32>,
    } else {
    }
    %c0 = arith.constant 0 : index
    %c0_1 = arith.constant 0 : index
    %c0_2 = arith.constant 0 : index
    %3 = vector.load %arg14[%c0, %c0_1, %c0_2] : memref<1x8x128xf32, #tpu.memory_space<vmem>>, vector<1x8x128xf32>
    %c0_3 = arith.constant 0 : index
    %c0_4 = arith.constant 0 : index
    %c0_5 = arith.constant 0 : index
    %4 = vector.load %arg12[%c0_3, %c0_4, %c0_5] : memref<1x16x128xf32, #tpu.memory_space<vmem>>, vector<1x16x128xf32>
    %5 = vector.shape_cast %4 : vector<1x16x128xf32> to vector<16x128xf32>
    %c0_6 = arith.constant 0 : index
    %c0_7 = arith.constant 0 : index
    %c0_8 = arith.constant 0 : index
    %6 = vector.load %arg3[%c0_6, %c0_7, %c0_8] : memref<1x17x128xbf16, #tpu.memory_space<vmem>>, vector<1x17x128xbf16>
    %c0_9 = arith.constant 0 : index
    %c0_10 = arith.constant 0 : index
    %c0_11 = arith.constant 0 : index
    %7 = vector.load %arg4[%c0_9, %c0_10, %c0_11] : memref<1x1x8xf32, #tpu.memory_space<vmem>>, vector<1x1x8xf32>
    %8 = arith.truncf %3 : vector<1x8x128xf32> to vector<1x8x128xbf16>
    %9 = vector.extract_strided_slice %5 {offsets = [0, 0], sizes = [3, 128], strides = [1, 1]} : vector<16x128xf32> to vector<3x128xf32>
    %10 = vector.extract_strided_slice %5 {offsets = [3, 0], sizes = [1, 128], strides = [1, 1]} : vector<16x128xf32> to vector<1x128xf32>
    %11 = vector.shape_cast %10 : vector<1x128xf32> to vector<128xf32>
    %c0_12 = arith.constant 0 : index
    %c0_13 = arith.constant 0 : index
    %c0_14 = arith.constant 0 : index
    %c0_15 = arith.constant 0 : index
    %12 = vector.load %arg6[%c0_12, %c0_13, %c0_14, %c0_15] : memref<1x3x128x128xbf16, #tpu.memory_space<vmem>>, vector<1x1x128x128xbf16>
    %13 = vector.shape_cast %12 : vector<1x1x128x128xbf16> to vector<128x128xbf16>
    %14 = vector.shape_cast %8 : vector<1x8x128xbf16> to vector<8x128xbf16>
    %cst = arith.constant dense<0.000000e+00> : vector<8x128xf32>
    %15 = tpu.matmul %14, %13, %cst {dimension_numbers = #tpu.dot_dimension_numbers<[1], [0], [0], [1], [0, 0, 1, 1], [], []>} : vector<8x128xbf16>, vector<128x128xbf16>, vector<8x128xf32> -> vector<8x128xf32>
    %16 = vector.shape_cast %15 : vector<8x128xf32> to vector<1x8x128xf32>
    %17 = vector.extract_strided_slice %9 {offsets = [0, 0], sizes = [1, 128], strides = [1, 1]} : vector<3x128xf32> to vector<1x128xf32>
    %18 = vector.shape_cast %17 : vector<1x128xf32> to vector<128xf32>
    %19 = vector.shape_cast %18 : vector<128xf32> to vector<1x1x128xf32>
    %20 = vector.broadcast %19 : vector<1x1x128xf32> to vector<1x8x128xf32>
    %21 = arith.addf %16, %20 : vector<1x8x128xf32>
    %c0_16 = arith.constant 0 : index
    %c1 = arith.constant 1 : index
    %c0_17 = arith.constant 0 : index
    %c0_18 = arith.constant 0 : index
    %22 = vector.load %arg6[%c0_16, %c1, %c0_17, %c0_18] : memref<1x3x128x128xbf16, #tpu.memory_space<vmem>>, vector<1x1x128x128xbf16>
    %23 = vector.shape_cast %22 : vector<1x1x128x128xbf16> to vector<128x128xbf16>
    %24 = vector.shape_cast %8 : vector<1x8x128xbf16> to vector<8x128xbf16>
    %cst_19 = arith.constant dense<0.000000e+00> : vector<8x128xf32>
    %25 = tpu.matmul %24, %23, %cst_19 {dimension_numbers = #tpu.dot_dimension_numbers<[1], [0], [0], [1], [0, 0, 1, 1], [], []>} : vector<8x128xbf16>, vector<128x128xbf16>, vector<8x128xf32> -> vector<8x128xf32>
    %26 = vector.shape_cast %25 : vector<8x128xf32> to vector<1x8x128xf32>
    %27 = vector.extract_strided_slice %9 {offsets = [1, 0], sizes = [1, 128], strides = [1, 1]} : vector<3x128xf32> to vector<1x128xf32>
    %28 = vector.shape_cast %27 : vector<1x128xf32> to vector<128xf32>
    %29 = vector.shape_cast %28 : vector<128xf32> to vector<1x1x128xf32>
    %30 = vector.broadcast %29 : vector<1x1x128xf32> to vector<1x8x128xf32>
    %31 = arith.addf %26, %30 : vector<1x8x128xf32>
    %c0_20 = arith.constant 0 : index
    %c2 = arith.constant 2 : index
    %c0_21 = arith.constant 0 : index
    %c0_22 = arith.constant 0 : index
    %32 = vector.load %arg6[%c0_20, %c2, %c0_21, %c0_22] : memref<1x3x128x128xbf16, #tpu.memory_space<vmem>>, vector<1x1x128x128xbf16>
    %33 = vector.shape_cast %32 : vector<1x1x128x128xbf16> to vector<128x128xbf16>
    %34 = vector.shape_cast %8 : vector<1x8x128xbf16> to vector<8x128xbf16>
    %cst_23 = arith.constant dense<0.000000e+00> : vector<8x128xf32>
    %35 = tpu.matmul %34, %33, %cst_23 {dimension_numbers = #tpu.dot_dimension_numbers<[1], [0], [0], [1], [0, 0, 1, 1], [], []>} : vector<8x128xbf16>, vector<128x128xbf16>, vector<8x128xf32> -> vector<8x128xf32>
    %36 = vector.shape_cast %35 : vector<8x128xf32> to vector<1x8x128xf32>
    %37 = vector.extract_strided_slice %9 {offsets = [2, 0], sizes = [1, 128], strides = [1, 1]} : vector<3x128xf32> to vector<1x128xf32>
    %38 = vector.shape_cast %37 : vector<1x128xf32> to vector<128xf32>
    %39 = vector.shape_cast %38 : vector<128xf32> to vector<1x1x128xf32>
    %40 = vector.broadcast %39 : vector<1x1x128xf32> to vector<1x8x128xf32>
    %41 = arith.addf %36, %40 : vector<1x8x128xf32>
    %42 = vector.extract_strided_slice %21 {offsets = [0, 0, 0], sizes = [1, 8, 32], strides = [1, 1, 1]} : vector<1x8x128xf32> to vector<1x8x32xf32>
    %43 = arith.truncf %42 : vector<1x8x32xf32> to vector<1x8x32xbf16>
    %44 = vector.extract_strided_slice %31 {offsets = [0, 0, 0], sizes = [1, 8, 32], strides = [1, 1, 1]} : vector<1x8x128xf32> to vector<1x8x32xf32>
    %45 = arith.truncf %44 : vector<1x8x32xf32> to vector<1x8x32xbf16>
    %46 = vector.extract_strided_slice %41 {offsets = [0, 0, 0], sizes = [1, 8, 32], strides = [1, 1, 1]} : vector<1x8x128xf32> to vector<1x8x32xf32>
    %47 = arith.truncf %46 : vector<1x8x32xf32> to vector<1x8x32xbf16>
    "tpu.trace_start"() <{level = 10 : i32, message = "bqe,bke->bqk"}> : () -> ()
    %cst_24 = arith.constant dense<0.000000e+00> : vector<1x8x8xf32>
    %48 = tpu.matmul %43, %45, %cst_24 {dimension_numbers = #tpu.dot_dimension_numbers<[2], [2], [1], [1], [0, 0, 0, 1, 1, 1], [0], [0]>} : vector<1x8x32xbf16>, vector<1x8x32xbf16>, vector<1x8x8xf32> -> vector<1x8x8xf32>
    "tpu.trace_stop"() : () -> ()
    %cst_25 = arith.constant 0.353553385 : f32
    %49 = vector.broadcast %cst_25 : f32 to vector<1x8x8xf32>
    %50 = arith.mulf %48, %49 : vector<1x8x8xf32>
    %51 = vector.broadcast %7 : vector<1x1x8xf32> to vector<1x8x8xf32>
    %52 = arith.addf %50, %51 : vector<1x8x8xf32>
    %cst_26 = arith.constant dense<0xFF800000> : vector<1x8xf32>
    %53 = vector.multi_reduction <maximumf>, %52, %cst_26 [2] : vector<1x8x8xf32> to vector<1x8xf32>
    %54 = vector.shape_cast %53 : vector<1x8xf32> to vector<1x8x1xf32>
    %55 = vector.broadcast %54 : vector<1x8x1xf32> to vector<1x8x8xf32>
    %56 = arith.subf %52, %55 : vector<1x8x8xf32>
    %57 = math.exp %56 : vector<1x8x8xf32>
    %cst_27 = arith.constant dense<0.000000e+00> : vector<1x8xf32>
    %58 = vector.multi_reduction <add>, %57, %cst_27 [2] : vector<1x8x8xf32> to vector<1x8xf32>
    %59 = vector.shape_cast %58 : vector<1x8xf32> to vector<1x8x1xf32>
    %60 = tpu.reciprocal %59 {approx = true} : vector<1x8x1xf32> -> vector<1x8x1xf32>
    %61 = vector.broadcast %60 : vector<1x8x1xf32> to vector<1x8x8xf32>
    %62 = arith.mulf %57, %61 : vector<1x8x8xf32>
    %63 = arith.truncf %62 : vector<1x8x8xf32> to vector<1x8x8xbf16>
    "tpu.trace_start"() <{level = 10 : i32, message = "bqk,bke->bqe"}> : () -> ()
    %cst_28 = arith.constant dense<0.000000e+00> : vector<1x8x32xf32>
    %64 = tpu.matmul %63, %47, %cst_28 {dimension_numbers = #tpu.dot_dimension_numbers<[2], [1], [1], [2], [0, 0, 0, 1, 1, 2], [0], [0]>} : vector<1x8x8xbf16>, vector<1x8x32xbf16>, vector<1x8x32xf32> -> vector<1x8x32xf32>
    "tpu.trace_stop"() : () -> ()
    %65 = vector.extract_strided_slice %21 {offsets = [0, 0, 32], sizes = [1, 8, 32], strides = [1, 1, 1]} : vector<1x8x128xf32> to vector<1x8x32xf32>
    %66 = arith.truncf %65 : vector<1x8x32xf32> to vector<1x8x32xbf16>
    %67 = vector.extract_strided_slice %31 {offsets = [0, 0, 32], sizes = [1, 8, 32], strides = [1, 1, 1]} : vector<1x8x128xf32> to vector<1x8x32xf32>
    %68 = arith.truncf %67 : vector<1x8x32xf32> to vector<1x8x32xbf16>
    %69 = vector.extract_strided_slice %41 {offsets = [0, 0, 32], sizes = [1, 8, 32], strides = [1, 1, 1]} : vector<1x8x128xf32> to vector<1x8x32xf32>
    %70 = arith.truncf %69 : vector<1x8x32xf32> to vector<1x8x32xbf16>
    "tpu.trace_start"() <{level = 10 : i32, message = "bqe,bke->bqk"}> : () -> ()
    %cst_29 = arith.constant dense<0.000000e+00> : vector<1x8x8xf32>
    %71 = tpu.matmul %66, %68, %cst_29 {dimension_numbers = #tpu.dot_dimension_numbers<[2], [2], [1], [1], [0, 0, 0, 1, 1, 1], [0], [0]>} : vector<1x8x32xbf16>, vector<1x8x32xbf16>, vector<1x8x8xf32> -> vector<1x8x8xf32>
    "tpu.trace_stop"() : () -> ()
    %cst_30 = arith.constant 0.353553385 : f32
    %72 = vector.broadcast %cst_30 : f32 to vector<1x8x8xf32>
    %73 = arith.mulf %71, %72 : vector<1x8x8xf32>
    %74 = vector.broadcast %7 : vector<1x1x8xf32> to vector<1x8x8xf32>
    %75 = arith.addf %73, %74 : vector<1x8x8xf32>
    %cst_31 = arith.constant dense<0xFF800000> : vector<1x8xf32>
    %76 = vector.multi_reduction <maximumf>, %75, %cst_31 [2] : vector<1x8x8xf32> to vector<1x8xf32>
    %77 = vector.shape_cast %76 : vector<1x8xf32> to vector<1x8x1xf32>
    %78 = vector.broadcast %77 : vector<1x8x1xf32> to vector<1x8x8xf32>
    %79 = arith.subf %75, %78 : vector<1x8x8xf32>
    %80 = math.exp %79 : vector<1x8x8xf32>
    %cst_32 = arith.constant dense<0.000000e+00> : vector<1x8xf32>
    %81 = vector.multi_reduction <add>, %80, %cst_32 [2] : vector<1x8x8xf32> to vector<1x8xf32>
    %82 = vector.shape_cast %81 : vector<1x8xf32> to vector<1x8x1xf32>
    %83 = tpu.reciprocal %82 {approx = true} : vector<1x8x1xf32> -> vector<1x8x1xf32>
    %84 = vector.broadcast %83 : vector<1x8x1xf32> to vector<1x8x8xf32>
    %85 = arith.mulf %80, %84 : vector<1x8x8xf32>
    %86 = arith.truncf %85 : vector<1x8x8xf32> to vector<1x8x8xbf16>
    "tpu.trace_start"() <{level = 10 : i32, message = "bqk,bke->bqe"}> : () -> ()
    %cst_33 = arith.constant dense<0.000000e+00> : vector<1x8x32xf32>
    %87 = tpu.matmul %86, %70, %cst_33 {dimension_numbers = #tpu.dot_dimension_numbers<[2], [1], [1], [2], [0, 0, 0, 1, 1, 2], [0], [0]>} : vector<1x8x8xbf16>, vector<1x8x32xbf16>, vector<1x8x32xf32> -> vector<1x8x32xf32>
    "tpu.trace_stop"() : () -> ()
    %88 = vector.extract_strided_slice %21 {offsets = [0, 0, 64], sizes = [1, 8, 32], strides = [1, 1, 1]} : vector<1x8x128xf32> to vector<1x8x32xf32>
    %89 = arith.truncf %88 : vector<1x8x32xf32> to vector<1x8x32xbf16>
    %90 = vector.extract_strided_slice %31 {offsets = [0, 0, 64], sizes = [1, 8, 32], strides = [1, 1, 1]} : vector<1x8x128xf32> to vector<1x8x32xf32>
    %91 = arith.truncf %90 : vector<1x8x32xf32> to vector<1x8x32xbf16>
    %92 = vector.extract_strided_slice %41 {offsets = [0, 0, 64], sizes = [1, 8, 32], strides = [1, 1, 1]} : vector<1x8x128xf32> to vector<1x8x32xf32>
    %93 = arith.truncf %92 : vector<1x8x32xf32> to vector<1x8x32xbf16>
    "tpu.trace_start"() <{level = 10 : i32, message = "bqe,bke->bqk"}> : () -> ()
    %cst_34 = arith.constant dense<0.000000e+00> : vector<1x8x8xf32>
    %94 = tpu.matmul %89, %91, %cst_34 {dimension_numbers = #tpu.dot_dimension_numbers<[2], [2], [1], [1], [0, 0, 0, 1, 1, 1], [0], [0]>} : vector<1x8x32xbf16>, vector<1x8x32xbf16>, vector<1x8x8xf32> -> vector<1x8x8xf32>
    "tpu.trace_stop"() : () -> ()
    %cst_35 = arith.constant 0.353553385 : f32
    %95 = vector.broadcast %cst_35 : f32 to vector<1x8x8xf32>
    %96 = arith.mulf %94, %95 : vector<1x8x8xf32>
    %97 = vector.broadcast %7 : vector<1x1x8xf32> to vector<1x8x8xf32>
    %98 = arith.addf %96, %97 : vector<1x8x8xf32>
    %cst_36 = arith.constant dense<0xFF800000> : vector<1x8xf32>
    %99 = vector.multi_reduction <maximumf>, %98, %cst_36 [2] : vector<1x8x8xf32> to vector<1x8xf32>
    %100 = vector.shape_cast %99 : vector<1x8xf32> to vector<1x8x1xf32>
    %101 = vector.broadcast %100 : vector<1x8x1xf32> to vector<1x8x8xf32>
    %102 = arith.subf %98, %101 : vector<1x8x8xf32>
    %103 = math.exp %102 : vector<1x8x8xf32>
    %cst_37 = arith.constant dense<0.000000e+00> : vector<1x8xf32>
    %104 = vector.multi_reduction <add>, %103, %cst_37 [2] : vector<1x8x8xf32> to vector<1x8xf32>
    %105 = vector.shape_cast %104 : vector<1x8xf32> to vector<1x8x1xf32>
    %106 = tpu.reciprocal %105 {approx = true} : vector<1x8x1xf32> -> vector<1x8x1xf32>
    %107 = vector.broadcast %106 : vector<1x8x1xf32> to vector<1x8x8xf32>
    %108 = arith.mulf %103, %107 : vector<1x8x8xf32>
    %109 = arith.truncf %108 : vector<1x8x8xf32> to vector<1x8x8xbf16>
    "tpu.trace_start"() <{level = 10 : i32, message = "bqk,bke->bqe"}> : () -> ()
    %cst_38 = arith.constant dense<0.000000e+00> : vector<1x8x32xf32>
    %110 = tpu.matmul %109, %93, %cst_38 {dimension_numbers = #tpu.dot_dimension_numbers<[2], [1], [1], [2], [0, 0, 0, 1, 1, 2], [0], [0]>} : vector<1x8x8xbf16>, vector<1x8x32xbf16>, vector<1x8x32xf32> -> vector<1x8x32xf32>
    "tpu.trace_stop"() : () -> ()
    %111 = vector.extract_strided_slice %21 {offsets = [0, 0, 96], sizes = [1, 8, 32], strides = [1, 1, 1]} : vector<1x8x128xf32> to vector<1x8x32xf32>
    %112 = arith.truncf %111 : vector<1x8x32xf32> to vector<1x8x32xbf16>
    %113 = vector.extract_strided_slice %31 {offsets = [0, 0, 96], sizes = [1, 8, 32], strides = [1, 1, 1]} : vector<1x8x128xf32> to vector<1x8x32xf32>
    %114 = arith.truncf %113 : vector<1x8x32xf32> to vector<1x8x32xbf16>
    %115 = vector.extract_strided_slice %41 {offsets = [0, 0, 96], sizes = [1, 8, 32], strides = [1, 1, 1]} : vector<1x8x128xf32> to vector<1x8x32xf32>
    %116 = arith.truncf %115 : vector<1x8x32xf32> to vector<1x8x32xbf16>
    "tpu.trace_start"() <{level = 10 : i32, message = "bqe,bke->bqk"}> : () -> ()
    %cst_39 = arith.constant dense<0.000000e+00> : vector<1x8x8xf32>
    %117 = tpu.matmul %112, %114, %cst_39 {dimension_numbers = #tpu.dot_dimension_numbers<[2], [2], [1], [1], [0, 0, 0, 1, 1, 1], [0], [0]>} : vector<1x8x32xbf16>, vector<1x8x32xbf16>, vector<1x8x8xf32> -> vector<1x8x8xf32>
    "tpu.trace_stop"() : () -> ()
    %cst_40 = arith.constant 0.353553385 : f32
    %118 = vector.broadcast %cst_40 : f32 to vector<1x8x8xf32>
    %119 = arith.mulf %117, %118 : vector<1x8x8xf32>
    %120 = vector.broadcast %7 : vector<1x1x8xf32> to vector<1x8x8xf32>
    %121 = arith.addf %119, %120 : vector<1x8x8xf32>
    %cst_41 = arith.constant dense<0xFF800000> : vector<1x8xf32>
    %122 = vector.multi_reduction <maximumf>, %121, %cst_41 [2] : vector<1x8x8xf32> to vector<1x8xf32>
    %123 = vector.shape_cast %122 : vector<1x8xf32> to vector<1x8x1xf32>
    %124 = vector.broadcast %123 : vector<1x8x1xf32> to vector<1x8x8xf32>
    %125 = arith.subf %121, %124 : vector<1x8x8xf32>
    %126 = math.exp %125 : vector<1x8x8xf32>
    %cst_42 = arith.constant dense<0.000000e+00> : vector<1x8xf32>
    %127 = vector.multi_reduction <add>, %126, %cst_42 [2] : vector<1x8x8xf32> to vector<1x8xf32>
    %128 = vector.shape_cast %127 : vector<1x8xf32> to vector<1x8x1xf32>
    %129 = tpu.reciprocal %128 {approx = true} : vector<1x8x1xf32> -> vector<1x8x1xf32>
    %130 = vector.broadcast %129 : vector<1x8x1xf32> to vector<1x8x8xf32>
    %131 = arith.mulf %126, %130 : vector<1x8x8xf32>
    %132 = arith.truncf %131 : vector<1x8x8xf32> to vector<1x8x8xbf16>
    "tpu.trace_start"() <{level = 10 : i32, message = "bqk,bke->bqe"}> : () -> ()
    %cst_43 = arith.constant dense<0.000000e+00> : vector<1x8x32xf32>
    %133 = tpu.matmul %132, %116, %cst_43 {dimension_numbers = #tpu.dot_dimension_numbers<[2], [1], [1], [2], [0, 0, 0, 1, 1, 2], [0], [0]>} : vector<1x8x8xbf16>, vector<1x8x32xbf16>, vector<1x8x32xf32> -> vector<1x8x32xf32>
    "tpu.trace_stop"() : () -> ()
    %134 = tpu.concatenate %64, %87, %110, %133 in 2 : vector<1x8x32xf32>, vector<1x8x32xf32>, vector<1x8x32xf32>, vector<1x8x32xf32> -> vector<1x8x128xf32>
    %135 = arith.truncf %134 : vector<1x8x128xf32> to vector<1x8x128xbf16>
    %c0_44 = arith.constant 0 : index
    %c0_45 = arith.constant 0 : index
    %c0_46 = arith.constant 0 : index
    %136 = vector.load %arg7[%c0_44, %c0_45, %c0_46] : memref<1x128x128xbf16, #tpu.memory_space<vmem>>, vector<1x128x128xbf16>
    %137 = vector.shape_cast %136 : vector<1x128x128xbf16> to vector<128x128xbf16>
    %138 = vector.shape_cast %135 : vector<1x8x128xbf16> to vector<8x128xbf16>
    %cst_47 = arith.constant dense<0.000000e+00> : vector<8x128xf32>
    %139 = tpu.matmul %138, %137, %cst_47 {dimension_numbers = #tpu.dot_dimension_numbers<[1], [0], [0], [1], [0, 0, 1, 1], [], []>} : vector<8x128xbf16>, vector<128x128xbf16>, vector<8x128xf32> -> vector<8x128xf32>
    %140 = vector.shape_cast %139 : vector<8x128xf32> to vector<1x8x128xf32>
    %141 = vector.shape_cast %11 : vector<128xf32> to vector<1x1x128xf32>
    %142 = vector.broadcast %141 : vector<1x1x128xf32> to vector<1x8x128xf32>
    %143 = arith.addf %140, %142 : vector<1x8x128xf32>
    %144 = arith.addf %143, %3 : vector<1x8x128xf32>
    %145 = vector.extract_strided_slice %5 {offsets = [4, 0], sizes = [1, 128], strides = [1, 1]} : vector<16x128xf32> to vector<1x128xf32>
    %146 = vector.shape_cast %145 : vector<1x128xf32> to vector<128xf32>
    %147 = vector.extract_strided_slice %5 {offsets = [5, 0], sizes = [1, 128], strides = [1, 1]} : vector<16x128xf32> to vector<1x128xf32>
    %148 = vector.shape_cast %147 : vector<1x128xf32> to vector<128xf32>
    %cst_48 = arith.constant dense<0.000000e+00> : vector<1x8xf32>
    %149 = vector.multi_reduction <add>, %144, %cst_48 [2] : vector<1x8x128xf32> to vector<1x8xf32>
    %150 = vector.shape_cast %149 : vector<1x8xf32> to vector<1x8x1xf32>
    %151 = arith.mulf %144, %144 : vector<1x8x128xf32>
    %cst_49 = arith.constant dense<0.000000e+00> : vector<1x8xf32>
    %152 = vector.multi_reduction <add>, %151, %cst_49 [2] : vector<1x8x128xf32> to vector<1x8xf32>
    %153 = vector.shape_cast %152 : vector<1x8xf32> to vector<1x8x1xf32>
    %cst_50 = arith.constant 3.200000e+01 : f32
    %154 = vector.broadcast %cst_50 : f32 to vector<1x8x1xf32>
    %155 = arith.divf %150, %154 : vector<1x8x1xf32>
    %cst_51 = arith.constant 3.200000e+01 : f32
    %156 = vector.broadcast %cst_51 : f32 to vector<1x8x1xf32>
    %157 = arith.divf %153, %156 : vector<1x8x1xf32>
    %158 = arith.mulf %155, %155 : vector<1x8x1xf32>
    %159 = arith.subf %157, %158 : vector<1x8x1xf32>
    %cst_52 = arith.constant 0.000000e+00 : f32
    %160 = vector.broadcast %cst_52 : f32 to vector<1x8x1xf32>
    %161 = arith.maximumf %159, %160 : vector<1x8x1xf32>
    %162 = vector.broadcast %155 : vector<1x8x1xf32> to vector<1x8x128xf32>
    %163 = arith.subf %144, %162 : vector<1x8x128xf32>
    %cst_53 = arith.constant 9.99999996E-13 : f32
    %164 = vector.broadcast %cst_53 : f32 to vector<1x8x1xf32>
    %165 = arith.addf %161, %164 : vector<1x8x1xf32>
    %166 = math.rsqrt %165 : vector<1x8x1xf32>
    %167 = vector.broadcast %166 : vector<1x8x1xf32> to vector<1x8x128xf32>
    %168 = arith.mulf %163, %167 : vector<1x8x128xf32>
    %169 = vector.shape_cast %146 : vector<128xf32> to vector<1x1x128xf32>
    %170 = vector.broadcast %169 : vector<1x1x128xf32> to vector<1x8x128xf32>
    %171 = arith.mulf %168, %170 : vector<1x8x128xf32>
    %172 = vector.shape_cast %148 : vector<128xf32> to vector<1x1x128xf32>
    %173 = vector.broadcast %172 : vector<1x1x128xf32> to vector<1x8x128xf32>
    %174 = arith.addf %171, %173 : vector<1x8x128xf32>
    %175 = arith.truncf %174 : vector<1x8x128xf32> to vector<1x8x128xbf16>
    %176 = vector.extract_strided_slice %5 {offsets = [6, 0], sizes = [3, 128], strides = [1, 1]} : vector<16x128xf32> to vector<3x128xf32>
    %177 = vector.extract_strided_slice %5 {offsets = [9, 0], sizes = [1, 128], strides = [1, 1]} : vector<16x128xf32> to vector<1x128xf32>
    %178 = vector.shape_cast %177 : vector<1x128xf32> to vector<128xf32>
    %c0_54 = arith.constant 0 : index
    %c0_55 = arith.constant 0 : index
    %c0_56 = arith.constant 0 : index
    %c0_57 = arith.constant 0 : index
    %179 = vector.load %arg8[%c0_54, %c0_55, %c0_56, %c0_57] : memref<1x3x128x128xbf16, #tpu.memory_space<vmem>>, vector<1x1x128x128xbf16>
    %180 = vector.shape_cast %179 : vector<1x1x128x128xbf16> to vector<128x128xbf16>
    %181 = vector.shape_cast %175 : vector<1x8x128xbf16> to vector<8x128xbf16>
    %cst_58 = arith.constant dense<0.000000e+00> : vector<8x128xf32>
    %182 = tpu.matmul %181, %180, %cst_58 {dimension_numbers = #tpu.dot_dimension_numbers<[1], [0], [0], [1], [0, 0, 1, 1], [], []>} : vector<8x128xbf16>, vector<128x128xbf16>, vector<8x128xf32> -> vector<8x128xf32>
    %183 = vector.shape_cast %182 : vector<8x128xf32> to vector<1x8x128xf32>
    %184 = vector.extract_strided_slice %176 {offsets = [0, 0], sizes = [1, 128], strides = [1, 1]} : vector<3x128xf32> to vector<1x128xf32>
    %185 = vector.shape_cast %184 : vector<1x128xf32> to vector<128xf32>
    %186 = vector.shape_cast %185 : vector<128xf32> to vector<1x1x128xf32>
    %187 = vector.broadcast %186 : vector<1x1x128xf32> to vector<1x8x128xf32>
    %188 = arith.addf %183, %187 : vector<1x8x128xf32>
    %c0_59 = arith.constant 0 : index
    %c1_60 = arith.constant 1 : index
    %c0_61 = arith.constant 0 : index
    %c0_62 = arith.constant 0 : index
    %189 = vector.load %arg8[%c0_59, %c1_60, %c0_61, %c0_62] : memref<1x3x128x128xbf16, #tpu.memory_space<vmem>>, vector<1x1x128x128xbf16>
    %190 = vector.shape_cast %189 : vector<1x1x128x128xbf16> to vector<128x128xbf16>
    %191 = vector.shape_cast %6 : vector<1x17x128xbf16> to vector<17x128xbf16>
    %cst_63 = arith.constant dense<0.000000e+00> : vector<17x128xf32>
    %192 = tpu.matmul %191, %190, %cst_63 {dimension_numbers = #tpu.dot_dimension_numbers<[1], [0], [0], [1], [0, 0, 1, 1], [], []>} : vector<17x128xbf16>, vector<128x128xbf16>, vector<17x128xf32> -> vector<17x128xf32>
    %193 = vector.shape_cast %192 : vector<17x128xf32> to vector<1x17x128xf32>
    %194 = vector.extract_strided_slice %176 {offsets = [1, 0], sizes = [1, 128], strides = [1, 1]} : vector<3x128xf32> to vector<1x128xf32>
    %195 = vector.shape_cast %194 : vector<1x128xf32> to vector<128xf32>
    %196 = vector.shape_cast %195 : vector<128xf32> to vector<1x1x128xf32>
    %197 = vector.broadcast %196 : vector<1x1x128xf32> to vector<1x17x128xf32>
    %198 = arith.addf %193, %197 : vector<1x17x128xf32>
    %c0_64 = arith.constant 0 : index
    %c2_65 = arith.constant 2 : index
    %c0_66 = arith.constant 0 : index
    %c0_67 = arith.constant 0 : index
    %199 = vector.load %arg8[%c0_64, %c2_65, %c0_66, %c0_67] : memref<1x3x128x128xbf16, #tpu.memory_space<vmem>>, vector<1x1x128x128xbf16>
    %200 = vector.shape_cast %199 : vector<1x1x128x128xbf16> to vector<128x128xbf16>
    %201 = vector.shape_cast %6 : vector<1x17x128xbf16> to vector<17x128xbf16>
    %cst_68 = arith.constant dense<0.000000e+00> : vector<17x128xf32>
    %202 = tpu.matmul %201, %200, %cst_68 {dimension_numbers = #tpu.dot_dimension_numbers<[1], [0], [0], [1], [0, 0, 1, 1], [], []>} : vector<17x128xbf16>, vector<128x128xbf16>, vector<17x128xf32> -> vector<17x128xf32>
    %203 = vector.shape_cast %202 : vector<17x128xf32> to vector<1x17x128xf32>
    %204 = vector.extract_strided_slice %176 {offsets = [2, 0], sizes = [1, 128], strides = [1, 1]} : vector<3x128xf32> to vector<1x128xf32>
    %205 = vector.shape_cast %204 : vector<1x128xf32> to vector<128xf32>
    %206 = vector.shape_cast %205 : vector<128xf32> to vector<1x1x128xf32>
    %207 = vector.broadcast %206 : vector<1x1x128xf32> to vector<1x17x128xf32>
    %208 = arith.addf %203, %207 : vector<1x17x128xf32>
    %209 = vector.extract_strided_slice %188 {offsets = [0, 0, 0], sizes = [1, 8, 32], strides = [1, 1, 1]} : vector<1x8x128xf32> to vector<1x8x32xf32>
    %210 = arith.truncf %209 : vector<1x8x32xf32> to vector<1x8x32xbf16>
    %211 = vector.extract_strided_slice %198 {offsets = [0, 0, 0], sizes = [1, 17, 32], strides = [1, 1, 1]} : vector<1x17x128xf32> to vector<1x17x32xf32>
    %212 = arith.truncf %211 : vector<1x17x32xf32> to vector<1x17x32xbf16>
    %213 = vector.extract_strided_slice %208 {offsets = [0, 0, 0], sizes = [1, 17, 32], strides = [1, 1, 1]} : vector<1x17x128xf32> to vector<1x17x32xf32>
    %214 = arith.truncf %213 : vector<1x17x32xf32> to vector<1x17x32xbf16>
    "tpu.trace_start"() <{level = 10 : i32, message = "bqe,bke->bqk"}> : () -> ()
    %cst_69 = arith.constant dense<0.000000e+00> : vector<1x8x17xf32>
    %215 = tpu.matmul %210, %212, %cst_69 {dimension_numbers = #tpu.dot_dimension_numbers<[2], [2], [1], [1], [0, 0, 0, 1, 1, 1], [0], [0]>} : vector<1x8x32xbf16>, vector<1x17x32xbf16>, vector<1x8x17xf32> -> vector<1x8x17xf32>
    "tpu.trace_stop"() : () -> ()
    %cst_70 = arith.constant 0.353553385 : f32
    %216 = vector.broadcast %cst_70 : f32 to vector<1x8x17xf32>
    %217 = arith.mulf %215, %216 : vector<1x8x17xf32>
    %cst_71 = arith.constant dense<0xFF800000> : vector<1x8xf32>
    %218 = vector.multi_reduction <maximumf>, %217, %cst_71 [2] : vector<1x8x17xf32> to vector<1x8xf32>
    %219 = vector.shape_cast %218 : vector<1x8xf32> to vector<1x8x1xf32>
    %220 = vector.broadcast %219 : vector<1x8x1xf32> to vector<1x8x17xf32>
    %221 = arith.subf %217, %220 : vector<1x8x17xf32>
    %222 = math.exp %221 : vector<1x8x17xf32>
    %cst_72 = arith.constant dense<0.000000e+00> : vector<1x8xf32>
    %223 = vector.multi_reduction <add>, %222, %cst_72 [2] : vector<1x8x17xf32> to vector<1x8xf32>
    %224 = vector.shape_cast %223 : vector<1x8xf32> to vector<1x8x1xf32>
    %225 = tpu.reciprocal %224 {approx = true} : vector<1x8x1xf32> -> vector<1x8x1xf32>
    %226 = vector.broadcast %225 : vector<1x8x1xf32> to vector<1x8x17xf32>
    %227 = arith.mulf %222, %226 : vector<1x8x17xf32>
    %228 = arith.truncf %227 : vector<1x8x17xf32> to vector<1x8x17xbf16>
    "tpu.trace_start"() <{level = 10 : i32, message = "bqk,bke->bqe"}> : () -> ()
    %cst_73 = arith.constant dense<0.000000e+00> : vector<1x8x32xf32>
    %229 = tpu.matmul %228, %214, %cst_73 {dimension_numbers = #tpu.dot_dimension_numbers<[2], [1], [1], [2], [0, 0, 0, 1, 1, 2], [0], [0]>} : vector<1x8x17xbf16>, vector<1x17x32xbf16>, vector<1x8x32xf32> -> vector<1x8x32xf32>
    "tpu.trace_stop"() : () -> ()
    %230 = vector.extract_strided_slice %188 {offsets = [0, 0, 32], sizes = [1, 8, 32], strides = [1, 1, 1]} : vector<1x8x128xf32> to vector<1x8x32xf32>
    %231 = arith.truncf %230 : vector<1x8x32xf32> to vector<1x8x32xbf16>
    %232 = vector.extract_strided_slice %198 {offsets = [0, 0, 32], sizes = [1, 17, 32], strides = [1, 1, 1]} : vector<1x17x128xf32> to vector<1x17x32xf32>
    %233 = arith.truncf %232 : vector<1x17x32xf32> to vector<1x17x32xbf16>
    %234 = vector.extract_strided_slice %208 {offsets = [0, 0, 32], sizes = [1, 17, 32], strides = [1, 1, 1]} : vector<1x17x128xf32> to vector<1x17x32xf32>
    %235 = arith.truncf %234 : vector<1x17x32xf32> to vector<1x17x32xbf16>
    "tpu.trace_start"() <{level = 10 : i32, message = "bqe,bke->bqk"}> : () -> ()
    %cst_74 = arith.constant dense<0.000000e+00> : vector<1x8x17xf32>
    %236 = tpu.matmul %231, %233, %cst_74 {dimension_numbers = #tpu.dot_dimension_numbers<[2], [2], [1], [1], [0, 0, 0, 1, 1, 1], [0], [0]>} : vector<1x8x32xbf16>, vector<1x17x32xbf16>, vector<1x8x17xf32> -> vector<1x8x17xf32>
    "tpu.trace_stop"() : () -> ()
    %cst_75 = arith.constant 0.353553385 : f32
    %237 = vector.broadcast %cst_75 : f32 to vector<1x8x17xf32>
    %238 = arith.mulf %236, %237 : vector<1x8x17xf32>
    %cst_76 = arith.constant dense<0xFF800000> : vector<1x8xf32>
    %239 = vector.multi_reduction <maximumf>, %238, %cst_76 [2] : vector<1x8x17xf32> to vector<1x8xf32>
    %240 = vector.shape_cast %239 : vector<1x8xf32> to vector<1x8x1xf32>
    %241 = vector.broadcast %240 : vector<1x8x1xf32> to vector<1x8x17xf32>
    %242 = arith.subf %238, %241 : vector<1x8x17xf32>
    %243 = math.exp %242 : vector<1x8x17xf32>
    %cst_77 = arith.constant dense<0.000000e+00> : vector<1x8xf32>
    %244 = vector.multi_reduction <add>, %243, %cst_77 [2] : vector<1x8x17xf32> to vector<1x8xf32>
    %245 = vector.shape_cast %244 : vector<1x8xf32> to vector<1x8x1xf32>
    %246 = tpu.reciprocal %245 {approx = true} : vector<1x8x1xf32> -> vector<1x8x1xf32>
    %247 = vector.broadcast %246 : vector<1x8x1xf32> to vector<1x8x17xf32>
    %248 = arith.mulf %243, %247 : vector<1x8x17xf32>
    %249 = arith.truncf %248 : vector<1x8x17xf32> to vector<1x8x17xbf16>
    "tpu.trace_start"() <{level = 10 : i32, message = "bqk,bke->bqe"}> : () -> ()
    %cst_78 = arith.constant dense<0.000000e+00> : vector<1x8x32xf32>
    %250 = tpu.matmul %249, %235, %cst_78 {dimension_numbers = #tpu.dot_dimension_numbers<[2], [1], [1], [2], [0, 0, 0, 1, 1, 2], [0], [0]>} : vector<1x8x17xbf16>, vector<1x17x32xbf16>, vector<1x8x32xf32> -> vector<1x8x32xf32>
    "tpu.trace_stop"() : () -> ()
    %251 = vector.extract_strided_slice %188 {offsets = [0, 0, 64], sizes = [1, 8, 32], strides = [1, 1, 1]} : vector<1x8x128xf32> to vector<1x8x32xf32>
    %252 = arith.truncf %251 : vector<1x8x32xf32> to vector<1x8x32xbf16>
    %253 = vector.extract_strided_slice %198 {offsets = [0, 0, 64], sizes = [1, 17, 32], strides = [1, 1, 1]} : vector<1x17x128xf32> to vector<1x17x32xf32>
    %254 = arith.truncf %253 : vector<1x17x32xf32> to vector<1x17x32xbf16>
    %255 = vector.extract_strided_slice %208 {offsets = [0, 0, 64], sizes = [1, 17, 32], strides = [1, 1, 1]} : vector<1x17x128xf32> to vector<1x17x32xf32>
    %256 = arith.truncf %255 : vector<1x17x32xf32> to vector<1x17x32xbf16>
    "tpu.trace_start"() <{level = 10 : i32, message = "bqe,bke->bqk"}> : () -> ()
    %cst_79 = arith.constant dense<0.000000e+00> : vector<1x8x17xf32>
    %257 = tpu.matmul %252, %254, %cst_79 {dimension_numbers = #tpu.dot_dimension_numbers<[2], [2], [1], [1], [0, 0, 0, 1, 1, 1], [0], [0]>} : vector<1x8x32xbf16>, vector<1x17x32xbf16>, vector<1x8x17xf32> -> vector<1x8x17xf32>
    "tpu.trace_stop"() : () -> ()
    %cst_80 = arith.constant 0.353553385 : f32
    %258 = vector.broadcast %cst_80 : f32 to vector<1x8x17xf32>
    %259 = arith.mulf %257, %258 : vector<1x8x17xf32>
    %cst_81 = arith.constant dense<0xFF800000> : vector<1x8xf32>
    %260 = vector.multi_reduction <maximumf>, %259, %cst_81 [2] : vector<1x8x17xf32> to vector<1x8xf32>
    %261 = vector.shape_cast %260 : vector<1x8xf32> to vector<1x8x1xf32>
    %262 = vector.broadcast %261 : vector<1x8x1xf32> to vector<1x8x17xf32>
    %263 = arith.subf %259, %262 : vector<1x8x17xf32>
    %264 = math.exp %263 : vector<1x8x17xf32>
    %cst_82 = arith.constant dense<0.000000e+00> : vector<1x8xf32>
    %265 = vector.multi_reduction <add>, %264, %cst_82 [2] : vector<1x8x17xf32> to vector<1x8xf32>
    %266 = vector.shape_cast %265 : vector<1x8xf32> to vector<1x8x1xf32>
    %267 = tpu.reciprocal %266 {approx = true} : vector<1x8x1xf32> -> vector<1x8x1xf32>
    %268 = vector.broadcast %267 : vector<1x8x1xf32> to vector<1x8x17xf32>
    %269 = arith.mulf %264, %268 : vector<1x8x17xf32>
    %270 = arith.truncf %269 : vector<1x8x17xf32> to vector<1x8x17xbf16>
    "tpu.trace_start"() <{level = 10 : i32, message = "bqk,bke->bqe"}> : () -> ()
    %cst_83 = arith.constant dense<0.000000e+00> : vector<1x8x32xf32>
    %271 = tpu.matmul %270, %256, %cst_83 {dimension_numbers = #tpu.dot_dimension_numbers<[2], [1], [1], [2], [0, 0, 0, 1, 1, 2], [0], [0]>} : vector<1x8x17xbf16>, vector<1x17x32xbf16>, vector<1x8x32xf32> -> vector<1x8x32xf32>
    "tpu.trace_stop"() : () -> ()
    %272 = vector.extract_strided_slice %188 {offsets = [0, 0, 96], sizes = [1, 8, 32], strides = [1, 1, 1]} : vector<1x8x128xf32> to vector<1x8x32xf32>
    %273 = arith.truncf %272 : vector<1x8x32xf32> to vector<1x8x32xbf16>
    %274 = vector.extract_strided_slice %198 {offsets = [0, 0, 96], sizes = [1, 17, 32], strides = [1, 1, 1]} : vector<1x17x128xf32> to vector<1x17x32xf32>
    %275 = arith.truncf %274 : vector<1x17x32xf32> to vector<1x17x32xbf16>
    %276 = vector.extract_strided_slice %208 {offsets = [0, 0, 96], sizes = [1, 17, 32], strides = [1, 1, 1]} : vector<1x17x128xf32> to vector<1x17x32xf32>
    %277 = arith.truncf %276 : vector<1x17x32xf32> to vector<1x17x32xbf16>
    "tpu.trace_start"() <{level = 10 : i32, message = "bqe,bke->bqk"}> : () -> ()
    %cst_84 = arith.constant dense<0.000000e+00> : vector<1x8x17xf32>
    %278 = tpu.matmul %273, %275, %cst_84 {dimension_numbers = #tpu.dot_dimension_numbers<[2], [2], [1], [1], [0, 0, 0, 1, 1, 1], [0], [0]>} : vector<1x8x32xbf16>, vector<1x17x32xbf16>, vector<1x8x17xf32> -> vector<1x8x17xf32>
    "tpu.trace_stop"() : () -> ()
    %cst_85 = arith.constant 0.353553385 : f32
    %279 = vector.broadcast %cst_85 : f32 to vector<1x8x17xf32>
    %280 = arith.mulf %278, %279 : vector<1x8x17xf32>
    %cst_86 = arith.constant dense<0xFF800000> : vector<1x8xf32>
    %281 = vector.multi_reduction <maximumf>, %280, %cst_86 [2] : vector<1x8x17xf32> to vector<1x8xf32>
    %282 = vector.shape_cast %281 : vector<1x8xf32> to vector<1x8x1xf32>
    %283 = vector.broadcast %282 : vector<1x8x1xf32> to vector<1x8x17xf32>
    %284 = arith.subf %280, %283 : vector<1x8x17xf32>
    %285 = math.exp %284 : vector<1x8x17xf32>
    %cst_87 = arith.constant dense<0.000000e+00> : vector<1x8xf32>
    %286 = vector.multi_reduction <add>, %285, %cst_87 [2] : vector<1x8x17xf32> to vector<1x8xf32>
    %287 = vector.shape_cast %286 : vector<1x8xf32> to vector<1x8x1xf32>
    %288 = tpu.reciprocal %287 {approx = true} : vector<1x8x1xf32> -> vector<1x8x1xf32>
    %289 = vector.broadcast %288 : vector<1x8x1xf32> to vector<1x8x17xf32>
    %290 = arith.mulf %285, %289 : vector<1x8x17xf32>
    %291 = arith.truncf %290 : vector<1x8x17xf32> to vector<1x8x17xbf16>
    "tpu.trace_start"() <{level = 10 : i32, message = "bqk,bke->bqe"}> : () -> ()
    %cst_88 = arith.constant dense<0.000000e+00> : vector<1x8x32xf32>
    %292 = tpu.matmul %291, %277, %cst_88 {dimension_numbers = #tpu.dot_dimension_numbers<[2], [1], [1], [2], [0, 0, 0, 1, 1, 2], [0], [0]>} : vector<1x8x17xbf16>, vector<1x17x32xbf16>, vector<1x8x32xf32> -> vector<1x8x32xf32>
    "tpu.trace_stop"() : () -> ()
    %293 = tpu.concatenate %229, %250, %271, %292 in 2 : vector<1x8x32xf32>, vector<1x8x32xf32>, vector<1x8x32xf32>, vector<1x8x32xf32> -> vector<1x8x128xf32>
    %294 = arith.truncf %293 : vector<1x8x128xf32> to vector<1x8x128xbf16>
    %c0_89 = arith.constant 0 : index
    %c0_90 = arith.constant 0 : index
    %c0_91 = arith.constant 0 : index
    %295 = vector.load %arg9[%c0_89, %c0_90, %c0_91] : memref<1x128x128xbf16, #tpu.memory_space<vmem>>, vector<1x128x128xbf16>
    %296 = vector.shape_cast %295 : vector<1x128x128xbf16> to vector<128x128xbf16>
    %297 = vector.shape_cast %294 : vector<1x8x128xbf16> to vector<8x128xbf16>
    %cst_92 = arith.constant dense<0.000000e+00> : vector<8x128xf32>
    %298 = tpu.matmul %297, %296, %cst_92 {dimension_numbers = #tpu.dot_dimension_numbers<[1], [0], [0], [1], [0, 0, 1, 1], [], []>} : vector<8x128xbf16>, vector<128x128xbf16>, vector<8x128xf32> -> vector<8x128xf32>
    %299 = vector.shape_cast %298 : vector<8x128xf32> to vector<1x8x128xf32>
    %300 = vector.shape_cast %178 : vector<128xf32> to vector<1x1x128xf32>
    %301 = vector.broadcast %300 : vector<1x1x128xf32> to vector<1x8x128xf32>
    %302 = arith.addf %299, %301 : vector<1x8x128xf32>
    %303 = arith.addf %302, %174 : vector<1x8x128xf32>
    %304 = vector.extract_strided_slice %5 {offsets = [10, 0], sizes = [1, 128], strides = [1, 1]} : vector<16x128xf32> to vector<1x128xf32>
    %305 = vector.shape_cast %304 : vector<1x128xf32> to vector<128xf32>
    %306 = vector.extract_strided_slice %5 {offsets = [11, 0], sizes = [1, 128], strides = [1, 1]} : vector<16x128xf32> to vector<1x128xf32>
    %307 = vector.shape_cast %306 : vector<1x128xf32> to vector<128xf32>
    %cst_93 = arith.constant dense<0.000000e+00> : vector<1x8xf32>
    %308 = vector.multi_reduction <add>, %303, %cst_93 [2] : vector<1x8x128xf32> to vector<1x8xf32>
    %309 = vector.shape_cast %308 : vector<1x8xf32> to vector<1x8x1xf32>
    %310 = arith.mulf %303, %303 : vector<1x8x128xf32>
    %cst_94 = arith.constant dense<0.000000e+00> : vector<1x8xf32>
    %311 = vector.multi_reduction <add>, %310, %cst_94 [2] : vector<1x8x128xf32> to vector<1x8xf32>
    %312 = vector.shape_cast %311 : vector<1x8xf32> to vector<1x8x1xf32>
    %cst_95 = arith.constant 3.200000e+01 : f32
    %313 = vector.broadcast %cst_95 : f32 to vector<1x8x1xf32>
    %314 = arith.divf %309, %313 : vector<1x8x1xf32>
    %cst_96 = arith.constant 3.200000e+01 : f32
    %315 = vector.broadcast %cst_96 : f32 to vector<1x8x1xf32>
    %316 = arith.divf %312, %315 : vector<1x8x1xf32>
    %317 = arith.mulf %314, %314 : vector<1x8x1xf32>
    %318 = arith.subf %316, %317 : vector<1x8x1xf32>
    %cst_97 = arith.constant 0.000000e+00 : f32
    %319 = vector.broadcast %cst_97 : f32 to vector<1x8x1xf32>
    %320 = arith.maximumf %318, %319 : vector<1x8x1xf32>
    %321 = vector.broadcast %314 : vector<1x8x1xf32> to vector<1x8x128xf32>
    %322 = arith.subf %303, %321 : vector<1x8x128xf32>
    %cst_98 = arith.constant 9.99999996E-13 : f32
    %323 = vector.broadcast %cst_98 : f32 to vector<1x8x1xf32>
    %324 = arith.addf %320, %323 : vector<1x8x1xf32>
    %325 = math.rsqrt %324 : vector<1x8x1xf32>
    %326 = vector.broadcast %325 : vector<1x8x1xf32> to vector<1x8x128xf32>
    %327 = arith.mulf %322, %326 : vector<1x8x128xf32>
    %328 = vector.shape_cast %305 : vector<128xf32> to vector<1x1x128xf32>
    %329 = vector.broadcast %328 : vector<1x1x128xf32> to vector<1x8x128xf32>
    %330 = arith.mulf %327, %329 : vector<1x8x128xf32>
    %331 = vector.shape_cast %307 : vector<128xf32> to vector<1x1x128xf32>
    %332 = vector.broadcast %331 : vector<1x1x128xf32> to vector<1x8x128xf32>
    %333 = arith.addf %330, %332 : vector<1x8x128xf32>
    %334 = arith.truncf %333 : vector<1x8x128xf32> to vector<1x8x128xbf16>
    %c0_99 = arith.constant 0 : index
    %c0_100 = arith.constant 0 : index
    %c0_101 = arith.constant 0 : index
    %335 = vector.load %arg10[%c0_99, %c0_100, %c0_101] : memref<1x128x128xbf16, #tpu.memory_space<vmem>>, vector<1x128x128xbf16>
    %336 = vector.shape_cast %335 : vector<1x128x128xbf16> to vector<128x128xbf16>
    %337 = vector.shape_cast %334 : vector<1x8x128xbf16> to vector<8x128xbf16>
    %cst_102 = arith.constant dense<0.000000e+00> : vector<8x128xf32>
    %338 = tpu.matmul %337, %336, %cst_102 {dimension_numbers = #tpu.dot_dimension_numbers<[1], [0], [0], [1], [0, 0, 1, 1], [], []>} : vector<8x128xbf16>, vector<128x128xbf16>, vector<8x128xf32> -> vector<8x128xf32>
    %339 = vector.shape_cast %338 : vector<8x128xf32> to vector<1x8x128xf32>
    %340 = vector.extract_strided_slice %5 {offsets = [12, 0], sizes = [1, 128], strides = [1, 1]} : vector<16x128xf32> to vector<1x128xf32>
    %341 = vector.shape_cast %340 : vector<1x128xf32> to vector<128xf32>
    %342 = vector.shape_cast %341 : vector<128xf32> to vector<1x1x128xf32>
    %343 = vector.broadcast %342 : vector<1x1x128xf32> to vector<1x8x128xf32>
    %344 = arith.addf %339, %343 : vector<1x8x128xf32>
    %345 = arith.mulf %344, %344 : vector<1x8x128xf32>
    %346 = arith.mulf %344, %345 : vector<1x8x128xf32>
    %cst_103 = arith.constant 4.471500e-02 : f32
    %347 = vector.broadcast %cst_103 : f32 to vector<1x8x128xf32>
    %348 = arith.mulf %347, %346 : vector<1x8x128xf32>
    %349 = arith.addf %344, %348 : vector<1x8x128xf32>
    %cst_104 = arith.constant 0.797884583 : f32
    %350 = vector.broadcast %cst_104 : f32 to vector<1x8x128xf32>
    %351 = arith.mulf %350, %349 : vector<1x8x128xf32>
    %352 = math.tanh %351 : vector<1x8x128xf32>
    %cst_105 = arith.constant 1.000000e+00 : f32
    %353 = vector.broadcast %cst_105 : f32 to vector<1x8x128xf32>
    %354 = arith.addf %353, %352 : vector<1x8x128xf32>
    %cst_106 = arith.constant 5.000000e-01 : f32
    %355 = vector.broadcast %cst_106 : f32 to vector<1x8x128xf32>
    %356 = arith.mulf %355, %354 : vector<1x8x128xf32>
    %357 = arith.mulf %344, %356 : vector<1x8x128xf32>
    %358 = arith.truncf %357 : vector<1x8x128xf32> to vector<1x8x128xbf16>
    %c0_107 = arith.constant 0 : index
    %c0_108 = arith.constant 0 : index
    %c0_109 = arith.constant 0 : index
    %359 = vector.load %arg11[%c0_107, %c0_108, %c0_109] : memref<1x128x128xbf16, #tpu.memory_space<vmem>>, vector<1x128x128xbf16>
    %360 = vector.shape_cast %359 : vector<1x128x128xbf16> to vector<128x128xbf16>
    %361 = vector.shape_cast %358 : vector<1x8x128xbf16> to vector<8x128xbf16>
    %cst_110 = arith.constant dense<0.000000e+00> : vector<8x128xf32>
    %362 = tpu.matmul %361, %360, %cst_110 {dimension_numbers = #tpu.dot_dimension_numbers<[1], [0], [0], [1], [0, 0, 1, 1], [], []>} : vector<8x128xbf16>, vector<128x128xbf16>, vector<8x128xf32> -> vector<8x128xf32>
    %363 = vector.shape_cast %362 : vector<8x128xf32> to vector<1x8x128xf32>
    %364 = vector.extract_strided_slice %5 {offsets = [13, 0], sizes = [1, 128], strides = [1, 1]} : vector<16x128xf32> to vector<1x128xf32>
    %365 = vector.shape_cast %364 : vector<1x128xf32> to vector<128xf32>
    %366 = vector.shape_cast %365 : vector<128xf32> to vector<1x1x128xf32>
    %367 = vector.broadcast %366 : vector<1x1x128xf32> to vector<1x8x128xf32>
    %368 = arith.addf %363, %367 : vector<1x8x128xf32>
    %369 = arith.addf %368, %333 : vector<1x8x128xf32>
    %370 = vector.extract_strided_slice %5 {offsets = [14, 0], sizes = [1, 128], strides = [1, 1]} : vector<16x128xf32> to vector<1x128xf32>
    %371 = vector.shape_cast %370 : vector<1x128xf32> to vector<128xf32>
    %372 = vector.extract_strided_slice %5 {offsets = [15, 0], sizes = [1, 128], strides = [1, 1]} : vector<16x128xf32> to vector<1x128xf32>
    %373 = vector.shape_cast %372 : vector<1x128xf32> to vector<128xf32>
    %cst_111 = arith.constant dense<0.000000e+00> : vector<1x8xf32>
    %374 = vector.multi_reduction <add>, %369, %cst_111 [2] : vector<1x8x128xf32> to vector<1x8xf32>
    %375 = vector.shape_cast %374 : vector<1x8xf32> to vector<1x8x1xf32>
    %376 = arith.mulf %369, %369 : vector<1x8x128xf32>
    %cst_112 = arith.constant dense<0.000000e+00> : vector<1x8xf32>
    %377 = vector.multi_reduction <add>, %376, %cst_112 [2] : vector<1x8x128xf32> to vector<1x8xf32>
    %378 = vector.shape_cast %377 : vector<1x8xf32> to vector<1x8x1xf32>
    %cst_113 = arith.constant 3.200000e+01 : f32
    %379 = vector.broadcast %cst_113 : f32 to vector<1x8x1xf32>
    %380 = arith.divf %375, %379 : vector<1x8x1xf32>
    %cst_114 = arith.constant 3.200000e+01 : f32
    %381 = vector.broadcast %cst_114 : f32 to vector<1x8x1xf32>
    %382 = arith.divf %378, %381 : vector<1x8x1xf32>
    %383 = arith.mulf %380, %380 : vector<1x8x1xf32>
    %384 = arith.subf %382, %383 : vector<1x8x1xf32>
    %cst_115 = arith.constant 0.000000e+00 : f32
    %385 = vector.broadcast %cst_115 : f32 to vector<1x8x1xf32>
    %386 = arith.maximumf %384, %385 : vector<1x8x1xf32>
    %387 = vector.broadcast %380 : vector<1x8x1xf32> to vector<1x8x128xf32>
    %388 = arith.subf %369, %387 : vector<1x8x128xf32>
    %cst_116 = arith.constant 9.99999996E-13 : f32
    %389 = vector.broadcast %cst_116 : f32 to vector<1x8x1xf32>
    %390 = arith.addf %386, %389 : vector<1x8x1xf32>
    %391 = math.rsqrt %390 : vector<1x8x1xf32>
    %392 = vector.broadcast %391 : vector<1x8x1xf32> to vector<1x8x128xf32>
    %393 = arith.mulf %388, %392 : vector<1x8x128xf32>
    %394 = vector.shape_cast %371 : vector<128xf32> to vector<1x1x128xf32>
    %395 = vector.broadcast %394 : vector<1x1x128xf32> to vector<1x8x128xf32>
    %396 = arith.mulf %393, %395 : vector<1x8x128xf32>
    %397 = vector.shape_cast %373 : vector<128xf32> to vector<1x1x128xf32>
    %398 = vector.broadcast %397 : vector<1x1x128xf32> to vector<1x8x128xf32>
    %399 = arith.addf %396, %398 : vector<1x8x128xf32>
    %c0_117 = arith.constant 0 : index
    %c0_118 = arith.constant 0 : index
    %c0_119 = arith.constant 0 : index
    %400 = vector.load %arg14[%c0_117, %c0_118, %c0_119] : memref<1x8x128xf32, #tpu.memory_space<vmem>>, vector<1x8x128xf32>
    tpu.vector_store %arg14[%c0_117, %c0_118, %c0_119], %399 {strides = array<i32>} : memref<1x8x128xf32, #tpu.memory_space<vmem>>, vector<1x8x128xf32>,
    %c1_i32 = arith.constant 1 : i32
    %401 = arith.cmpi eq, %arg1, %c1_i32 : i32
    %402 = arith.extui %401 : i1 to i32
    %c0_i32_120 = arith.constant 0 : i32
    %403 = arith.cmpi ne, %402, %c0_i32_120 : i32
    scf.if %403 {
      %c0_121 = arith.constant 0 : index
      %c0_122 = arith.constant 0 : index
      %c0_123 = arith.constant 0 : index
      %404 = vector.load %arg13[%c0_121, %c0_122, %c0_123] : memref<1x8x128xf32, #tpu.memory_space<vmem>>, vector<1x8x128xf32>
      tpu.vector_store %arg13[%c0_121, %c0_122, %c0_123], %399 {strides = array<i32>} : memref<1x8x128xf32, #tpu.memory_space<vmem>>, vector<1x8x128xf32>,
    } else {
    }
    return
  }
  func.func @transform_0(%arg0: i32, %arg1: i32) -> (i32, i32, i32) {
    %c0_i32 = arith.constant 0 : i32
    %c0_i32_0 = arith.constant 0 : i32
    %c0_i32_1 = arith.constant 0 : i32
    return %arg0, %c0_i32, %c0_i32_0 : i32, i32, i32
  }
  func.func @transform_1(%arg0: i32, %arg1: i32) -> (i32, i32, i32) {
    %c0_i32 = arith.constant 0 : i32
    %c0_i32_0 = arith.constant 0 : i32
    %c0_i32_1 = arith.constant 0 : i32
    return %arg0, %c0_i32, %c0_i32_0 : i32, i32, i32
  }
  func.func @transform_2(%arg0: i32, %arg1: i32) -> (i32, i32, i32) {
    %c0_i32 = arith.constant 0 : i32
    %c0_i32_0 = arith.constant 0 : i32
    %c0_i32_1 = arith.constant 0 : i32
    return %arg0, %c0_i32, %c0_i32_0 : i32, i32, i32
  }
  func.func @transform_3(%arg0: i32, %arg1: i32) -> (i32, i32) {
    %c0_i32 = arith.constant 0 : i32
    %c0_i32_0 = arith.constant 0 : i32
    %c0_i32_1 = arith.constant 0 : i32
    return %c0_i32, %c0_i32_0 : i32, i32
  }
  func.func @transform_4(%arg0: i32, %arg1: i32) -> (i32, i32, i32, i32) {
    %c0_i32 = arith.constant 0 : i32
    %c0_i32_0 = arith.constant 0 : i32
    %c0_i32_1 = arith.constant 0 : i32
    %c0_i32_2 = arith.constant 0 : i32
    return %arg1, %c0_i32, %c0_i32_0, %c0_i32_1 : i32, i32, i32, i32
  }
  func.func @transform_5(%arg0: i32, %arg1: i32) -> (i32, i32, i32) {
    %c0_i32 = arith.constant 0 : i32
    %c0_i32_0 = arith.constant 0 : i32
    %c0_i32_1 = arith.constant 0 : i32
    return %arg1, %c0_i32, %c0_i32_0 : i32, i32, i32
  }
  func.func @transform_6(%arg0: i32, %arg1: i32) -> (i32, i32, i32, i32) {
    %c0_i32 = arith.constant 0 : i32
    %c0_i32_0 = arith.constant 0 : i32
    %c0_i32_1 = arith.constant 0 : i32
    %c0_i32_2 = arith.constant 0 : i32
    return %arg1, %c0_i32, %c0_i32_0, %c0_i32_1 : i32, i32, i32, i32
  }
  func.func @transform_7(%arg0: i32, %arg1: i32) -> (i32, i32, i32) {
    %c0_i32 = arith.constant 0 : i32
    %c0_i32_0 = arith.constant 0 : i32
    %c0_i32_1 = arith.constant 0 : i32
    return %arg1, %c0_i32, %c0_i32_0 : i32, i32, i32
  }
  func.func @transform_8(%arg0: i32, %arg1: i32) -> (i32, i32, i32) {
    %c0_i32 = arith.constant 0 : i32
    %c0_i32_0 = arith.constant 0 : i32
    %c0_i32_1 = arith.constant 0 : i32
    return %arg1, %c0_i32, %c0_i32_0 : i32, i32, i32
  }
  func.func @transform_9(%arg0: i32, %arg1: i32) -> (i32, i32, i32) {
    %c0_i32 = arith.constant 0 : i32
    %c0_i32_0 = arith.constant 0 : i32
    %c0_i32_1 = arith.constant 0 : i32
    return %arg1, %c0_i32, %c0_i32_0 : i32, i32, i32
  }
  func.func @transform_10(%arg0: i32, %arg1: i32) -> (i32, i32, i32) {
    %c0_i32 = arith.constant 0 : i32
    %c0_i32_0 = arith.constant 0 : i32
    %c0_i32_1 = arith.constant 0 : i32
    return %arg1, %c0_i32, %c0_i32_0 : i32, i32, i32
  }
  func.func @transform_11(%arg0: i32, %arg1: i32) -> (i32, i32, i32) {
    %c0_i32 = arith.constant 0 : i32
    %c0_i32_0 = arith.constant 0 : i32
    %c0_i32_1 = arith.constant 0 : i32
    return %arg0, %c0_i32, %c0_i32_0 : i32, i32, i32
  }
}

</mosaic_0001>

<bundles_post_ra>
// kernel: blip_forward.2
= control target key start
LH: loop header
LB: loop body
LE: loop exit
PB: predicated region body
PF: predicated region fallthrough
CT: control target
= control target key end

     0   :  { %s3642_s0 = inlined_call_operand.vmem [shape: bf16[2,16,128], index: 0, kind: input, shape index: {}]   ;;  %s3643_s1 = inlined_call_operand.hbm [shape: bf16[128,128], index: 1, kind: input, shape index: {}]   ;;  %s3644_s2 = inlined_call_operand.vmem [shape: f32[17,128], index: 2, kind: input, shape index: {}]   ;;  %s3645_s3 = inlined_call_operand.vmem [shape: bf16[2,3,128,128], index: 3, kind: input, shape index: {}]   ;;  %s3646_s4 = inlined_call_operand.vmem [shape: bf16[2,128,128], index: 4, kind: input, shape index: {}]   ;;  %s3647_s5 = inlined_call_operand.vmem [shape: bf16[2,128,128], index: 5, kind: input, shape index: {}]   ;;  %s3648_s6 = inlined_call_operand.vmem [shape: bf16[2,128,128], index: 6, kind: input, shape index: {}]   ;;  %s3649_s7 = inlined_call_operand.vmem [shape: f32[2,10,128], index: 7, kind: input, shape index: {}]   ;;  %s3650_s8 = inlined_call_operand.vmem [shape: f32[2,128], index: 8, kind: input, shape index: {}]   ;;  %s3651_s9 = inlined_call_operand.vmem [shape: bf16[2,17,128], index: 9, kind: output, shape index: {}]  }
   0x1   :  { %3652 = sst [smem:[#allocation8_spill]] %s3642_s0 }
   0x2   :  { %3653 = sst [smem:[#allocation9_spill]] %s3643_s1 }
   0x3   :  { %14 = vsyncpa [#allocation4], 0  ;;  %s3221_s30 = smov 0   ;;  %s3223_s10 = smov 0  }
   0x4   :  { %s3225_s11 = smov 0   ;;  %s3227_s12 = smov 0  }
   0x5   :  { %s3229_s13 = smov 0  }
   0x6 LB: > { %s2426_s14 = sadd.s32 4294967295, %s3160_s13   ;;  %s29_s15 = sadd.s32 1, %s3152_s11  ;;  %s3160_s13 = sphi %s3229_s13, %s20_s13   ;;  %s3156_s12 = sphi %s3227_s12, %s3666_s12   ;;  %s3152_s11 = sphi %s3225_s11, %s3665_s11   ;;  %s3148_s10 = sphi %s3223_s10, %s3664_s10   ;;  %s3144_s30 = sphi %s3221_s30, %s3663_s30  }
   0x7   : > { %p30_p0 = scmp.ge.s32.totalorder %s29_s15, 2  ;;  %s32_s16 = sadd.s32 1, %s3156_s12 }
   0x8   : > { %p2428_p1 = scmp.ge.s32.totalorder %s3160_s13, 1  ;;  %p282_p2 = scmp.lt.s32.totalorder %s3160_s13, 5 }
   0x9   : > { %s3668_s15 = smov (%p30_p0, %s29_s15), 0  ;;  %s3670_s16 = smov (!%p30_p0, %s32_s16), %s3156_s12 }
   0xa   : > { %3654 = sst [smem:[#allocation6_spill]] %s3668_s15  ;;  %p3254_p3 = pnand %p2428_p1, %p282_p2 }
   0xb   : > { %p34_p4 = scmp.ge.s32.totalorder %s3670_s16, 2  ;;  %p3258_p5 = scmp.eq.s32.totalorder %s2426_s14, 0 }
   0xc   : > { %p2889_p6 = pneg %p3254_p3  ;;  %s3162_s19 = smov [#allocation3]  }
   0xd   : > { %s3672_s16 = smov (%p34_p4, %s3670_s16), 0  ;;  %s294_s20 = sshll.u32 %s3162_s19, 4  ;;  %s295_s20 = int_to_ptr.vmem [resolvable:$true] %s294_s20 }
   0xe   : > { %3657 = sst [smem:[#allocation7_spill]] %s3672_s16  ;;  %p3268_p7 = pnand %p3258_p5, %p2889_p6 }
   0xf   : > { %s3103_s22 = scalar_lea.vmem %s295_s20, 1024  ;;  %p3111_p12 = scmp.lt.s32.totalorder %s295_s20, %s295_s20 }
  0x10   : > { %p3094_p8 = pneg %p3268_p7  ;;  %p3104_p9 = scmp.ne.s32.totalorder %s295_s20, %s3103_s22 }
  0x11   : > { %p3112_p13 = scmp.lt.s32.totalorder %s3103_s22, %s3103_s22 }
  0x12   : > { %p3106_p10 = pnand %p3104_p9, %p3094_p8 }
  0x13   : > { %p3113_p0 = por %p3112_p13, %p3111_p12 }
  0x14   : > { %p3107_p11 = pneg %p3106_p10 }
  0x16   : > { %p3114_p1 = pnand %p3113_p0, %p3107_p11 }
  0x18   : > { %3117 = shalt.err (!%p3114_p1)
}
  0x19   : > { %s3163_s23 = smov 64   ;;  %s3164_s24 = smov 4  }
  0x1a   : > { %s3659_s1 = sld [smem:[#allocation9_spill]] }
  0x1c   : > { %364 = sbr.rel (%p3254_p3) target bundleno = 3599 (0xe0f), region = 56 }
  0x20   : > { %2892 = dma.hbm_to_vmem [thread:$0]  (!%p3268_p7), %s3659_s1, 1024, %s295_s20, [#allocation4], %s3163_s23, %s3163_s23, %s3164_s24  }
  0x21   : > { %3139 = dma.done.wait (%p3258_p5), [#allocation4], 1024  }
  0x22   : > { %3141 = vsyncadd (%p3258_p5), [#allocation4], 4294966272  ;;  %p425_p2 = scmp.lt.s32.totalorder %s3148_s10, 1  ;;  %p430_p4 = scmp.lt.s32.totalorder %s3144_s30, 1 }
  0x23   : > { %s3660_s0 = sld [smem:[#allocation8_spill]]  ;;  %p2445_p3 = scmp.ne.s32.totalorder %s3144_s30, 0 }
  0x24   : > { %s3674_s10 = smov (!%p425_p2, %s3148_s10), 1 }
  0x25   : > { %s431_s27 = scalar_select %p430_p4, %s3144_s30, 1 }
  0x26   : > { %s2557_s28 = sshll.u32 %s3674_s10, 3  ;;  %s2884_s29 = smul.u32 12, %s3674_s10 }
  0x27   : > { %s2883_s20 = smul.u32 192, %s431_s27  ;;  %s2558_s21 = sshll.u32 %s431_s27, 6 }
  0x28   : > { %s2561_s22 = sshll.u32 %s431_s27, 4  ;;  %s3302_s1 = scalar_lea.vmem %s3646_s4, %s2558_s21 }
  0x29   : > { %s3292_s17 = scalar_lea.vmem %s3660_s0, %s2557_s28  ;;  %s3297_s24 = scalar_lea.vmem %s3645_s3, %s2883_s20 }
  0x2a   : > { %s3307_s15 = scalar_lea.vmem %s3647_s5, %s2558_s21  ;;  %s3312_s19 = scalar_lea.vmem %s3648_s6, %s2558_s21 }
  0x2b   : > { %s3317_s20 = scalar_lea.vmem %s3649_s7, %s2561_s22  ;;  %s3322_s25 = scalar_lea.vmem %s3651_s9, %s2884_s29 }
  0x2c   : > { %464 = sbr.rel (%p2445_p3) target bundleno = 285 (0x11d), region = 64 }
  0x31   : > { %v2944_v0 = vld [vmem:[#allocation3 + $0x38] sm:$0xff]   ;;  %v3165_v1 = vmov 0.0   ;;  %v2945_v2 = vld [vmem:[#allocation3 + $0x30] sm:$0xff]   ;;  %vm3166_vm0 = vmmov 0   ;;  %v2946_v3 = vld [vmem:[#allocation3 + $0x28] sm:$0xff]   ;;  %vm580_vm1 = vcmask 1040384  }
  0x32   : > { %2671 = vmatprep.subr.bf16.mxu0 %v3165_v1  ;;  %2687 = vmatprep.mubr.msk.bf16.mxu0 %vm3166_vm0, %v3165_v1  ;;  %v2947_v4 = vld [vmem:[#allocation3 + $0x20] sm:$0xff]   ;;  %v2948_v5 = vld [vmem:[#allocation3 + $0x18] sm:$0xff]   ;;  %v2949_v6 = vld [vmem:[#allocation3 + $0x10] sm:$0xff]  }
  0x33   : > { %2672 = vmatpush3.bf16.msra.mxu0 %v2944_v0  ;;  %v2950_v7 = vld [vmem:[#allocation3 + $0x8] sm:$0xff]   ;;  %v2951_v8 = vld [vmem:[#allocation3] sm:$0xff]   ;;  %v590_v17 = vld [vmem:[%s3644_s2 + $0x10] sm:$0x1] }
  0x34   : > { %2673 = vmatprep.subr.bf16.mxu0 %v3165_v1  ;;  %v2952_v9 = vld [vmem:[%s3292_s17] sm:$0xff]   ;;  %v589_v19 = vld [vmem:[%s3644_s2 + $0x8] sm:$0xff] }
  0x35   : > { %v588_v12 = vld [vmem:[%s3644_s2] sm:$0xff] }
  0x37   : > { %2674 = vmatpush3.bf16.msra.mxu0 %v2945_v2 }
  0x38   : > { %2675 = vmatprep.subr.bf16.mxu0 %v3165_v1 }
  0x3b   : > { %2676 = vmatpush3.bf16.msra.mxu0 %v2946_v3 }
  0x3c   : > { %2677 = vmatprep.subr.bf16.mxu0 %v3165_v1 }
  0x3f   : > { %2678 = vmatpush3.bf16.msra.mxu0 %v2947_v4 }
  0x40   : > { %2679 = vmatprep.subr.bf16.mxu0 %v3165_v1 }
  0x43   : > { %2680 = vmatpush3.bf16.msra.mxu0 %v2948_v5 }
  0x44   : > { %2681 = vmatprep.subr.bf16.mxu0 %v3165_v1 }
  0x47   : > { %2682 = vmatpush3.bf16.msra.mxu0 %v2949_v6 }
  0x48   : > { %2683 = vmatprep.subr.bf16.mxu0 %v3165_v1 }
  0x4b   : > { %2684 = vmatpush3.bf16.msra.mxu0 %v2950_v7 }
  0x4c   : > { %2685 = vmatprep.subr.bf16.mxu0 %v3165_v1 }
  0x4f   : > { %2686 = vmatpush3.bf16.msra.mxu0 %v2951_v8 }
  0x52   : > { %2688 = vmatmul.mubr.bf16.vlgmr.msra.gmra.mxu0 %v2952_v9 }
 0x112   : > { %v571_v10 = vpop.f32.mrf.mxu0 }
 0x113   : > { %v581_v11 = vrot.slane %v571_v10, 7 }
 0x114   : > { %v2689_v13 = vpop.f32.mrf.mxu0 }
 0x115   : > { %v587_v14 = vsel %vm580_vm1, 0.0, %v581_v11 }
 0x116   : > { %v591_v15 = vadd.f32 %v588_v12, %v587_v14  ;;  %v574_v16 = vpop.f32.mrf.mxu0 }
 0x117   : > { %v582_v18 = vrot.slane %v574_v16, 7 }
 0x118   : > { %594 = vst [vmem:[#allocation2 + $0x10] sm:$0xff] %v591_v15  ;;  %v2690_v20 = vpop.f32.mrf.mxu0 }
 0x119   : > { %v583_v21 = vsel %vm580_vm1, %v581_v11, %v582_v18  ;;  %v593_v22 = vadd.f32 %v590_v17, %v582_v18 }
 0x11a   : > { %v592_v23 = vadd.f32 %v589_v19, %v583_v21 }
 0x11b   : > { %596 = vst [vmem:[#allocation2 + $0x8] sm:$0x1] %v593_v22 }
 0x11c   : > { %595 = vst [vmem:[#allocation2] sm:$0xff] %v592_v23 }
 0x11d PF: > { %vm606_vm2 = vcmask 1040384   ;;  %v2968_v32 = vld [vmem:[%s3297_s24 + $0x38] sm:$0xff]   ;;  %v2970_v34 = vld [vmem:[%s3297_s24 + $0x30] sm:$0xff]   ;;  %v2972_v36 = vld [vmem:[%s3297_s24 + $0x28] sm:$0xff]   ;;  %v648_v8 = vlaneseq  ;;  %vm1029_vm3 = vcmask 261120   ;;  %vm1093_vm4 = vcmask 138240  }
 0x11e   : > { %v2969_v33 = vld [vmem:[%s3297_s24 + $0x78] sm:$0xff]   ;;  %2691 = vmatprep.subr.bf16.mxu0 %v2968_v32  ;;  %v2971_v35 = vld [vmem:[%s3297_s24 + $0x70] sm:$0xff]   ;;  %v2973_v37 = vld [vmem:[%s3297_s24 + $0x68] sm:$0xff]   ;;  %vm1100_vm5 = vcmask 131072   ;;  %s3169_s26 = smov 64   ;;  %s3170_s10 = smov 32  }
 0x11f   : > { %v3335_v24 = vld [vmem:[#allocation2 + $0x10] sm:$0xff]  ;;  %2692 = vmatpush3.bf16.msra.mxu0 %v2968_v32  ;;  %2711 = vmatprep.subr.bf16.mxu1 %v2969_v33  ;;  %v2974_v38 = vld [vmem:[%s3297_s24 + $0x20] sm:$0xff]   ;;  %v2976_v40 = vld [vmem:[%s3297_s24 + $0x18] sm:$0xff]   ;;  %v3369_v10 = vshrl.u32 %v648_v8, 7  ;;  %vm1738_vm6 = vcmask 523264   ;;  %vm1742_vm7 = vcmask 785408  }
 0x120   : > { %602 = vadd.xlane.f32.xlu0 %v3335_v24  ;;  %v610_v29 = vmul.f32 %v3335_v24, %v3335_v24  ;;  %2712 = vmatpush3.bf16.msra.mxu1 %v2969_v33  ;;  %v2975_v39 = vld [vmem:[%s3297_s24 + $0x60] sm:$0xff]   ;;  %v2977_v41 = vld [vmem:[%s3297_s24 + $0x58] sm:$0xff]   ;;  %v2978_v42 = vld [vmem:[%s3297_s24 + $0x10] sm:$0xff]   ;;  %p2551_p5 = scmp.ne.s32.totalorder %s3144_s30, 1 }
 0x121   : > { %2693 = vmatprep.subr.bf16.mxu0 %v2970_v34  ;;  %2713 = vmatprep.subr.bf16.mxu1 %v2971_v35  ;;  %v2979_v43 = vld [vmem:[%s3297_s24 + $0x50] sm:$0xff]   ;;  %v2980_v44 = vld [vmem:[%s3297_s24 + $0x8] sm:$0xff]   ;;  %v2982_v46 = vld [vmem:[%s3297_s24] sm:$0xff]   ;;  %v3372_v11 = vsub.s32 0, %v3369_v10  ;;  %v3381_v16 = vsub.s32 1, %v3369_v10 }
 0x122   : > { %v3337_v25 = vld [vmem:[#allocation2 + $0x8] sm:$0x1]  ;;  %v2983_v47 = vld [vmem:[%s3297_s24 + $0x40] sm:$0xff]   ;;  %v2984_v48 = vld [vmem:[%s3297_s24 + $0xb8] sm:$0xff]  }
 0x123   : > { %v607_v26 = vsel %vm606_vm2, %v3337_v25, 0.0  ;;  %v3342_v27 = vld [vmem:[#allocation2] sm:$0xff]  ;;  %v612_v28 = vmul.f32 %v3337_v25, %v3337_v25  ;;  %2694 = vmatpush3.bf16.msra.mxu0 %v2970_v34  ;;  %v2981_v45 = vld [vmem:[%s3297_s24 + $0x48] sm:$0xff]   ;;  %v2985_v34 = vld [vmem:[%s3297_s24 + $0xb0] sm:$0xff]  }
 0x124   : > { %608 = vadd.xlane.f32.xlu1 %v607_v26  ;;  %604 = vadd.xlane.f32.xlu0 %v3342_v27  ;;  %v611_v31 = vmul.f32 %v3342_v27, %v3342_v27  ;;  %v3375_v12 = vld [vmem:[%s3317_s20] sm:$0xff] }
 0x125   : > { %v617_v30 = vsel %vm606_vm2, %v612_v28, 0.0  ;;  %2714 = vmatpush3.bf16.msra.mxu1 %v2971_v35  ;;  %2695 = vmatprep.subr.bf16.mxu0 %v2972_v36  ;;  %v651_v15 = vrot.slane %v3375_v12, %v3372_v11  ;;  %v2987_v35 = vld [vmem:[%s3297_s24 + $0xa0] sm:$0xff]  }
 0x126   : > { %2715 = vmatprep.subr.bf16.mxu1 %v2973_v37 }
 0x127   : > { %2696 = vmatpush3.bf16.msra.mxu0 %v2972_v36  ;;  %v2988_v36 = vld [vmem:[%s3297_s24 + $0x98] sm:$0xff]  }
 0x128   : > { %613 = vadd.xlane.f32.xlu1 %v610_v29  ;;  %615 = vadd.xlane.f32.xlu0 %v611_v31 }
 0x129   : > { %2716 = vmatpush3.bf16.msra.mxu1 %v2973_v37  ;;  %2697 = vmatprep.subr.bf16.mxu0 %v2974_v38  ;;  %v2989_v37 = vld [vmem:[%s3297_s24 + $0x90] sm:$0xff]  }
 0x12a   : > { %2717 = vmatprep.subr.bf16.mxu1 %v2975_v39 }
 0x12b   : > { %2698 = vmatpush3.bf16.msra.mxu0 %v2974_v38  ;;  %v2990_v38 = vld [vmem:[%s3297_s24 + $0x88] sm:$0xff]  }
 0x12c   : > { %618 = vadd.xlane.f32.xlu1 %v617_v30  ;;  %2699 = vmatprep.subr.bf16.mxu0 %v2976_v40 }
 0x12d   : > { %2718 = vmatpush3.bf16.msra.mxu1 %v2975_v39  ;;  %v2991_v39 = vld [vmem:[%s3297_s24 + $0x80] sm:$0xff]  }
 0x12e   : > { %2719 = vmatprep.subr.bf16.mxu1 %v2977_v41 }
 0x12f   : > { %2700 = vmatpush3.bf16.msra.mxu0 %v2976_v40  ;;  %v898_v40 = vsub.s32 3, %v3369_v10 }
 0x130   : > { %2701 = vmatprep.subr.bf16.mxu0 %v2978_v42 }
 0x131   : > { %2720 = vmatpush3.bf16.msra.mxu1 %v2977_v41  ;;  %v899_v41 = vrot.slane %v3375_v12, %v898_v40 }
 0x132   : > { %2721 = vmatprep.subr.bf16.mxu1 %v2979_v43 }
 0x133   : > { %2702 = vmatpush3.bf16.msra.mxu0 %v2978_v42 }
 0x134   : > { %2703 = vmatprep.subr.bf16.mxu0 %v2980_v44 }
 0x135   : > { %2722 = vmatpush3.bf16.msra.mxu1 %v2979_v43 }
 0x136   : > { %2723 = vmatprep.subr.bf16.mxu1 %v2981_v45 }
 0x137   : > { %2704 = vmatpush3.bf16.msra.mxu0 %v2980_v44  ;;  %v778_v44 = vsub.s32 2, %v3369_v10 }
 0x138   : > { %2705 = vmatprep.subr.bf16.mxu0 %v2982_v46 }
 0x139   : > { %2724 = vmatpush3.bf16.msra.mxu1 %v2981_v45 }
 0x13a   : > { %2725 = vmatprep.subr.bf16.mxu1 %v2983_v47 }
 0x13b   : > { %2706 = vmatpush3.bf16.msra.mxu0 %v2982_v46 }
 0x13c   : > { %2731 = vmatprep.subr.bf16.mxu0 %v2984_v48 }
 0x13d   : > { %2726 = vmatpush3.bf16.msra.mxu1 %v2983_v47 }
 0x1a9   : > { %v603_v49 = vpop.xlane.xlu0 %602 }
 0x1aa   : > { %v621_v51 = vmul.f32 0.03125, %v603_v49 }
 0x1ac   : > { %v627_v55 = vmul.f32 %v621_v51, %v621_v51  ;;  %v636_v13 = vsub.f32 %v3335_v24, %v621_v51  ;;  %v658_v24 = vrot.slane %v3375_v12, %v3381_v16  ;;  %v779_v51 = vrot.slane %v3375_v12, %v778_v44 }
 0x1ad   : > { %v609_v50 = vpop.xlane.xlu1 %608  ;;  %v605_v52 = vpop.xlane.xlu0 %604 }
 0x1ae   : > { %v622_v53 = vmul.f32 0.03125, %v605_v52  ;;  %v623_v56 = vmul.f32 0.03125, %v609_v50 }
 0x1b0   : > { %v628_v60 = vmul.f32 %v622_v53, %v622_v53  ;;  %v629_v63 = vmul.f32 %v623_v56, %v623_v56  ;;  %v637_v18 = vsub.f32 %v3342_v27, %v622_v53  ;;  %v638_v20 = vsub.f32 %v3337_v25, %v623_v56  ;;  %v2986_v25 = vld [vmem:[%s3297_s24 + $0xa8] sm:$0xff]   ;;  %s3168_s24 = smov 96  }
 0x1b1   : > { %v614_v54 = vpop.xlane.xlu1 %613  ;;  %v616_v59 = vpop.xlane.xlu0 %615 }
 0x1b2   : > { %v624_v57 = vmul.f32 0.03125, %v614_v54  ;;  %v625_v61 = vmul.f32 0.03125, %v616_v59 }
 0x1b4   : > { %v630_v58 = vsub.f32 %v624_v57, %v627_v55  ;;  %v631_v2 = vsub.f32 %v625_v61, %v628_v60 }
 0x1b5   : > { %v619_v62 = vpop.xlane.xlu1 %618 }
 0x1b6   : > { %v633_v0 = vmax.f32 %v630_v58, 0.0  ;;  %v626_v1 = vmul.f32 0.03125, %v619_v62  ;;  %v634_v5 = vmax.f32 %v631_v2, 0.0 }
 0x1b8   : > { %v639_v3 = vadd.f32 1e-06, %v633_v0  ;;  %v632_v4 = vsub.f32 %v626_v1, %v629_v63  ;;  %v640_v7 = vadd.f32 1e-06, %v634_v5  ;;  %v1018_v0 = vsub.s32 4, %v3369_v10 }
 0x1b9   : > { %v3167_v5 = vmov 0  }
 0x1ba   : > { %3016 = vrsqrt.f32 %v639_v3  ;;  %v635_v6 = vmax.f32 %v632_v4, 0.0  ;;  %v1019_v1 = vrot.slane %v3375_v12, %v1018_v0 }
 0x1bb   : > { %3018 = vrsqrt.f32 %v640_v7 }
 0x1bc   : > { %v641_v9 = vadd.f32 1e-06, %v635_v6  ;;  %v3421_v6 = vsel %vm606_vm2, 65535, %v3167_v5 }
 0x1be   : > { %3020 = vrsqrt.f32 %v641_v9 }
 0x1c7   : > { %v3017_v14 = vpop.eup %3016 }
 0x1c8   : > { %v645_v17 = vmul.f32 %v3017_v14, %v636_v13  ;;  %v3019_v19 = vpop.eup %3018 }
 0x1c9   : > { %v646_v22 = vmul.f32 %v3019_v19, %v637_v18 }
 0x1ca   : > { %v652_v23 = vmul.f32 %v651_v15, %v645_v17 }
 0x1cb   : > { %v3021_v21 = vpop.eup %3020  ;;  %v653_v28 = vmul.f32 %v651_v15, %v646_v22 }
 0x1cc   : > { %v647_v26 = vmul.f32 %v3021_v21, %v638_v20  ;;  %v659_v30 = vadd.f32 %v658_v24, %v652_v23 }
 0x1cd   : > { %v660_v31 = vadd.f32 %v658_v24, %v653_v28 }
 0x1ce   : > { %v654_v29 = vmul.f32 %v651_v15, %v647_v26 }
 0x1cf   : > { %v662_v33 = vpack.c.bf16 %v660_v31, %v659_v30 }
 0x1d0   : > { %v661_v32 = vadd.f32 %v658_v24, %v654_v29 }
 0x1d1   : > { %2707 = vmatprep.mubr.bf16.mxu0 %v662_v33  ;;  %2727 = vmatprep.mubr.bf16.mxu1 %v662_v33 }
 0x1d2   : > { %v663_v27 = vpack.c.bf16 %v661_v32, %v661_v32 }
 0x1d4   : > { %2708 = vmatmul.mubr.bf16.vlgmr.msra.gmra.mxu0 %v663_v27  ;;  %2728 = vmatmul.mubr.bf16.vlgmr.msra.gmra.mxu1 %v663_v27 }
 0x1d5   : > { %2732 = vmatpush3.bf16.msra.mxu0 %v2984_v48  ;;  %2747 = vmatprep.mubr.bf16.mxu0 %v662_v33 }
 0x1d6   : > { %2733 = vmatprep.subr.bf16.mxu0 %v2985_v34 }
 0x1d9   : > { %2734 = vmatpush3.bf16.msra.mxu0 %v2985_v34 }
 0x1da   : > { %2735 = vmatprep.subr.bf16.mxu0 %v2986_v25 }
 0x1dd   : > { %2736 = vmatpush3.bf16.msra.mxu0 %v2986_v25 }
 0x1de   : > { %2737 = vmatprep.subr.bf16.mxu0 %v2987_v35 }
 0x1e1   : > { %2738 = vmatpush3.bf16.msra.mxu0 %v2987_v35 }
 0x1e2   : > { %2739 = vmatprep.subr.bf16.mxu0 %v2988_v36 }
 0x1e5   : > { %2740 = vmatpush3.bf16.msra.mxu0 %v2988_v36 }
 0x1e6   : > { %2741 = vmatprep.subr.bf16.mxu0 %v2989_v37 }
 0x1e9   : > { %2742 = vmatpush3.bf16.msra.mxu0 %v2989_v37 }
 0x1ea   : > { %2743 = vmatprep.subr.bf16.mxu0 %v2990_v38 }
 0x1ed   : > { %2744 = vmatpush3.bf16.msra.mxu0 %v2990_v38 }
 0x1ee   : > { %2745 = vmatprep.subr.bf16.mxu0 %v2991_v39 }
 0x1f1   : > { %2746 = vmatpush3.bf16.msra.mxu0 %v2991_v39 }
 0x1f4   : > { %2748 = vmatmul.mubr.bf16.vlgmr.msra.gmra.mxu0 %v663_v27 }
 0x294   : > { %v2709_v42 = vpop.f32.mrf.mxu0  ;;  %v2729_v43 = vpop.f32.mrf.mxu1 }
 0x295   : > { %v902_v45 = vadd.f32 %v2729_v43, %v899_v41  ;;  %v782_v62 = vadd.f32 %v2709_v42, %v779_v51 }
 0x296   : > { %v762_v46 = vpop.f32.mrf.mxu0  ;;  %v882_v47 = vpop.f32.mrf.mxu1 }
 0x297   : > { %v3397_v48 = vpack.c.bf16 %v902_v45, %v902_v45  ;;  %v780_v55 = vadd.f32 %v779_v51, %v762_v46  ;;  %v900_v56 = vadd.f32 %v899_v41, %v882_v47  ;;  %v3414_v63 = vpack.c.bf16 %v782_v62, %v782_v62 }
 0x298   : > { %v2710_v49 = vpop.f32.mrf.mxu0  ;;  %v2730_v50 = vpop.f32.mrf.mxu1 }
 0x299   : > { %2875 = vmatprep.subr.msk.bf16.mxu1 %vm1029_vm3, %v3397_v48  ;;  %v1040_v52 = vsel %vm1029_vm3, %v3397_v48, 0 }
 0x29a   : > { %v765_v53 = vpop.f32.mrf.mxu0  ;;  %v885_v54 = vpop.f32.mrf.mxu1  ;;  %2752 = vmatpush3.bf16.xpose.msra.mxu1 %v1040_v52 }
 0x29b   : > { %v781_v57 = vadd.f32 %v779_v51, %v765_v53  ;;  %v901_v58 = vadd.f32 %v899_v41, %v885_v54 }
 0x29d   : > { %v3404_v59 = vpack.c.bf16 %v781_v57, %v780_v55  ;;  %v3406_v60 = vpack.c.bf16 %v901_v58, %v900_v56 }
 0x29f   : > { %2876 = vmatprep.subr.msk.bf16.mxu1 %vm1029_vm3, %v3406_v60  ;;  %2755 = vmatprep.mubr.msk.bf16.mxu1 %vm1029_vm3, %v3404_v59  ;;  %v1037_v61 = vsel %vm1029_vm3, %v3406_v60, 0 }
 0x2a2   : > { %2754 = vmatpush3.bf16.xpose.msra.mxu1 %v1037_v61 }
 0x2a9   : > { %2756 = vmatmul.mubr.msk.bf16.vlgmr.msra.gmra.mxu1 %vm1029_vm3, %v3414_v63 }
 0x2b4   : > { %v2749_v2 = vpop.f32.mrf.mxu0 }
 0x2b5   : > { %v1022_v3 = vadd.f32 %v2749_v2, %v1019_v1 }
 0x2b6   : > { %v1002_v4 = vpop.f32.mrf.mxu0 }
 0x2b7   : > { %v3423_v7 = vpack.c.bf16 %v1022_v3, %v1022_v3  ;;  %v1020_v14 = vadd.f32 %v1019_v1, %v1002_v4 }
 0x2b8   : > { %v2750_v8 = vpop.f32.mrf.mxu0 }
 0x2b9   : > { %v1139_v9 = vand.u32 %v3421_v6, %v3423_v7 }
 0x2ba   : > { %v1005_v13 = vpop.f32.mrf.mxu0 }
 0x2bb   : > { %v1021_v15 = vadd.f32 %v1019_v1, %v1005_v13  ;;  %2759 = vmatprep.subr.bf16.mxu1 %v1139_v9 }
 0x2bc   : > { %2760 = vmatpush3.bf16.msra.mxu1 %v1139_v9 }
 0x2bd   : > { %v3427_v17 = vpack.c.bf16 %v1021_v15, %v1020_v14 }
 0x2bf   : > { %2761 = vmatprep.subr.bf16.mxu1 %v3427_v17 }
 0x2c0   : > { %2762 = vmatpush3.bf16.msra.mxu1 %v3427_v17 }
 0x369   : > { %v2757_v18 = vpop.f32.mrf.mxu1 }
 0x36a   : > { %v1092_v22 = vmul.f32 0.35355338, %v2757_v18 }
 0x36b   : > { %v1076_v19 = vpop.f32.mrf.mxu1 }
 0x36c   : > { %v1090_v20 = vmul.f32 0.35355338, %v1076_v19  ;;  %v1101_v28 = vsel %vm1100_vm5, %v1092_v22, -inf }
 0x36d   : > { %v2758_v21 = vpop.f32.mrf.mxu1 }
 0x36e   : > { %v1094_v23 = vsel %vm1093_vm4, %v1090_v20, -inf }
 0x36f   : > { %1095 = vmax.xlane.f32.xlu0 %v1094_v23  ;;  %v1079_v24 = vpop.f32.mrf.mxu1 }
 0x370   : > { %v1091_v26 = vmul.f32 0.35355338, %v1079_v24 }
 0x372   : > { %v1097_v29 = vsel %vm1093_vm4, %v1091_v26, -inf }
 0x373   : > { %1102 = vmax.xlane.f32.xlu0 %v1101_v28  ;;  %1098 = vmax.xlane.f32.xlu1 %v1097_v29 }
 0x3f8   : > { %v1096_v30 = vpop.xlane.xlu0 %1095 }
 0x3f9   : > { %v1104_v31 = vsub.f32 %v1090_v20, %v1096_v30 }
 0x3fb   : > { %v1107_v32 = vmul.f32 1.442695, %v1104_v31 }
 0x3fc   : > { %v1103_v33 = vpop.xlane.xlu0 %1102  ;;  %v1099_v27 = vpop.xlane.xlu1 %1098 }
 0x3fd   : > { %3022 = vpow2.f32 %v1107_v32  ;;  %v1106_v34 = vsub.f32 %v1092_v22, %v1103_v33  ;;  %v1105_v25 = vsub.f32 %v1091_v26, %v1099_v27 }
 0x3ff   : > { %v1111_v35 = vmul.f32 1.442695, %v1106_v34  ;;  %v1109_v36 = vmul.f32 1.442695, %v1105_v25 }
 0x401   : > { %3024 = vpow2.f32 %v1111_v35 }
 0x402   : > { %3026 = vpow2.f32 %v1109_v36 }
 0x40a   : > { %v3023_v37 = vpop.eup %3022 }
 0x40b   : > { %v1113_v38 = vsel %vm1093_vm4, %v3023_v37, 0.0 }
 0x40c   : > { %1114 = vadd.xlane.f32.xlu1 %v1113_v38 }
 0x40e   : > { %v3025_v39 = vpop.eup %3024 }
 0x40f   : > { %v3027_v40 = vpop.eup %3026  ;;  %v1119_v41 = vsel %vm1100_vm5, %v3025_v39, 0.0 }
 0x410   : > { %1120 = vadd.xlane.f32.xlu1 %v1119_v41  ;;  %v1116_v42 = vsel %vm1093_vm4, %v3027_v40, 0.0 }
 0x411   : > { %1117 = vadd.xlane.f32.xlu0 %v1116_v42 }
 0x421   : > { %1197 = vrot.lane.b32.xlu1 %v3406_v60, %s3168_s24 }
 0x425   : > { %1191 = vrot.lane.b32.xlu1 %v3404_v59, %s3168_s24 }
 0x427   : > { %1199 = vrot.lane.b32.xlu0 %v3397_v48, %s3168_s24 }
 0x429   : > { %1369 = vrot.lane.b32.xlu1 %v3397_v48, %s3169_s26 }
 0x42b   : > { %1193 = vrot.lane.b32.xlu0 %v3414_v63, %s3168_s24 }
 0x42d   : > { %1367 = vrot.lane.b32.xlu1 %v3406_v60, %s3169_s26 }
 0x42f   : > { %1363 = vrot.lane.b32.xlu0 %v3404_v59, %s3169_s26 }
 0x431   : > { %1365 = vrot.lane.b32.xlu1 %v3414_v63, %s3169_s26 }
 0x495   : > { %v1115_v43 = vpop.xlane.xlu1 %1114 }
 0x496   : > { %3028 = vrcp.f32 %v1115_v43 }
 0x499   : > { %v1121_v44 = vpop.xlane.xlu1 %1120 }
 0x49a   : > { %v1118_v45 = vpop.xlane.xlu0 %1117  ;;  %3030 = vrcp.f32 %v1121_v44 }
 0x49b   : > { %3032 = vrcp.f32 %v1118_v45 }
 0x49d   : > { %v1198_v51 = vpop.permute.xlu1 %1197 }
 0x49e   : > { %v1200_v46 = vpop.permute.xlu0 %1199  ;;  %v1208_v61 = vsel %vm1029_vm3, %v1198_v51, 0 }
 0x49f   : > { %2877 = vmatprep.subr.msk.bf16.mxu1 %vm1029_vm3, %v1200_v46  ;;  %v1211_v57 = vsel %vm1029_vm3, %v1200_v46, 0 }
 0x4a1   : > { %v1192_v58 = vpop.permute.xlu1 %1191 }
 0x4a2   : > { %v1194_v0 = vpop.permute.xlu0 %1193 }
 0x4a3   : > { %v3029_v47 = vpop.eup %3028 }
 0x4a4   : > { %v1125_v53 = vmul.f32 %v3029_v47, %v3023_v37 }
 0x4a5   : > { %v1370_v62 = vpop.permute.xlu1 %1369 }
 0x4a6   : > { %v1364_v1 = vpop.permute.xlu0 %1363  ;;  %v1381_v2 = vsel %vm1029_vm3, %v1370_v62, 0 }
 0x4a7   : > { %v3031_v49 = vpop.eup %3030 }
 0x4a8   : > { %v3033_v50 = vpop.eup %3032  ;;  %v1127_v52 = vmul.f32 %v3031_v49, %v3025_v39 }
 0x4a9   : > { %v1126_v54 = vmul.f32 %v3033_v50, %v3027_v40  ;;  %v1368_v3 = vpop.permute.xlu1 %1367 }
 0x4aa   : > { %v1129_v55 = vpack.c.bf16 %v1127_v52, %v1127_v52  ;;  %v1378_v4 = vsel %vm1029_vm3, %v1368_v3, 0 }
 0x4ab   : > { %v1128_v56 = vpack.c.bf16 %v1126_v54, %v1125_v53 }
 0x4ad   : > { %2763 = vmatprep.mubr.msk.bf16.mxu1 %vm1093_vm4, %v1128_v56  ;;  %v1366_v5 = vpop.permute.xlu1 %1365 }
 0x4ae   : > { %2764 = vmatmul.mubr.msk.bf16.vlgmr.msra.gmra.mxu1 %vm1093_vm4, %v1129_v55 }
 0x4af   : > { %2768 = vmatpush3.bf16.xpose.msra.mxu1 %v1211_v57  ;;  %2771 = vmatprep.mubr.msk.bf16.mxu1 %vm1029_vm3, %v1192_v58 }
 0x4b0   : > { %2878 = vmatprep.subr.msk.bf16.mxu1 %vm1029_vm3, %v1198_v51 }
 0x4b7   : > { %2770 = vmatpush3.bf16.xpose.msra.mxu1 %v1208_v61 }
 0x4b8   : > { %2879 = vmatprep.subr.msk.bf16.mxu1 %vm1029_vm3, %v1370_v62 }
 0x4be   : > { %2772 = vmatmul.mubr.msk.bf16.vlgmr.msra.gmra.mxu1 %vm1029_vm3, %v1194_v0 }
 0x4bf   : > { %2784 = vmatpush3.bf16.xpose.msra.mxu1 %v1381_v2  ;;  %2787 = vmatprep.mubr.msk.bf16.mxu1 %vm1029_vm3, %v1364_v1 }
 0x4c0   : > { %2880 = vmatprep.subr.msk.bf16.mxu1 %vm1029_vm3, %v1368_v3 }
 0x4c7   : > { %2786 = vmatpush3.bf16.xpose.msra.mxu1 %v1378_v4 }
 0x4ce   : > { %2788 = vmatmul.mubr.msk.bf16.vlgmr.msra.gmra.mxu1 %vm1029_vm3, %v1366_v5 }
 0x56e   : > { %v3467_v8 = vpop.f32.mrf.mxu1 }
 0x570   : > { %v3469_v9 = vpop.f32.mrf.mxu1 }
 0x572   : > { %v2766_v13 = vpop.f32.mrf.mxu1 }
 0x574   : > { %v3471_v14 = vpop.f32.mrf.mxu1 }
 0x57e   : > { %v2773_v15 = vpop.f32.mrf.mxu1 }
 0x57f   : > { %v1263_v47 = vmul.f32 0.35355338, %v2773_v15 }
 0x580   : > { %v1247_v18 = vpop.f32.mrf.mxu1 }
 0x581   : > { %v1261_v46 = vmul.f32 0.35355338, %v1247_v18 }
 0x582   : > { %v2774_v19 = vpop.f32.mrf.mxu1 }
 0x583   : > { %v1264_v49 = vsel %vm1093_vm4, %v1261_v46, -inf }
 0x584   : > { %v1250_v20 = vpop.f32.mrf.mxu1 }
 0x585   : > { %v1262_v50 = vmul.f32 0.35355338, %v1250_v20 }
 0x587   : > { %v1267_v51 = vsel %vm1093_vm4, %v1262_v50, -inf }
 0x58e   : > { %v2789_v21 = vpop.f32.mrf.mxu1 }
 0x58f   : > { %v1433_v26 = vmul.f32 0.35355338, %v2789_v21 }
 0x590   : > { %v1417_v22 = vpop.f32.mrf.mxu1 }
 0x591   : > { %v1431_v23 = vmul.f32 0.35355338, %v1417_v22  ;;  %v1440_v31 = vsel %vm1100_vm5, %v1433_v26, -inf }
 0x592   : > { %v2790_v24 = vpop.f32.mrf.mxu1 }
 0x593   : > { %v1434_v28 = vsel %vm1093_vm4, %v1431_v23, -inf }
 0x594   : > { %1435 = vmax.xlane.f32.xlu0 %v1434_v28  ;;  %v1420_v29 = vpop.f32.mrf.mxu1 }
 0x595   : > { %v1432_v30 = vmul.f32 0.35355338, %v1420_v29 }
 0x597   : > { %v1437_v32 = vsel %vm1093_vm4, %v1432_v30, -inf }
 0x598   : > { %1441 = vmax.xlane.f32.xlu0 %v1440_v31  ;;  %1438 = vmax.xlane.f32.xlu1 %v1437_v32 }
 0x61d   : > { %v1436_v33 = vpop.xlane.xlu0 %1435 }
 0x61e   : > { %v1443_v27 = vsub.f32 %v1431_v23, %v1436_v33 }
 0x620   : > { %v1446_v34 = vmul.f32 1.442695, %v1443_v27 }
 0x621   : > { %v1442_v25 = vpop.xlane.xlu0 %1441  ;;  %v1439_v35 = vpop.xlane.xlu1 %1438 }
 0x622   : > { %3034 = vpow2.f32 %v1446_v34  ;;  %v1445_v36 = vsub.f32 %v1433_v26, %v1442_v25  ;;  %v1444_v37 = vsub.f32 %v1432_v30, %v1439_v35 }
 0x624   : > { %v1450_v38 = vmul.f32 1.442695, %v1445_v36  ;;  %v1448_v39 = vmul.f32 1.442695, %v1444_v37 }
 0x626   : > { %3036 = vpow2.f32 %v1450_v38 }
 0x627   : > { %3038 = vpow2.f32 %v1448_v39 }
 0x62f   : > { %v3035_v40 = vpop.eup %3034 }
 0x630   : > { %v1452_v41 = vsel %vm1093_vm4, %v3035_v40, 0.0 }
 0x631   : > { %1453 = vadd.xlane.f32.xlu0 %v1452_v41 }
 0x633   : > { %v3037_v42 = vpop.eup %3036 }
 0x634   : > { %v3039_v43 = vpop.eup %3038  ;;  %v1458_v44 = vsel %vm1100_vm5, %v3037_v42, 0.0 }
 0x635   : > { %1459 = vadd.xlane.f32.xlu1 %v1458_v44  ;;  %v1455_v45 = vsel %vm1093_vm4, %v3039_v43, 0.0 }
 0x636   : > { %1456 = vadd.xlane.f32.xlu0 %v1455_v45 }
 0x646   : > { %1469 = vrot.lane.b32.xlu1 %v3427_v17, %s3169_s26 }
 0x64a   : > { %1537 = vrot.lane.b32.xlu1 %v3397_v48, %s3170_s10  ;;  %v1270_v48 = vsel %vm1100_vm5, %v1263_v47, -inf }
 0x64c   : > { %1471 = vrot.lane.b32.xlu0 %v3423_v7, %s3169_s26 }
 0x64e   : > { %1535 = vrot.lane.b32.xlu1 %v3406_v60, %s3170_s10 }
 0x650   : > { %1531 = vrot.lane.b32.xlu0 %v3404_v59, %s3170_s10 }
 0x652   : > { %1533 = vrot.lane.b32.xlu1 %v3414_v63, %s3170_s10 }
 0x66f   : > { %1265 = vmax.xlane.f32.xlu0 %v1264_v49 }
 0x673   : > { %1271 = vmax.xlane.f32.xlu0 %v1270_v48 }
 0x676   : > { %1268 = vmax.xlane.f32.xlu1 %v1267_v51 }
 0x6ba   : > { %v1454_v52 = vpop.xlane.xlu0 %1453 }
 0x6bb   : > { %3040 = vrcp.f32 %v1454_v52 }
 0x6be   : > { %v1460_v60 = vpop.xlane.xlu1 %1459 }
 0x6bf   : > { %v1457_v53 = vpop.xlane.xlu0 %1456  ;;  %3042 = vrcp.f32 %v1460_v60 }
 0x6c0   : > { %3044 = vrcp.f32 %v1457_v53 }
 0x6c2   : > { %v1470_v54 = vpop.permute.xlu1 %1469 }
 0x6c3   : > { %v1472_v59 = vpop.permute.xlu0 %1471 }
 0x6c4   : > { %v1481_v63 = vand.u32 %v1472_v59, %v3421_v6 }
 0x6c6   : > { %2791 = vmatprep.subr.bf16.mxu1 %v1481_v63  ;;  %v1538_v56 = vpop.permute.xlu1 %1537 }
 0x6c7   : > { %2792 = vmatpush3.bf16.msra.mxu1 %v1481_v63  ;;  %v1532_v3 = vpop.permute.xlu0 %1531  ;;  %v1549_v4 = vsel %vm1029_vm3, %v1538_v56, 0 }
 0x6c8   : > { %2793 = vmatprep.subr.bf16.mxu1 %v1470_v54  ;;  %v3041_v55 = vpop.eup %3040 }
 0x6c9   : > { %v1464_v62 = vmul.f32 %v3041_v55, %v3035_v40 }
 0x6ca   : > { %v1536_v5 = vpop.permute.xlu1 %1535 }
 0x6cb   : > { %2794 = vmatpush3.bf16.msra.mxu1 %v1470_v54  ;;  %v1546_v13 = vsel %vm1029_vm3, %v1536_v5, 0 }
 0x6cc   : > { %v3043_v57 = vpop.eup %3042  ;;  %2881 = vmatprep.subr.msk.bf16.mxu1 %vm1029_vm3, %v1538_v56 }
 0x6cd   : > { %v3045_v58 = vpop.eup %3044  ;;  %v1466_v61 = vmul.f32 %v3043_v57, %v3037_v42 }
 0x6ce   : > { %v1465_v0 = vmul.f32 %v3045_v58, %v3039_v43  ;;  %v1534_v15 = vpop.permute.xlu1 %1533 }
 0x6cf   : > { %v1468_v1 = vpack.c.bf16 %v1466_v61, %v1466_v61 }
 0x6d0   : > { %v1467_v2 = vpack.c.bf16 %v1465_v0, %v1464_v62 }
 0x6d2   : > { %2795 = vmatprep.mubr.msk.bf16.mxu1 %vm1093_vm4, %v1467_v2 }
 0x6d3   : > { %2796 = vmatmul.mubr.msk.bf16.vlgmr.msra.gmra.mxu1 %vm1093_vm4, %v1468_v1 }
 0x6d4   : > { %2800 = vmatpush3.bf16.xpose.msra.mxu1 %v1549_v4  ;;  %2803 = vmatprep.mubr.msk.bf16.mxu1 %vm1029_vm3, %v1532_v3 }
 0x6d5   : > { %2882 = vmatprep.subr.msk.bf16.mxu1 %vm1029_vm3, %v1536_v5 }
 0x6dc   : > { %2802 = vmatpush3.bf16.xpose.msra.mxu1 %v1546_v13 }
 0x6e3   : > { %2804 = vmatmul.mubr.msk.bf16.vlgmr.msra.gmra.mxu1 %vm1029_vm3, %v1534_v15 }
 0x6f8   : > { %v1266_v20 = vpop.xlane.xlu0 %1265 }
 0x6f9   : > { %v1273_v26 = vsub.f32 %v1261_v46, %v1266_v20 }
 0x6fb   : > { %v1276_v31 = vmul.f32 1.442695, %v1273_v26 }
 0x6fc   : > { %v1272_v28 = vpop.xlane.xlu0 %1271 }
 0x6fd   : > { %v1275_v32 = vsub.f32 %v1263_v47, %v1272_v28 }
 0x6ff   : > { %v1269_v18 = vpop.xlane.xlu1 %1268  ;;  %v1280_v33 = vmul.f32 1.442695, %v1275_v32 }
 0x700   : > { %v1274_v19 = vsub.f32 %v1262_v50, %v1269_v18 }
 0x702   : > { %v1278_v23 = vmul.f32 1.442695, %v1274_v19 }
 0x704   : > { %3046 = vpow2.f32 %v1278_v23 }
 0x705   : > { %3048 = vpow2.f32 %v1276_v31 }
 0x706   : > { %3050 = vpow2.f32 %v1280_v33 }
 0x711   : > { %v3047_v37 = vpop.eup %3046 }
 0x712   : > { %v1285_v42 = vsel %vm1093_vm4, %v3047_v37, 0.0  ;;  %v3049_v44 = vpop.eup %3048 }
 0x713   : > { %v1282_v45 = vsel %vm1093_vm4, %v3049_v44, 0.0  ;;  %v3051_v46 = vpop.eup %3050 }
 0x714   : > { %v1288_v47 = vsel %vm1100_vm5, %v3051_v46, 0.0 }
 0x793   : > { %v3503_v21 = vpop.f32.mrf.mxu1 }
 0x795   : > { %v3505_v22 = vpop.f32.mrf.mxu1 }
 0x797   : > { %v2798_v24 = vpop.f32.mrf.mxu1 }
 0x799   : > { %v3507_v29 = vpop.f32.mrf.mxu1 }
 0x79a   : > { %v2958_v30 = vpack.i.bf16 %v3507_v29, %v3505_v22 }
 0x7a3   : > { %v2805_v27 = vpop.f32.mrf.mxu1 }
 0x7a4   : > { %v1601_v34 = vmul.f32 0.35355338, %v2805_v27 }
 0x7a5   : > { %v1585_v25 = vpop.f32.mrf.mxu1 }
 0x7a6   : > { %v1599_v35 = vmul.f32 0.35355338, %v1585_v25  ;;  %v1608_v36 = vsel %vm1100_vm5, %v1601_v34, -inf }
 0x7a7   : > { %1609 = vmax.xlane.f32.xlu1 %v1608_v36  ;;  %v2806_v38 = vpop.f32.mrf.mxu1 }
 0x7a8   : > { %v1602_v39 = vsel %vm1093_vm4, %v1599_v35, -inf  ;;  %v2992_v38 = vld [vmem:[%s3302_s1 + $0x38] sm:$0xff]  }
 0x7a9   : > { %1603 = vmax.xlane.f32.xlu0 %v1602_v39  ;;  %v1588_v40 = vpop.f32.mrf.mxu1  ;;  %v2993_v39 = vld [vmem:[%s3302_s1 + $0x30] sm:$0xff]  }
 0x7aa   : > { %v1600_v41 = vmul.f32 0.35355338, %v1588_v40  ;;  %v2994_v40 = vld [vmem:[%s3302_s1 + $0x28] sm:$0xff]  }
 0x7ab   : > { %1286 = vadd.xlane.f32.xlu1 %v1285_v42  ;;  %v2996_v42 = vld [vmem:[%s3302_s1 + $0x18] sm:$0xff]  }
 0x7ac   : > { %v1605_v43 = vsel %vm1093_vm4, %v1600_v41, -inf }
 0x7ad   : > { %1606 = vmax.xlane.f32.xlu0 %v1605_v43  ;;  %v2997_v43 = vld [vmem:[%s3302_s1 + $0x10] sm:$0xff]  }
 0x7b1   : > { %1283 = vadd.xlane.f32.xlu0 %v1282_v45  ;;  %v2998_v45 = vld [vmem:[%s3302_s1 + $0x8] sm:$0xff]  }
 0x7b5   : > { %1289 = vadd.xlane.f32.xlu0 %v1288_v47 }
 0x830   : > { %v1610_v49 = vpop.xlane.xlu1 %1609 }
 0x831   : > { %v1613_v50 = vsub.f32 %v1601_v34, %v1610_v49  ;;  %v2999_v49 = vld [vmem:[%s3302_s1] sm:$0xff]  }
 0x832   : > { %v1604_v48 = vpop.xlane.xlu0 %1603 }
 0x833   : > { %v1618_v51 = vmul.f32 1.442695, %v1613_v50  ;;  %v1611_v52 = vsub.f32 %v1599_v35, %v1604_v48 }
 0x834   : > { %v1287_v59 = vpop.xlane.xlu1 %1286 }
 0x835   : > { %3052 = vpow2.f32 %v1618_v51  ;;  %v1614_v60 = vmul.f32 1.442695, %v1611_v52 }
 0x836   : > { %v1607_v53 = vpop.xlane.xlu0 %1606 }
 0x837   : > { %3054 = vpow2.f32 %v1614_v60  ;;  %v1612_v63 = vsub.f32 %v1600_v41, %v1607_v53  ;;  %v2995_v41 = vld [vmem:[%s3302_s1 + $0x20] sm:$0xff]  }
 0x838   : > { %3056 = vrcp.f32 %v1287_v59 }
 0x839   : > { %v1616_v54 = vmul.f32 1.442695, %v1612_v63 }
 0x83a   : > { %v1284_v55 = vpop.xlane.xlu0 %1283 }
 0x83b   : > { %3058 = vpow2.f32 %v1616_v54 }
 0x83c   : > { %3060 = vrcp.f32 %v1284_v55 }
 0x83e   : > { %v1290_v13 = vpop.xlane.xlu0 %1289 }
 0x83f   : > { %3062 = vrcp.f32 %v1290_v13 }
 0x842   : > { %v3053_v56 = vpop.eup %3052 }
 0x843   : > { %v1626_v57 = vsel %vm1100_vm5, %v3053_v56, 0.0 }
 0x844   : > { %v3055_v58 = vpop.eup %3054  ;;  %1627 = vadd.xlane.f32.xlu1 %v1626_v57 }
 0x845   : > { %v3057_v61 = vpop.eup %3056  ;;  %v1620_v62 = vsel %vm1093_vm4, %v3055_v58, 0.0 }
 0x846   : > { %v1295_v4 = vmul.f32 %v3057_v61, %v3047_v37 }
 0x848   : > { %v3059_v0 = vpop.eup %3058  ;;  %1621 = vadd.xlane.f32.xlu1 %v1620_v62 }
 0x849   : > { %v3061_v1 = vpop.eup %3060  ;;  %v1623_v2 = vsel %vm1093_vm4, %v3059_v0, 0.0 }
 0x84a   : > { %1624 = vadd.xlane.f32.xlu0 %v1623_v2  ;;  %v1294_v3 = vmul.f32 %v3061_v1, %v3049_v44 }
 0x84c   : > { %v1297_v5 = vpack.c.bf16 %v1295_v4, %v1294_v3  ;;  %v3063_v26 = vpop.eup %3062 }
 0x84e   : > { %2779 = vmatprep.mubr.msk.bf16.mxu0 %vm1093_vm4, %v1297_v5 }
 0x859   : > { %1301 = vrot.lane.b32.xlu1 %v3427_v17, %s3168_s24 }
 0x85d   : > { %1639 = vrot.lane.b32.xlu1 %v3423_v7, %s3170_s10 }
 0x860   : > { %1303 = vrot.lane.b32.xlu0 %v3423_v7, %s3168_s24  ;;  %v1296_v7 = vmul.f32 %v3063_v26, %v3051_v46  ;;  %v3082_v26 = vld [vmem:[#allocation2 + $0x8] sm:$0x1] }
 0x861   : > { %1637 = vrot.lane.b32.xlu1 %v3427_v17, %s3170_s10 }
 0x862   : > { %v1298_v33 = vpack.c.bf16 %v1296_v7, %v1296_v7 }
 0x8cd   : > { %v1628_v15 = vpop.xlane.xlu1 %1627 }
 0x8d1   : > { %v1622_v18 = vpop.xlane.xlu1 %1621 }
 0x8d2   : > { %3064 = vrcp.f32 %v1622_v18 }
 0x8d3   : > { %3066 = vrcp.f32 %v1628_v15  ;;  %v1625_v19 = vpop.xlane.xlu0 %1624 }
 0x8d4   : > { %3068 = vrcp.f32 %v1625_v19 }
 0x8d5   : > { %v1302_v20 = vpop.permute.xlu1 %1301 }
 0x8d7   : > { %v1304_v23 = vpop.permute.xlu0 %1303 }
 0x8d8   : > { %v1313_v24 = vand.u32 %v1304_v23, %v3421_v6 }
 0x8d9   : > { %v1640_v28 = vpop.permute.xlu1 %1639 }
 0x8da   : > { %2775 = vmatprep.subr.bf16.mxu0 %v1313_v24  ;;  %v1649_v17 = vand.u32 %v1640_v28, %v3421_v6 }
 0x8db   : > { %2776 = vmatpush3.bf16.msra.mxu0 %v1313_v24 }
 0x8dc   : > { %2777 = vmatprep.subr.bf16.mxu0 %v1302_v20 }
 0x8dd   : > { %v1638_v35 = vpop.permute.xlu1 %1637 }
 0x8df   : > { %v3065_v31 = vpop.eup %3064  ;;  %2778 = vmatpush3.bf16.msra.mxu0 %v1302_v20  ;;  %v1862_v20 = vsub.s32 5, %v3369_v10 }
 0x8e0   : > { %v3067_v32 = vpop.eup %3066  ;;  %2807 = vmatprep.subr.bf16.mxu0 %v1649_v17  ;;  %v1632_v34 = vmul.f32 %v3065_v31, %v3055_v58 }
 0x8e1   : > { %v3069_v27 = vpop.eup %3068  ;;  %v1634_v37 = vmul.f32 %v3067_v32, %v3053_v56 }
 0x8e2   : > { %2780 = vmatmul.mubr.msk.bf16.vlgmr.msra.gmra.mxu0 %vm1093_vm4, %v1298_v33  ;;  %v1633_v25 = vmul.f32 %v3069_v27, %v3059_v0  ;;  %v3083_v27 = vld [vmem:[#allocation2 + $0x10] sm:$0xff] }
 0x8e3   : > { %2808 = vmatpush3.bf16.msra.mxu0 %v1649_v17  ;;  %v1636_v6 = vpack.c.bf16 %v1634_v37, %v1634_v37 }
 0x8e4   : > { %2809 = vmatprep.subr.bf16.mxu0 %v1638_v35  ;;  %v1635_v36 = vpack.c.bf16 %v1633_v25, %v1632_v34 }
 0x8e6   : > { %2811 = vmatprep.mubr.msk.bf16.mxu0 %vm1093_vm4, %v1635_v36 }
 0x8e7   : > { %2810 = vmatpush3.bf16.msra.mxu0 %v1638_v35 }
 0x8e8   : > { %2815 = vmatprep.subr.bf16.mxu0 %v2992_v38 }
 0x8ea   : > { %2812 = vmatmul.mubr.msk.bf16.vlgmr.msra.gmra.mxu0 %vm1093_vm4, %v1636_v6 }
 0x8eb   : > { %2816 = vmatpush3.bf16.msra.mxu0 %v2992_v38  ;;  %v3000_v38 = vld [vmem:[%s3307_s15 + $0x38] sm:$0xff]  }
 0x8ec   : > { %2817 = vmatprep.subr.bf16.mxu0 %v2993_v39  ;;  %2835 = vmatprep.subr.bf16.mxu1 %v3000_v38 }
 0x8ed   : > { %2836 = vmatpush3.bf16.msra.mxu1 %v3000_v38  ;;  %v3013_v38 = vld [vmem:[%s3312_s19 + $0x10] sm:$0xff]  }
 0x8ef   : > { %2818 = vmatpush3.bf16.msra.mxu0 %v2993_v39  ;;  %v3001_v39 = vld [vmem:[%s3307_s15 + $0x30] sm:$0xff]  }
 0x8f0   : > { %2819 = vmatprep.subr.bf16.mxu0 %v2994_v40  ;;  %2837 = vmatprep.subr.bf16.mxu1 %v3001_v39 }
 0x8f1   : > { %2838 = vmatpush3.bf16.msra.mxu1 %v3001_v39  ;;  %v3014_v39 = vld [vmem:[%s3312_s19 + $0x8] sm:$0xff]  }
 0x8f3   : > { %2820 = vmatpush3.bf16.msra.mxu0 %v2994_v40  ;;  %v3002_v40 = vld [vmem:[%s3307_s15 + $0x28] sm:$0xff]  }
 0x8f4   : > { %2821 = vmatprep.subr.bf16.mxu0 %v2995_v41  ;;  %2839 = vmatprep.subr.bf16.mxu1 %v3002_v40 }
 0x8f5   : > { %2840 = vmatpush3.bf16.msra.mxu1 %v3002_v40  ;;  %v3015_v40 = vld [vmem:[%s3312_s19] sm:$0xff]  }
 0x8f7   : > { %2822 = vmatpush3.bf16.msra.mxu0 %v2995_v41  ;;  %v3003_v41 = vld [vmem:[%s3307_s15 + $0x20] sm:$0xff]  }
 0x8f8   : > { %2823 = vmatprep.subr.bf16.mxu0 %v2996_v42  ;;  %2841 = vmatprep.subr.bf16.mxu1 %v3003_v41 }
 0x8f9   : > { %2842 = vmatpush3.bf16.msra.mxu1 %v3003_v41  ;;  %v601_v41 = vld [vmem:[%s3317_s20 + $0x8] sm:$0x3] }
 0x8fb   : > { %2824 = vmatpush3.bf16.msra.mxu0 %v2996_v42  ;;  %v3004_v42 = vld [vmem:[%s3307_s15 + $0x18] sm:$0xff]  }
 0x8fc   : > { %2825 = vmatprep.subr.bf16.mxu0 %v2997_v43  ;;  %2843 = vmatprep.subr.bf16.mxu1 %v3004_v42 }
 0x8fd   : > { %2844 = vmatpush3.bf16.msra.mxu1 %v3004_v42  ;;  %v2045_v42 = vrot.slane %v601_v41, %v3372_v11 }
 0x8ff   : > { %2826 = vmatpush3.bf16.msra.mxu0 %v2997_v43  ;;  %v3005_v43 = vld [vmem:[%s3307_s15 + $0x10] sm:$0xff]  }
 0x900   : > { %2827 = vmatprep.subr.bf16.mxu0 %v2998_v45  ;;  %2845 = vmatprep.subr.bf16.mxu1 %v3005_v43 }
 0x901   : > { %2846 = vmatpush3.bf16.msra.mxu1 %v3005_v43 }
 0x903   : > { %2828 = vmatpush3.bf16.msra.mxu0 %v2998_v45  ;;  %v3007_v45 = vld [vmem:[%s3307_s15] sm:$0xff]  }
 0x904   : > { %2829 = vmatprep.subr.bf16.mxu0 %v2999_v49 }
 0x907   : > { %2830 = vmatpush3.bf16.msra.mxu0 %v2999_v49 }
 0x9a2   : > { %v2781_v44 = vpop.f32.mrf.mxu0 }
 0x9a3   : > { %1706 = vrot.lane.b32.xlu1 %v2781_v44, %s3170_s10  ;;  %v3006_v44 = vld [vmem:[%s3307_s15 + $0x8] sm:$0xff]  }
 0x9a4   : > { %v1349_v46 = vpop.f32.mrf.mxu0  ;;  %2847 = vmatprep.subr.bf16.mxu1 %v3006_v44 }
 0x9a5   : > { %2848 = vmatpush3.bf16.msra.mxu1 %v3006_v44 }
 0x9a6   : > { %v2782_v47 = vpop.f32.mrf.mxu0  ;;  %2849 = vmatprep.subr.bf16.mxu1 %v3007_v45 }
 0x9a7   : > { %1718 = vrot.lane.b32.xlu1 %v3503_v21, %s3169_s26 }
 0x9a8   : > { %v1352_v50 = vpop.f32.mrf.mxu0 }
 0x9a9   : > { %v2953_v48 = vpack.i.bf16 %v1352_v50, %v1349_v46  ;;  %2850 = vmatpush3.bf16.msra.mxu1 %v3007_v45 }
 0x9aa   : > { %v2813_v51 = vpop.f32.mrf.mxu0 }
 0x9ab   : > { %2954 = vrot.lane.b32.xlu0 %v2953_v48, %s3170_s10  ;;  %1730 = vrot.lane.b32.xlu1 %v2813_v51, %s3168_s24 }
 0x9ac   : > { %v1685_v52 = vpop.f32.mrf.mxu0 }
 0x9ae   : > { %v2814_v60 = vpop.f32.mrf.mxu0 }
 0x9af   : > { %2959 = vrot.lane.b32.xlu0 %v2958_v30, %s3169_s26 }
 0x9b0   : > { %v1688_v53 = vpop.f32.mrf.mxu0 }
 0x9b1   : > { %v2963_v59 = vpack.i.bf16 %v1688_v53, %v1685_v52 }
 0x9b3   : > { %2964 = vrot.lane.b32.xlu0 %v2963_v59, %s3168_s24 }
 0xa15   : > { %v1707_v21 = vpop.permute.xlu1 %1706 }
 0xa16   : > { %v1737_v62 = vsel %vm1029_vm3, %v3467_v8, %v1707_v21 }
 0xa19   : > { %v1719_v54 = vpop.permute.xlu1 %1718 }
 0xa1a   : > { %v1741_v22 = vsel %vm1738_vm6, %v1737_v62, %v1719_v54 }
 0xa1d   : > { %v2955_v63 = vpop.permute.xlu0 %2954  ;;  %v1731_v0 = vpop.permute.xlu1 %1730 }
 0xa1e   : > { %v2957_v56 = vunpack.i.h.bf16 %v2955_v63  ;;  %v2956_v57 = vunpack.i.l.bf16 %v2955_v63  ;;  %v1745_v4 = vsel %vm1742_vm7, %v1741_v22, %v1731_v0 }
 0xa1f   : > { %v1747_v19 = vpack.c.bf16 %v1745_v4, %v1745_v4 }
 0xa20   : > { %v1736_v30 = vsel %vm1029_vm3, %v3471_v14, %v2957_v56  ;;  %v1735_v1 = vsel %vm1029_vm3, %v3469_v9, %v2956_v57  ;;  %v1863_v14 = vrot.slane %v3375_v12, %v1862_v20  ;;  %v3084_v12 = vld [vmem:[#allocation2] sm:$0xff] }
 0xa21   : > { %v2960_v55 = vpop.permute.xlu0 %2959 }
 0xa22   : > { %v2962_v58 = vunpack.i.h.bf16 %v2960_v55  ;;  %v2961_v61 = vunpack.i.l.bf16 %v2960_v55 }
 0xa24   : > { %v1739_v5 = vsel %vm1738_vm6, %v1735_v1, %v2961_v61  ;;  %v1740_v13 = vsel %vm1738_vm6, %v1736_v30, %v2962_v58 }
 0xa25   : > { %v2965_v29 = vpop.permute.xlu0 %2964 }
 0xa26   : > { %v2967_v2 = vunpack.i.h.bf16 %v2965_v29  ;;  %v2966_v3 = vunpack.i.l.bf16 %v2965_v29 }
 0xa28   : > { %v1743_v15 = vsel %vm1742_vm7, %v1739_v5, %v2966_v3  ;;  %v1744_v8 = vsel %vm1742_vm7, %v1740_v13, %v2967_v2  ;;  %v1916_v2 = vsub.s32 6, %v3369_v10  ;;  %v3085_v13 = vld [vmem:[%s3317_s20] sm:$0xff] }
 0xa29   : > { %v1746_v18 = vpack.c.bf16 %v1744_v8, %v1743_v15  ;;  %v1923_v8 = vsub.s32 7, %v3369_v10 }
 0xa2a   : > { %v1917_v15 = vrot.slane %v3085_v13, %v1916_v2 }
 0xa2b   : > { %2831 = vmatprep.mubr.bf16.mxu0 %v1746_v18 }
 0xa2c   : > { %2832 = vmatmul.mubr.bf16.vlgmr.msra.gmra.mxu0 %v1747_v19 }
 0xaec   : > { %v2833_v23 = vpop.f32.mrf.mxu0 }
 0xaed   : > { %v1866_v24 = vadd.f32 %v2833_v23, %v1863_v14 }
 0xaee   : > { %v1846_v9 = vpop.f32.mrf.mxu0 }
 0xaef   : > { %v3563_v28 = vadd.f32 %v3082_v26, %v1866_v24  ;;  %v1864_v7 = vadd.f32 %v1863_v14, %v1846_v9  ;;  %v1924_v24 = vrot.slane %v3085_v13, %v1923_v8 }
 0xaf0   : > { %v2834_v17 = vpop.f32.mrf.mxu0 }
 0xaf1   : > { %v1874_v31 = vsel %vm606_vm2, %v3563_v28, 0.0  ;;  %v3567_v34 = vadd.f32 %v3083_v27, %v1864_v7  ;;  %v1879_v35 = vmul.f32 %v3563_v28, %v3563_v28 }
 0xaf2   : > { %1875 = vadd.xlane.f32.xlu0 %v1874_v31  ;;  %v1849_v32 = vpop.f32.mrf.mxu0 }
 0xaf3   : > { %v1865_v33 = vadd.f32 %v1863_v14, %v1849_v32  ;;  %v1877_v36 = vmul.f32 %v3567_v34, %v3567_v34  ;;  %v1884_v37 = vsel %vm606_vm2, %v1879_v35, 0.0  ;;  %v3009_v35 = vld [vmem:[%s3312_s19 + $0x30] sm:$0xff]  }
 0xaf5   : > { %v3569_v25 = vadd.f32 %v3084_v12, %v1865_v33  ;;  %v3008_v12 = vld [vmem:[%s3312_s19 + $0x38] sm:$0xff]  }
 0xaf6   : > { %1870 = vadd.xlane.f32.xlu0 %v3567_v34  ;;  %2855 = vmatprep.subr.bf16.mxu0 %v3008_v12 }
 0xaf7   : > { %1872 = vadd.xlane.f32.xlu1 %v3569_v25  ;;  %v1878_v6 = vmul.f32 %v3569_v25, %v3569_v25  ;;  %2856 = vmatpush3.bf16.msra.mxu0 %v3008_v12 }
 0xaf8   : > { %2857 = vmatprep.subr.bf16.mxu0 %v3009_v35 }
 0xafa   : > { %1880 = vadd.xlane.f32.xlu0 %v1877_v36  ;;  %v3010_v36 = vld [vmem:[%s3312_s19 + $0x28] sm:$0xff]  }
 0xafb   : > { %1885 = vadd.xlane.f32.xlu1 %v1884_v37  ;;  %2858 = vmatpush3.bf16.msra.mxu0 %v3009_v35  ;;  %v3011_v37 = vld [vmem:[%s3312_s19 + $0x20] sm:$0xff]  }
 0xafc   : > { %2859 = vmatprep.subr.bf16.mxu0 %v3010_v36 }
 0xafe   : > { %1882 = vadd.xlane.f32.xlu0 %v1878_v6  ;;  %v3012_v6 = vld [vmem:[%s3312_s19 + $0x18] sm:$0xff]  }
 0xaff   : > { %2860 = vmatpush3.bf16.msra.mxu0 %v3010_v36 }
 0xb00   : > { %2861 = vmatprep.subr.bf16.mxu0 %v3011_v37 }
 0xb03   : > { %2862 = vmatpush3.bf16.msra.mxu0 %v3011_v37 }
 0xb04   : > { %2863 = vmatprep.subr.bf16.mxu0 %v3012_v6 }
 0xb07   : > { %2864 = vmatpush3.bf16.msra.mxu0 %v3012_v6 }
 0xb08   : > { %2865 = vmatprep.subr.bf16.mxu0 %v3013_v38 }
 0xb0b   : > { %2866 = vmatpush3.bf16.msra.mxu0 %v3013_v38 }
 0xb0c   : > { %2867 = vmatprep.subr.bf16.mxu0 %v3014_v39 }
 0xb0f   : > { %2868 = vmatpush3.bf16.msra.mxu0 %v3014_v39 }
 0xb10   : > { %2869 = vmatprep.subr.bf16.mxu0 %v3015_v40 }
 0xb13   : > { %2870 = vmatpush3.bf16.msra.mxu0 %v3015_v40 }
 0xb7b   : > { %v1876_v46 = vpop.xlane.xlu0 %1875 }
 0xb7c   : > { %v1889_v48 = vmul.f32 0.03125, %v1876_v46 }
 0xb7e   : > { %v1895_v21 = vmul.f32 %v1889_v48, %v1889_v48  ;;  %v1904_v5 = vsub.f32 %v3563_v28, %v1889_v48 }
 0xb7f   : > { %v1871_v47 = vpop.xlane.xlu0 %1870 }
 0xb80   : > { %v1887_v49 = vmul.f32 0.03125, %v1871_v47  ;;  %v1873_v50 = vpop.xlane.xlu1 %1872 }
 0xb81   : > { %v1888_v60 = vmul.f32 0.03125, %v1873_v50 }
 0xb82   : > { %v1893_v52 = vmul.f32 %v1887_v49, %v1887_v49  ;;  %v1902_v3 = vsub.f32 %v3567_v34, %v1887_v49 }
 0xb83   : > { %v1881_v51 = vpop.xlane.xlu0 %1880  ;;  %v1894_v57 = vmul.f32 %v1888_v60, %v1888_v60  ;;  %v1903_v14 = vsub.f32 %v3569_v25, %v1888_v60 }
 0xb84   : > { %v1890_v53 = vmul.f32 0.03125, %v1881_v51  ;;  %v1886_v59 = vpop.xlane.xlu1 %1885 }
 0xb85   : > { %v1892_v63 = vmul.f32 0.03125, %v1886_v59 }
 0xb86   : > { %v1896_v54 = vsub.f32 %v1890_v53, %v1893_v52 }
 0xb87   : > { %v1898_v55 = vsub.f32 %v1892_v63, %v1895_v21  ;;  %v1883_v56 = vpop.xlane.xlu0 %1882 }
 0xb88   : > { %v1899_v58 = vmax.f32 %v1896_v54, 0.0  ;;  %v1891_v61 = vmul.f32 0.03125, %v1883_v56 }
 0xb89   : > { %v1901_v62 = vmax.f32 %v1898_v55, 0.0 }
 0xb8a   : > { %v1905_v0 = vadd.f32 1e-06, %v1899_v58  ;;  %v1897_v22 = vsub.f32 %v1891_v61, %v1894_v57 }
 0xb8b   : > { %v1907_v29 = vadd.f32 1e-06, %v1901_v62 }
 0xb8c   : > { %3070 = vrsqrt.f32 %v1905_v0  ;;  %v1900_v30 = vmax.f32 %v1897_v22, 0.0 }
 0xb8d   : > { %3072 = vrsqrt.f32 %v1907_v29 }
 0xb8e   : > { %v1906_v1 = vadd.f32 1e-06, %v1900_v30 }
 0xb90   : > { %3074 = vrsqrt.f32 %v1906_v1 }
 0xb99   : > { %v3071_v4 = vpop.eup %3070 }
 0xb9a   : > { %v3073_v18 = vpop.eup %3072  ;;  %v1911_v19 = vmul.f32 %v3071_v4, %v1902_v3 }
 0xb9b   : > { %v1913_v20 = vmul.f32 %v3073_v18, %v1904_v5 }
 0xb9c   : > { %v1918_v7 = vmul.f32 %v1917_v15, %v1911_v19 }
 0xb9d   : > { %v3075_v23 = vpop.eup %3074  ;;  %v1920_v9 = vmul.f32 %v1917_v15, %v1913_v20  ;;  %v2196_v20 = vrot.slane %v601_v41, %v3381_v16 }
 0xb9e   : > { %v1912_v26 = vmul.f32 %v3075_v23, %v1903_v14  ;;  %v1925_v32 = vadd.f32 %v1924_v24, %v1918_v7 }
 0xb9f   : > { %v1927_v31 = vadd.f32 %v1924_v24, %v1920_v9 }
 0xba0   : > { %v1919_v17 = vmul.f32 %v1917_v15, %v1912_v26 }
 0xba1   : > { %v1929_v27 = vpack.c.bf16 %v1927_v31, %v1927_v31 }
 0xba2   : > { %v1926_v33 = vadd.f32 %v1924_v24, %v1919_v17 }
 0xba4   : > { %v1928_v10 = vpack.c.bf16 %v1926_v33, %v1925_v32 }
 0xba6   : > { %2851 = vmatprep.mubr.bf16.mxu1 %v1928_v10 }
 0xba7   : > { %2852 = vmatmul.mubr.bf16.vlgmr.msra.gmra.mxu1 %v1929_v27 }
 0xc67   : > { %v2853_v43 = vpop.f32.mrf.mxu1 }
 0xc68   : > { %v2048_v44 = vadd.f32 %v2853_v43, %v2045_v42 }
 0xc69   : > { %v2028_v45 = vpop.f32.mrf.mxu1 }
 0xc6a   : > { %v2051_v46 = vmul.f32 %v2048_v44, %v2048_v44  ;;  %v2046_v47 = vadd.f32 %v2045_v42, %v2028_v45 }
 0xc6b   : > { %v2854_v49 = vpop.f32.mrf.mxu1 }
 0xc6c   : > { %v2054_v50 = vmul.f32 %v2051_v46, %v2048_v44  ;;  %v2049_v48 = vmul.f32 %v2046_v47, %v2046_v47 }
 0xc6d   : > { %v2031_v51 = vpop.f32.mrf.mxu1 }
 0xc6e   : > { %v2057_v52 = vmul.f32 0.044715, %v2054_v50  ;;  %v2052_v60 = vmul.f32 %v2049_v48, %v2046_v47  ;;  %v2047_v53 = vadd.f32 %v2045_v42, %v2031_v51 }
 0xc70   : > { %v2060_v59 = vadd.f32 %v2057_v52, %v2048_v44  ;;  %v2055_v21 = vmul.f32 0.044715, %v2052_v60  ;;  %v2050_v63 = vmul.f32 %v2047_v53, %v2047_v53 }
 0xc72   : > { %v2063_v54 = vmul.f32 0.7978846, %v2060_v59  ;;  %v2058_v55 = vadd.f32 %v2055_v21, %v2046_v47  ;;  %v2053_v56 = vmul.f32 %v2050_v63, %v2047_v53 }
 0xc74   : > { %3076 = vtanh.f32 %v2063_v54  ;;  %v2061_v57 = vmul.f32 0.7978846, %v2058_v55  ;;  %v2056_v58 = vmul.f32 0.044715, %v2053_v56 }
 0xc76   : > { %3078 = vtanh.f32 %v2061_v57  ;;  %v2059_v61 = vadd.f32 %v2056_v58, %v2047_v53 }
 0xc78   : > { %v2062_v62 = vmul.f32 0.7978846, %v2059_v61 }
 0xc7a   : > { %3080 = vtanh.f32 %v2062_v62 }
 0xc81   : > { %v3077_v0 = vpop.eup %3076 }
 0xc82   : > { %v2069_v29 = vadd.f32 1.0, %v3077_v0 }
 0xc83   : > { %v3079_v22 = vpop.eup %3078 }
 0xc84   : > { %v2067_v30 = vadd.f32 1.0, %v3079_v22  ;;  %v2072_v2 = vmul.f32 0.5, %v2069_v29 }
 0xc86   : > { %v2070_v4 = vmul.f32 0.5, %v2067_v30  ;;  %v2075_v13 = vmul.f32 %v2072_v2, %v2048_v44 }
 0xc87   : > { %v3081_v1 = vpop.eup %3080 }
 0xc88   : > { %v2068_v3 = vadd.f32 1.0, %v3081_v1  ;;  %v2073_v15 = vmul.f32 %v2070_v4, %v2046_v47  ;;  %v2077_v19 = vpack.c.bf16 %v2075_v13, %v2075_v13 }
 0xc8a   : > { %v2071_v5 = vmul.f32 0.5, %v2068_v3 }
 0xc8c   : > { %v2074_v8 = vmul.f32 %v2071_v5, %v2047_v53 }
 0xc8e   : > { %v2076_v18 = vpack.c.bf16 %v2074_v8, %v2073_v15 }
 0xc90   : > { %2871 = vmatprep.mubr.bf16.mxu0 %v2076_v18 }
 0xc91   : > { %2872 = vmatmul.mubr.bf16.vlgmr.msra.gmra.mxu0 %v2077_v19 }
 0xd51   : > { %v2873_v14 = vpop.f32.mrf.mxu0 }
 0xd52   : > { %v2192_v23 = vadd.f32 %v2873_v14, %v3563_v28 }
 0xd53   : > { %v2176_v24 = vpop.f32.mrf.mxu0 }
 0xd54   : > { %v2199_v9 = vadd.f32 %v2196_v20, %v2192_v23  ;;  %v2190_v26 = vadd.f32 %v2176_v24, %v3567_v34 }
 0xd55   : > { %v2874_v7 = vpop.f32.mrf.mxu0 }
 0xd56   : > { %2202 = vst [vmem:[#allocation2 + $0x8] sm:$0x1] %v2199_v9  ;;  %v3607_v17 = vadd.f32 %v2196_v20, %v2190_v26 }
 0xd57   : > { %v2179_v31 = vpop.f32.mrf.mxu0 }
 0xd58   : > { %2200 = vst [vmem:[#allocation2 + $0x10] sm:$0xff] %v3607_v17  ;;  %v2191_v32 = vadd.f32 %v2179_v31, %v3569_v25  ;;  %2206 = sbr.rel (%p2551_p5) target bundleno = 3599 (0xe0f), region = 68 }
 0xd5a   : > { %v2198_v33 = vadd.f32 %v2196_v20, %v2191_v32 }
 0xd5c   : > { %2201 = vst [vmem:[#allocation2] sm:$0xff] %v2198_v33 }
 0xd5d   : > { %2210 = vadd.xlane.f32.xlu1 %v2198_v33  ;;  %v2212_v28 = vsel %vm606_vm2, %v2199_v9, 0.0  ;;  %v2217_v10 = vmul.f32 %v2199_v9, %v2199_v9  ;;  %v2216_v27 = vmul.f32 %v2198_v33, %v2198_v33  ;;  %v2215_v12 = vmul.f32 %v3607_v17, %v3607_v17  ;;  %v2207_v63 = vld [vmem:[%s3650_s8] sm:$0x3]  ;;  %v2284_v2 = vld [vmem:[%s3322_s25 + $0x8] sm:$0x1] }
 0xd5e   : > { %2213 = vadd.xlane.f32.xlu0 %v2212_v28  ;;  %v2255_v55 = vrot.slane %v2207_v63, %v3372_v11  ;;  %v2262_v58 = vrot.slane %v2207_v63, %v3381_v16  ;;  %vm2282_vm8 = vsmask.f32 256 }
 0xd5f   : > { %v2222_v34 = vsel %vm606_vm2, %v2217_v10, 0.0  ;;  %vm2283_vm9 = vmand %vm606_vm2, %vm2282_vm8 }
 0xd61   : > { %2223 = vadd.xlane.f32.xlu1 %v2222_v34 }
 0xd62   : > { %2208 = vadd.xlane.f32.xlu0 %v3607_v17 }
 0xd65   : > { %2220 = vadd.xlane.f32.xlu1 %v2216_v27 }
 0xd66   : > { %2218 = vadd.xlane.f32.xlu0 %v2215_v12 }
 0xde6   : > { %v2211_v25 = vpop.xlane.xlu1 %2210 }
 0xde7   : > { %v2214_v35 = vpop.xlane.xlu0 %2213  ;;  %v2226_v38 = vmul.f32 0.03125, %v2211_v25 }
 0xde8   : > { %v2227_v36 = vmul.f32 0.03125, %v2214_v35 }
 0xde9   : > { %v2232_v44 = vmul.f32 %v2226_v38, %v2226_v38  ;;  %v2241_v61 = vsub.f32 %v2198_v33, %v2226_v38 }
 0xdea   : > { %v2233_v37 = vmul.f32 %v2227_v36, %v2227_v36  ;;  %v2224_v6 = vpop.xlane.xlu1 %2223  ;;  %v2242_v54 = vsub.f32 %v2199_v9, %v2227_v36 }
 0xdeb   : > { %v2230_v39 = vmul.f32 0.03125, %v2224_v6  ;;  %v2209_v40 = vpop.xlane.xlu0 %2208 }
 0xdec   : > { %v2225_v41 = vmul.f32 0.03125, %v2209_v40 }
 0xded   : > { %v2236_v42 = vsub.f32 %v2230_v39, %v2233_v37 }
 0xdee   : > { %v2221_v43 = vpop.xlane.xlu1 %2220  ;;  %v2231_v49 = vmul.f32 %v2225_v41, %v2225_v41  ;;  %v2240_v22 = vsub.f32 %v3607_v17, %v2225_v41 }
 0xdef   : > { %v2239_v45 = vmax.f32 %v2236_v42, 0.0  ;;  %v2229_v46 = vmul.f32 0.03125, %v2221_v43  ;;  %v2219_v47 = vpop.xlane.xlu0 %2218 }
 0xdf0   : > { %v2228_v50 = vmul.f32 0.03125, %v2219_v47 }
 0xdf1   : > { %v2245_v48 = vadd.f32 1e-06, %v2239_v45  ;;  %v2235_v51 = vsub.f32 %v2229_v46, %v2232_v44 }
 0xdf2   : > { %v2234_v52 = vsub.f32 %v2228_v50, %v2231_v49 }
 0xdf3   : > { %3086 = vrsqrt.f32 %v2245_v48  ;;  %v2238_v60 = vmax.f32 %v2235_v51, 0.0 }
 0xdf4   : > { %v2237_v53 = vmax.f32 %v2234_v52, 0.0 }
 0xdf5   : > { %v2244_v59 = vadd.f32 1e-06, %v2238_v60 }
 0xdf6   : > { %v2243_v21 = vadd.f32 1e-06, %v2237_v53 }
 0xdf7   : > { %3088 = vrsqrt.f32 %v2244_v59 }
 0xdf8   : > { %3090 = vrsqrt.f32 %v2243_v21 }
 0xe00   : > { %v3087_v56 = vpop.eup %3086 }
 0xe01   : > { %v2251_v57 = vmul.f32 %v3087_v56, %v2242_v54 }
 0xe03   : > { %v2258_v62 = vmul.f32 %v2255_v55, %v2251_v57 }
 0xe04   : > { %v3089_v0 = vpop.eup %3088 }
 0xe05   : > { %v3091_v29 = vpop.eup %3090  ;;  %v2265_v30 = vadd.f32 %v2262_v58, %v2258_v62  ;;  %v2250_v1 = vmul.f32 %v3089_v0, %v2241_v61 }
 0xe06   : > { %v2249_v3 = vmul.f32 %v3091_v29, %v2240_v22 }
 0xe07   : > { %v2564_v11 = vpack.c.bf16 %v2265_v30, %v2265_v30  ;;  %v2257_v4 = vmul.f32 %v2255_v55, %v2250_v1 }
 0xe08   : > { %v2256_v5 = vmul.f32 %v2255_v55, %v2249_v3 }
 0xe09   : > { %v2285_v13 = vsel %vm2283_vm9, %v2564_v11, %v2284_v2  ;;  %v2264_v16 = vadd.f32 %v2262_v58, %v2257_v4 }
 0xe0a   : > { %2286 = vst [vmem:[%s3322_s25 + $0x8] sm:$0x1] %v2285_v13  ;;  %v2263_v15 = vadd.f32 %v2262_v58, %v2256_v5 }
 0xe0c   : > { %v2568_v8 = vpack.c.bf16 %v2264_v16, %v2263_v15 }
 0xe0e   : > { %2569 = vst [vmem:[%s3322_s25] sm:$0xff] %v2568_v8  }
 0xe0f PF: > { %s20_s13 = sadd.s32 1, %s3160_s13   ;;  %s3661_s15 = sld [smem:[#allocation6_spill]] }
 0xe10   : > { %p17_p6 = scmp.ge.s32.totalorder %s20_s13, 6   ;;  %s3662_s28 = sld [smem:[#allocation7_spill]] }
 0xe11   : > { %s3663_s30 = smov %s3152_s11  ;;  %s3664_s10 = smov %s3156_s12 }
 0xe12   :  { %19 = sbr.rel (!%p17_p6) target bundleno = 6 (0x6), region = 116 }
 0xe15   : > { %s3665_s11 = smov %s3661_s15 }
 0xe16   : > { %s3666_s12 = smov %s3662_s28 }
 0xe17   :  { %2308 = vsyncpa [#allocation4], 1 }
 0xe18   :  { %2310 = vsyncpa [#allocation4 + $0x1], 1 }

// kernel: blip_forward.3
= control target key start
LH: loop header
LB: loop body
LE: loop exit
PB: predicated region body
PF: predicated region fallthrough
CT: control target
= control target key end

     0   :  { %s4623_s0 = inlined_call_operand.vmem [shape: f32[2,8,128], index: 0, kind: input, shape index: {}]   ;;  %s4624_s1 = inlined_call_operand.vmem [shape: bf16[2,17,128], index: 1, kind: input, shape index: {}]   ;;  %s4625_s2 = inlined_call_operand.vmem [shape: f32[2,1,8], index: 2, kind: input, shape index: {}]   ;;  %s4626_s3 = inlined_call_operand.vmem [shape: f32[2,128], index: 3, kind: input, shape index: {}]   ;;  %s4627_s4 = inlined_call_operand.vmem [shape: bf16[2,3,128,128], index: 4, kind: input, shape index: {}]   ;;  %s4628_s5 = inlined_call_operand.vmem [shape: bf16[2,128,128], index: 5, kind: input, shape index: {}]   ;;  %s4629_s6 = inlined_call_operand.vmem [shape: bf16[2,3,128,128], index: 6, kind: input, shape index: {}]   ;;  %s4630_s7 = inlined_call_operand.vmem [shape: bf16[2,128,128], index: 7, kind: input, shape index: {}]   ;;  %s4631_s8 = inlined_call_operand.vmem [shape: bf16[2,128,128], index: 8, kind: input, shape index: {}]   ;;  %s4632_s9 = inlined_call_operand.vmem [shape: bf16[2,128,128], index: 9, kind: input, shape index: {}]   ;;  %s4633_s10 = inlined_call_operand.vmem [shape: f32[2,16,128], index: 10, kind: input, shape index: {}]   ;;  %s4634_s11 = inlined_call_operand.hbm [shape: f32[2,8,128], index: 11, kind: output, shape index: {}]  }
   0x1   :  { %4650 = sst [smem:[#allocation19_spill]] %s4623_s0 }
   0x2   :  { %4651 = sst [smem:[#allocation20_spill]] %s4624_s1 }
   0x3   :  { %4652 = sst [smem:[#allocation21_spill]] %s4626_s3 }
   0x4   :  { %4653 = sst [smem:[#allocation22_spill]] %s4634_s11 }
   0x5   :  { %16 = vsyncpa [#allocation4], 0 }
   0x6   :  { %18 = vsyncpa [#allocation4 + $0x1], 0  ;;  %s3988_s17 = smov 0   ;;  %s3990_s18 = smov 0  }
   0x7   :  { %s3992_s19 = smov 0   ;;  %s3994_s20 = smov 0  }
   0x8   :  { %s3996_s21 = smov 0   ;;  %s3998_s22 = smov 0  }
   0x9   :  { %s4000_s23 = smov 0   ;;  %s4002_s24 = smov 0  }
   0xa LB: > { %4654 = sst [smem:[#allocation6_spill]] %s3891_s17  ;;  %s2986_s25 = sadd.s32 4294967295, %s3919_s24   ;;  %s3919_s24 = sphi %s4002_s24, %s24_s24   ;;  %s3915_s23 = sphi %s4000_s23, %s4690_s23   ;;  %s3911_s22 = sphi %s3998_s22, %s4689_s22   ;;  %s3907_s21 = sphi %s3996_s21, %s4688_s21   ;;  %s3903_s20 = sphi %s3994_s20, %s4687_s20   ;;  %s3899_s19 = sphi %s3992_s19, %s4686_s19   ;;  %s3895_s18 = sphi %s3990_s18, %s4685_s18   ;;  %s3891_s17 = sphi %s3988_s17, %s4684_s17  }
   0xb   : > { %4655 = sst [smem:[#allocation7_spill]] %s3895_s18  ;;  %s2987_s26 = sadd.s32 4294967294, %s3919_s24  }
   0xc   : > { %4656 = sst [smem:[#allocation8_spill]] %s3899_s19  ;;  %s33_s27 = sadd.s32 1, %s3911_s22 }
   0xd   : > { %4657 = sst [smem:[#allocation9_spill]] %s3903_s20  ;;  %p34_p0 = scmp.ge.s32.totalorder %s33_s27, 2 }
   0xe   : > { %4658 = sst [smem:[#allocation10_spill]] %s3907_s21  ;;  %s36_s28 = sadd.s32 1, %s3915_s23 }
   0xf   : > { %4659 = sst [smem:[#allocation11_spill]] %s3911_s22  ;;  %p334_p1 = scmp.ne.s32.totalorder %s3899_s19, %s3895_s18 }
  0x10   : > { %4660 = sst [smem:[#allocation12_spill]] %s3915_s23  ;;  %p335_p2 = scmp.eq.s32.totalorder %s2986_s25, 3 }
  0x11   : > { %4661 = sst [smem:[#allocation13_spill]] %s3919_s24  ;;  %s4692_s27 = smov (%p34_p0, %s33_s27), 0 }
  0x12   : > { %4662 = sst [smem:[#allocation14_spill]] %s4692_s27  ;;  %s4694_s28 = smov (!%p34_p0, %s36_s28), %s3915_s23 }
  0x13   : > { %p4037_p3 = por %p335_p2, %p334_p1  ;;  %p340_p4 = scmp.ne.s32.totalorder %s3895_s18, %s3891_s17 }
  0x14   : > { %p38_p5 = scmp.ge.s32.totalorder %s4694_s28, 2  ;;  %p341_p6 = scmp.eq.s32.totalorder %s2987_s26, 3 }
  0x15   : > { %s4663_s29 = scalar_select %p4037_p3, 1, 0 }
  0x16   : > { %p2990_p7 = scmp.ge.s32.totalorder %s3919_s24, 1  ;;  %p439_p8 = scmp.lt.s32.totalorder %s3919_s24, 5 }
  0x17   : > { %4664 = sst [smem:[#allocation15_spill]] %s4663_s29  ;;  %s4696_s28 = smov (%p38_p5, %s4694_s28), 0 }
  0x18   : > { %4665 = sst [smem:[#allocation16_spill]] %s4696_s28  ;;  %p4047_p9 = por %p341_p6, %p340_p4 }
  0x19   : > { %p440_p10 = pnand %p2990_p7, %p439_p8  ;;  %s321_s12 = ssub.s32 %s3915_s23, %s4696_s28 }
  0x1a   : > { %s4666_s30 = scalar_select %p4047_p9, 1, 0 }
  0x1b   : > { %s324_s13 = sadd.s32 1, %s3899_s19  ;;  %p322_p11 = scmp.eq.s32.totalorder %s321_s12, 0 }
  0x1c   : > { %4667 = sst [smem:[#allocation17_spill]] %s4666_s30  ;;  %443 = sbr.rel (%p440_p10) target bundleno = 5776 (0x1690), region = 64 }
  0x1d   : > { %s4055_s14 = scalar_select %p322_p11, %s3899_s19, %s324_s13  }
  0x1e   : > { %s4639_s15 = sand.u32 (!%p440_p10), 1, %s3895_s18   ;;  %p521_p12 = scmp.lt.s32.totalorder (!%p440_p10), %s3907_s21, 1 }
  0x1f   : > { %4668 = sst [smem:[#allocation18_spill]] %s4055_s14  ;;  %s4061_s16 = sshll.u32 (!%p440_p10), %s4639_s15, 3 }
  0x20   : > { %p533_p13 = scmp.lt.s32.totalorder (!%p440_p10), %s3903_s20, 1  ;;  %s4669_s0 = sld [smem:[#allocation19_spill]] (!%p440_p10) }
  0x21   : > { %s4065_s25 = scalar_select %p521_p12, %s3907_s21, 1 }
  0x22   : > { %s534_s26 = scalar_select %p533_p13, %s3903_s20, 1 }
  0x23   : > { %s2992_s12 = sshll.u32 %s4065_s25, 3  ;;  %s3624_s13 = smul.u32 12, %s4065_s25 }
  0x24   : > { %s4670_s1 = sld [smem:[#allocation20_spill]]  ;;  %s3625_s24 = smul.u32 192, %s534_s26 }
  0x25   : > { %s3175_s11 = sshll.u32 %s534_s26, 6  ;;  %s3179_s29 = sshll.u32 %s534_s26, 4 }
  0x26   : > { %s524_s23 = scalar_lea.vmem %s4669_s0, %s2992_s12  ;;  %s4085_s3 = scalar_lea.vmem %s4627_s4, %s3625_s24 }
  0x27   : > { %s4090_s28 = scalar_lea.vmem %s4628_s5, %s3175_s11  ;;  %s4095_s12 = scalar_lea.vmem %s4629_s6, %s3625_s24 }
  0x28   : > { %s4105_s18 = scalar_lea.vmem %s4631_s8, %s3175_s11  ;;  %s4110_s20 = scalar_lea.vmem %s4632_s9, %s3175_s11 }
  0x29   : > { %s4115_s24 = scalar_lea.vmem %s4633_s10, %s3179_s29  ;;  %s520_s22 = scalar_lea.vmem [#allocation3], %s4061_s16 }
  0x2a   : > { %s4080_s17 = scalar_lea.vmem %s4670_s1, %s3624_s13  ;;  %s4100_s13 = scalar_lea.vmem %s4630_s7, %s3175_s11 }
  0x2b   : > { %s4671_s14 = sld [smem:[#allocation9_spill]] }
  0x31   : > { %p3006_p0 = scmp.ne.s32.totalorder %s4671_s14, 0 }
  0x32   : > { %s4672_s11 = sld [smem:[#allocation21_spill]] (!%p3006_p0) }
  0x33   : > { %572 = sbr.rel (%p3006_p0) target bundleno = 228 (0xe4), region = 68 }
  0x38   : > { %v574_v0 = vld [vmem:[%s524_s23] sm:$0xff]  ;;  %v590_v10 = vlaneseq }
  0x39   : > { %575 = vadd.xlane.f32.xlu0 %v574_v0  ;;  %v577_v1 = vmul.f32 %v574_v0, %v574_v0  ;;  %v573_v13 = vld [vmem:[%s4672_s11] sm:$0x3] }
  0x3a   : > { %v591_v11 = vshrl.u32 %v590_v10, 7 }
  0x3c   : > { %v592_v12 = vsub.s32 0, %v591_v11  ;;  %v597_v14 = vsub.s32 1, %v591_v11 }
  0x3d   : > { %578 = vadd.xlane.f32.xlu0 %v577_v1 }
  0x3e   : > { %v593_v16 = vrot.slane %v573_v13, %v592_v12  ;;  %v598_v19 = vrot.slane %v573_v13, %v597_v14 }
  0xc2   : > { %v576_v2 = vpop.xlane.xlu0 %575 }
  0xc3   : > { %v581_v3 = vmul.f32 0.03125, %v576_v2 }
  0xc5   : > { %v583_v5 = vmul.f32 %v581_v3, %v581_v3  ;;  %v586_v15 = vsub.f32 %v574_v0, %v581_v3 }
  0xc6   : > { %v579_v4 = vpop.xlane.xlu0 %578 }
  0xc7   : > { %v582_v6 = vmul.f32 0.03125, %v579_v4 }
  0xc9   : > { %v584_v7 = vsub.f32 %v582_v6, %v583_v5 }
  0xcb   : > { %v585_v8 = vmax.f32 %v584_v7, 0.0 }
  0xcd   : > { %v587_v9 = vadd.f32 1e-12, %v585_v8 }
  0xcf   : > { %3703 = vrsqrt.f32 %v587_v9 }
  0xdc   : > { %v3704_v17 = vpop.eup %3703 }
  0xdd   : > { %v589_v18 = vmul.f32 %v3704_v17, %v586_v15 }
  0xdf   : > { %v594_v20 = vmul.f32 %v593_v16, %v589_v18 }
  0xe1   : > { %v599_v21 = vadd.f32 %v598_v19, %v594_v20 }
  0xe3   : > { %600 = vst [vmem:[#allocation2] sm:$0xff] %v599_v21 }
  0xe4 PF: > { %v3705_v22 = vld [vmem:[%s4085_s3 + $0x78] sm:$0xff]   ;;  %v3921_v23 = vmov 0.0   ;;  %v3707_v25 = vld [vmem:[%s4085_s3 + $0x70] sm:$0xff]   ;;  %vm3922_vm0 = vmmov 0   ;;  %v3709_v27 = vld [vmem:[%s4085_s3 + $0x68] sm:$0xff]   ;;  %v713_v41 = vlaneseq  ;;  %vm941_vm1 = vcmask 261120   ;;  %s4673_s26 = scalar_lea.vmem %s4625_s2, %s4065_s25 }
  0xe5   : > { %3332 = vmatprep.subr.bf16.mxu1 %v3921_v23  ;;  %3312 = vmatprep.subr.bf16.mxu0 %v3921_v23  ;;  %v3706_v24 = vld [vmem:[%s4085_s3 + $0x38] sm:$0xff]   ;;  %v3708_v26 = vld [vmem:[%s4085_s3 + $0x30] sm:$0xff]   ;;  %v3710_v28 = vld [vmem:[%s4085_s3 + $0x28] sm:$0xff]   ;;  %s3923_s19 = smov 96   ;;  %s3924_s23 = smov 64   ;;  %vm996_vm2 = vcmask 64512  }
  0xe6   : > { %3333 = vmatpush3.bf16.msra.mxu1 %v3705_v22  ;;  %3348 = vmatprep.mubr.msk.bf16.mxu1 %vm3922_vm0, %v3921_v23  ;;  %v3711_v29 = vld [vmem:[%s4085_s3 + $0x60] sm:$0xff]   ;;  %v3713_v31 = vld [vmem:[%s4085_s3 + $0x58] sm:$0xff]   ;;  %v3715_v33 = vld [vmem:[%s4085_s3 + $0x50] sm:$0xff]   ;;  %v4172_v42 = vshrl.u32 %v713_v41, 7  ;;  %s3925_s29 = smov 32   ;;  %vm1012_vm3 = vcmask 1043456  }
  0xe7   : > { %3313 = vmatpush3.bf16.msra.mxu0 %v3706_v24  ;;  %3334 = vmatprep.subr.bf16.mxu1 %v3921_v23  ;;  %v3712_v30 = vld [vmem:[%s4085_s3 + $0x20] sm:$0xff]   ;;  %v3714_v32 = vld [vmem:[%s4085_s3 + $0x18] sm:$0xff]   ;;  %v3716_v34 = vld [vmem:[%s4085_s3 + $0x10] sm:$0xff]   ;;  %vm1408_vm4 = vcmask 523264   ;;  %vm1410_vm5 = vcmask 785408   ;;  %vm1979_vm6 = vcmask 1040384  }
  0xe8   : > { %3314 = vmatprep.subr.bf16.mxu0 %v3921_v23  ;;  %3328 = vmatprep.mubr.msk.bf16.mxu0 %vm3922_vm0, %v3921_v23  ;;  %v3717_v35 = vld [vmem:[%s4085_s3 + $0x48] sm:$0xff]   ;;  %v3719_v37 = vld [vmem:[%s4085_s3 + $0x40] sm:$0xff]   ;;  %v825_v43 = vsub.s32 1, %v4172_v42  ;;  %v715_v45 = vsub.s32 0, %v4172_v42  ;;  %v3721_v61 = vld [vmem:[%s4085_s3 + $0xb8] sm:$0xff]   ;;  %v935_v19 = vsub.s32 2, %v4172_v42 }
  0xe9   : > { %v3718_v36 = vld [vmem:[%s4085_s3 + $0x8] sm:$0xff]   ;;  %v3720_v39 = vld [vmem:[%s4085_s3] sm:$0xff]   ;;  %v3722_v62 = vld [vmem:[%s4085_s3 + $0xb0] sm:$0xff]   ;;  %vm1963_vm7 = vcmask 138240  }
  0xea   : > { %3335 = vmatpush3.bf16.msra.mxu1 %v3707_v25  ;;  %v4155_v38 = vld [vmem:[#allocation2] sm:$0xff]  ;;  %v3723_v63 = vld [vmem:[%s4085_s3 + $0xa8] sm:$0xff]   ;;  %v3725_v1 = vld [vmem:[%s4085_s3 + $0x98] sm:$0xff]  }
  0xeb   : > { %3315 = vmatpush3.bf16.msra.mxu0 %v3708_v26  ;;  %3336 = vmatprep.subr.bf16.mxu1 %v3921_v23  ;;  %v4162_v40 = vpack.c.bf16 %v4155_v38, %v4155_v38  ;;  %v4176_v44 = vld [vmem:[%s4115_s24] sm:$0xff]  ;;  %v3726_v2 = vld [vmem:[%s4085_s3 + $0x90] sm:$0xff]   ;;  %v3727_v3 = vld [vmem:[%s4085_s3 + $0x88] sm:$0xff]  }
  0xec   : > { %3316 = vmatprep.subr.bf16.mxu0 %v3921_v23  ;;  %v826_v46 = vrot.slane %v4176_v44, %v825_v43  ;;  %v716_v47 = vrot.slane %v4176_v44, %v715_v45  ;;  %v3724_v0 = vld [vmem:[%s4085_s3 + $0xa0] sm:$0xff]   ;;  %v936_v20 = vrot.slane %v4176_v44, %v935_v19 }
  0xed   : > { %v3728_v4 = vld [vmem:[%s4085_s3 + $0x80] sm:$0xff]   ;;  %s4674_s3 = sld [smem:[#allocation9_spill]] }
  0xee   : > { %3337 = vmatpush3.bf16.msra.mxu1 %v3709_v27  ;;  %v4224_v6 = vld [vmem:[%s4673_s26] ss:$0 sm:$0xff] }
  0xef   : > { %3317 = vmatpush3.bf16.msra.mxu0 %v3710_v28  ;;  %3338 = vmatprep.subr.bf16.mxu1 %v3921_v23 }
  0xf0   : > { %3318 = vmatprep.subr.bf16.mxu0 %v3921_v23 }
  0xf2   : > { %3339 = vmatpush3.bf16.msra.mxu1 %v3711_v29 }
  0xf3   : > { %3319 = vmatpush3.bf16.msra.mxu0 %v3712_v30  ;;  %3340 = vmatprep.subr.bf16.mxu1 %v3921_v23  ;;  %p3170_p1 = scmp.ne.s32.totalorder %s4674_s3, 1 }
  0xf4   : > { %3320 = vmatprep.subr.bf16.mxu0 %v3921_v23 }
  0xf6   : > { %3341 = vmatpush3.bf16.msra.mxu1 %v3713_v31 }
  0xf7   : > { %3321 = vmatpush3.bf16.msra.mxu0 %v3714_v32  ;;  %3342 = vmatprep.subr.bf16.mxu1 %v3921_v23 }
  0xf8   : > { %3322 = vmatprep.subr.bf16.mxu0 %v3921_v23 }
  0xfa   : > { %3343 = vmatpush3.bf16.msra.mxu1 %v3715_v33 }
  0xfb   : > { %3323 = vmatpush3.bf16.msra.mxu0 %v3716_v34  ;;  %3344 = vmatprep.subr.bf16.mxu1 %v3921_v23 }
  0xfc   : > { %3324 = vmatprep.subr.bf16.mxu0 %v3921_v23 }
  0xfe   : > { %3345 = vmatpush3.bf16.msra.mxu1 %v3717_v35 }
  0xff   : > { %3325 = vmatpush3.bf16.msra.mxu0 %v3718_v36  ;;  %3346 = vmatprep.subr.bf16.mxu1 %v3921_v23 }
 0x100   : > { %3326 = vmatprep.subr.bf16.mxu0 %v3921_v23 }
 0x102   : > { %3347 = vmatpush3.bf16.msra.mxu1 %v3719_v37 }
 0x103   : > { %3327 = vmatpush3.bf16.msra.mxu0 %v3720_v39  ;;  %3372 = vmatprep.subr.bf16.mxu1 %v3921_v23 }
 0x104   : > { %3352 = vmatprep.subr.bf16.mxu0 %v3921_v23 }
 0x105   : > { %3349 = vmatmul.mubr.bf16.vlgmr.msra.gmra.mxu1 %v4162_v40 }
 0x106   : > { %3329 = vmatmul.mubr.bf16.vlgmr.msra.gmra.mxu0 %v4162_v40  ;;  %3374 = vmatprep.mubr.msk.bf16.mxu1 %vm3922_vm0, %v3921_v23 }
 0x107   : > { %3368 = vmatprep.mubr.msk.bf16.mxu0 %vm3922_vm0, %v3921_v23  ;;  %3353 = vmatpush3.bf16.msra.mxu0 %v3721_v61 }
 0x108   : > { %3354 = vmatprep.subr.bf16.mxu0 %v3921_v23 }
 0x10b   : > { %3355 = vmatpush3.bf16.msra.mxu0 %v3722_v62 }
 0x10c   : > { %3356 = vmatprep.subr.bf16.mxu0 %v3921_v23 }
 0x10f   : > { %3357 = vmatpush3.bf16.msra.mxu0 %v3723_v63 }
 0x110   : > { %3358 = vmatprep.subr.bf16.mxu0 %v3921_v23 }
 0x113   : > { %3359 = vmatpush3.bf16.msra.mxu0 %v3724_v0 }
 0x114   : > { %3360 = vmatprep.subr.bf16.mxu0 %v3921_v23 }
 0x117   : > { %3361 = vmatpush3.bf16.msra.mxu0 %v3725_v1 }
 0x118   : > { %3362 = vmatprep.subr.bf16.mxu0 %v3921_v23 }
 0x11b   : > { %3363 = vmatpush3.bf16.msra.mxu0 %v3726_v2 }
 0x11c   : > { %3364 = vmatprep.subr.bf16.mxu0 %v3921_v23 }
 0x11f   : > { %3365 = vmatpush3.bf16.msra.mxu0 %v3727_v3 }
 0x120   : > { %3366 = vmatprep.subr.bf16.mxu0 %v3921_v23 }
 0x123   : > { %3367 = vmatpush3.bf16.msra.mxu0 %v3728_v4 }
 0x124   : > { %3396 = vmatprep.subr.bf16.mxu0 %v3921_v23 }
 0x126   : > { %3369 = vmatmul.mubr.bf16.vlgmr.msra.gmra.mxu0 %v4162_v40 }
 0x127   : > { %3398 = vmatprep.mubr.msk.bf16.mxu0 %vm3922_vm0, %v3921_v23 }
 0x1c5   : > { %v817_v48 = vpop.f32.mrf.mxu1 }
 0x1c6   : > { %v827_v49 = vadd.f32 %v826_v46, %v817_v48  ;;  %v707_v50 = vpop.f32.mrf.mxu0 }
 0x1c7   : > { %v3350_v51 = vpop.f32.mrf.mxu1  ;;  %v717_v52 = vadd.f32 %v716_v47, %v707_v50 }
 0x1c8   : > { %v4185_v53 = vpack.c.bf16 %v827_v49, %v827_v49  ;;  %v3330_v54 = vpop.f32.mrf.mxu0 }
 0x1c9   : > { %v820_v55 = vpop.f32.mrf.mxu1  ;;  %v938_v56 = vpack.c.bf16 %v717_v52, %v717_v52 }
 0x1ca   : > { %1060 = vrot.lane.b32.xlu1 %v4185_v53, %s3923_s19  ;;  %v946_v57 = vsel %vm941_vm1, %v4185_v53, 0  ;;  %v710_v58 = vpop.f32.mrf.mxu0 }
 0x1cb   : > { %v3351_v59 = vpop.f32.mrf.mxu1  ;;  %3373 = vmatpush3.bf16.xpose.msra.mxu1 %v946_v57 }
 0x1cc   : > { %v3331_v60 = vpop.f32.mrf.mxu0  ;;  %3378 = vmatprep.subr.bf16.mxu1 %v3921_v23 }
 0x1ce   : > { %1057 = vrot.lane.b32.xlu1 %v938_v56, %s3923_s19 }
 0x1d2   : > { %1171 = vrot.lane.b32.xlu1 %v938_v56, %s3924_s23  ;;  %3375 = vmatmul.mubr.msk.bf16.vlgmr.msra.gmra.mxu1 %vm941_vm1, %v938_v56 }
 0x1d3   : > { %3380 = vmatprep.mubr.msk.bf16.mxu1 %vm3922_vm0, %v3921_v23 }
 0x1d6   : > { %1285 = vrot.lane.b32.xlu1 %v4185_v53, %s3925_s29 }
 0x1da   : > { %1283 = vrot.lane.b32.xlu1 %v938_v56, %s3925_s29 }
 0x1e6   : > { %v927_v18 = vpop.f32.mrf.mxu0 }
 0x1e7   : > { %v937_v22 = vadd.f32 %v936_v20, %v927_v18 }
 0x1e8   : > { %v3370_v21 = vpop.f32.mrf.mxu0 }
 0x1e9   : > { %v4233_v25 = vpack.c.bf16 %v937_v22, %v937_v22 }
 0x1ea   : > { %v930_v24 = vpop.f32.mrf.mxu0 }
 0x1eb   : > { %v1014_v27 = vsel %vm1012_vm3, %v4233_v25, 0 }
 0x1ec   : > { %v3371_v26 = vpop.f32.mrf.mxu0  ;;  %3379 = vmatpush3.bf16.msra.mxu1 %v1014_v27 }
 0x1ed   : > { %3384 = vmatprep.subr.bf16.mxu1 %v3921_v23 }
 0x23c   : > { %v1061_v28 = vpop.permute.xlu1 %1060 }
 0x23d   : > { %v1066_v40 = vsel %vm941_vm1, %v1061_v28, 0 }
 0x240   : > { %v1058_v29 = vpop.permute.xlu1 %1057 }
 0x244   : > { %v1172_v31 = vpop.permute.xlu1 %1171 }
 0x248   : > { %v1286_v34 = vpop.permute.xlu1 %1285 }
 0x249   : > { %v1291_v35 = vsel %vm941_vm1, %v1286_v34, 0 }
 0x24c   : > { %v1284_v41 = vpop.permute.xlu1 %1283 }
 0x292   : > { %v982_v5 = vpop.f32.mrf.mxu1 }
 0x293   : > { %v988_v7 = vmul.f32 0.35355338, %v982_v5 }
 0x294   : > { %v3376_v8 = vpop.f32.mrf.mxu1 }
 0x295   : > { %v995_v9 = vadd.f32 %v4224_v6, %v988_v7 }
 0x296   : > { %v985_v10 = vpop.f32.mrf.mxu1 }
 0x297   : > { %v997_v11 = vsel %vm996_vm2, %v995_v9, -inf }
 0x298   : > { %998 = vmax.xlane.f32.xlu0 %v997_v11  ;;  %v3377_v12 = vpop.f32.mrf.mxu1 }
 0x321   : > { %v999_v13 = vpop.xlane.xlu0 %998 }
 0x322   : > { %v1000_v14 = vsub.f32 %v995_v9, %v999_v13 }
 0x324   : > { %v1001_v15 = vmul.f32 1.442695, %v1000_v14 }
 0x326   : > { %3787 = vpow2.f32 %v1001_v15 }
 0x333   : > { %v3788_v16 = vpop.eup %3787 }
 0x334   : > { %v1003_v17 = vsel %vm996_vm2, %v3788_v16, 0.0 }
 0x335   : > { %1004 = vadd.xlane.f32.xlu0 %v1003_v17 }
 0x34b   : > { %1173 = vrot.lane.b32.xlu0 %v4185_v53, %s3924_s23 }
 0x3be   : > { %v1005_v30 = vpop.xlane.xlu0 %1004 }
 0x3bf   : > { %3789 = vrcp.f32 %v1005_v30 }
 0x3c2   : > { %v1174_v32 = vpop.permute.xlu0 %1173 }
 0x3c3   : > { %v1179_v33 = vsel %vm941_vm1, %v1174_v32, 0 }
 0x3c4   : > { %3397 = vmatpush3.bf16.xpose.msra.mxu0 %v1179_v33 }
 0x3c5   : > { %3408 = vmatprep.subr.bf16.mxu0 %v3921_v23 }
 0x3cb   : > { %3399 = vmatmul.mubr.msk.bf16.vlgmr.msra.gmra.mxu0 %vm941_vm1, %v1172_v31 }
 0x3cc   : > { %v3790_v36 = vpop.eup %3789  ;;  %3409 = vmatpush3.bf16.xpose.msra.mxu0 %v1291_v35  ;;  %3410 = vmatprep.mubr.msk.bf16.mxu0 %vm3922_vm0, %v3921_v23 }
 0x3cd   : > { %v1007_v37 = vmul.f32 %v3790_v36, %v3788_v16  ;;  %3420 = vmatprep.subr.bf16.mxu0 %v3921_v23 }
 0x3cf   : > { %v1008_v39 = vpack.c.bf16 %v1007_v37, %v1007_v37 }
 0x3d1   : > { %3381 = vmatmul.mubr.msk.bf16.vlgmr.msra.gmra.mxu1 %vm996_vm2, %v1008_v39 }
 0x3d2   : > { %3385 = vmatpush3.bf16.xpose.msra.mxu1 %v1066_v40  ;;  %3386 = vmatprep.mubr.msk.bf16.mxu1 %vm3922_vm0, %v3921_v23 }
 0x3d3   : > { %3411 = vmatmul.mubr.msk.bf16.vlgmr.msra.gmra.mxu0 %vm941_vm1, %v1284_v41  ;;  %3390 = vmatprep.subr.bf16.mxu1 %v3921_v23 }
 0x3d4   : > { %3436 = vmatprep.mubr.msk.bf16.mxu0 %vm3922_vm0, %v3921_v23 }
 0x3d9   : > { %3387 = vmatmul.mubr.msk.bf16.vlgmr.msra.gmra.mxu1 %vm941_vm1, %v1058_v29 }
 0x3da   : > { %3392 = vmatprep.mubr.msk.bf16.mxu1 %vm3922_vm0, %v3921_v23 }
 0x48b   : > { %v1215_v46 = vpop.f32.mrf.mxu0 }
 0x48c   : > { %v1221_v47 = vmul.f32 0.35355338, %v1215_v46 }
 0x48d   : > { %v3400_v48 = vpop.f32.mrf.mxu0 }
 0x48e   : > { %v1222_v49 = vadd.f32 %v4224_v6, %v1221_v47  ;;  %v3729_v47 = vld [vmem:[%s4090_s28 + $0x38] sm:$0xff]   ;;  %v3730_v48 = vld [vmem:[%s4090_s28 + $0x30] sm:$0xff]  }
 0x48f   : > { %v1218_v50 = vpop.f32.mrf.mxu0  ;;  %3421 = vmatpush3.bf16.msra.mxu0 %v3729_v47 }
 0x490   : > { %v1223_v51 = vsel %vm996_vm2, %v1222_v49, -inf  ;;  %3422 = vmatprep.subr.bf16.mxu0 %v3921_v23  ;;  %v3732_v50 = vld [vmem:[%s4090_s28 + $0x20] sm:$0xff]  }
 0x491   : > { %v4260_v52 = vpop.f32.mrf.mxu1  ;;  %1224 = vmax.xlane.f32.xlu0 %v1223_v51  ;;  %v3401_v53 = vpop.f32.mrf.mxu0  ;;  %v3733_v51 = vld [vmem:[%s4090_s28 + $0x18] sm:$0xff]  }
 0x492   : > { %v3734_v53 = vld [vmem:[%s4090_s28 + $0x10] sm:$0xff]  }
 0x493   : > { %v3382_v54 = vpop.f32.mrf.mxu1  ;;  %v1327_v55 = vpop.f32.mrf.mxu0  ;;  %3423 = vmatpush3.bf16.msra.mxu0 %v3730_v48 }
 0x494   : > { %v1333_v62 = vmul.f32 0.35355338, %v1327_v55  ;;  %3424 = vmatprep.subr.bf16.mxu0 %v3921_v23  ;;  %v3735_v54 = vld [vmem:[%s4090_s28 + $0x8] sm:$0xff]  }
 0x495   : > { %v1053_v56 = vpop.f32.mrf.mxu1  ;;  %v3412_v57 = vpop.f32.mrf.mxu0 }
 0x496   : > { %v1334_v4 = vadd.f32 %v4224_v6, %v1333_v62  ;;  %v3736_v57 = vld [vmem:[%s4090_s28] sm:$0xff]  }
 0x497   : > { %v3383_v58 = vpop.f32.mrf.mxu1  ;;  %v1330_v59 = vpop.f32.mrf.mxu0 }
 0x498   : > { %v1335_v7 = vsel %vm996_vm2, %v1334_v4, -inf }
 0x499   : > { %v1102_v60 = vpop.f32.mrf.mxu1  ;;  %v3413_v61 = vpop.f32.mrf.mxu0 }
 0x49a   : > { %v1108_v63 = vmul.f32 0.35355338, %v1102_v60 }
 0x49b   : > { %v3388_v0 = vpop.f32.mrf.mxu1 }
 0x49c   : > { %v1109_v1 = vadd.f32 %v4224_v6, %v1108_v63 }
 0x49d   : > { %v1105_v2 = vpop.f32.mrf.mxu1 }
 0x49e   : > { %v1110_v3 = vsel %vm996_vm2, %v1109_v1, -inf }
 0x49f   : > { %1111 = vmax.xlane.f32.xlu1 %v1110_v3  ;;  %v3389_v5 = vpop.f32.mrf.mxu1 }
 0x4a3   : > { %1336 = vmax.xlane.f32.xlu1 %v1335_v7 }
 0x51a   : > { %v1225_v8 = vpop.xlane.xlu0 %1224 }
 0x51b   : > { %v1226_v9 = vsub.f32 %v1222_v49, %v1225_v8  ;;  %v3731_v49 = vld [vmem:[%s4090_s28 + $0x28] sm:$0xff]  }
 0x51c   : > { %3425 = vmatpush3.bf16.msra.mxu0 %v3731_v49 }
 0x51d   : > { %v1227_v10 = vmul.f32 1.442695, %v1226_v9  ;;  %3426 = vmatprep.subr.bf16.mxu0 %v3921_v23 }
 0x51f   : > { %3791 = vpow2.f32 %v1227_v10 }
 0x520   : > { %3427 = vmatpush3.bf16.msra.mxu0 %v3732_v50 }
 0x521   : > { %3428 = vmatprep.subr.bf16.mxu0 %v3921_v23 }
 0x524   : > { %3429 = vmatpush3.bf16.msra.mxu0 %v3733_v51 }
 0x525   : > { %3430 = vmatprep.subr.bf16.mxu0 %v3921_v23 }
 0x528   : > { %v1112_v11 = vpop.xlane.xlu1 %1111  ;;  %3431 = vmatpush3.bf16.msra.mxu0 %v3734_v53  ;;  %v1540_v53 = vsub.s32 4, %v4172_v42 }
 0x529   : > { %v1113_v12 = vsub.f32 %v1109_v1, %v1112_v11  ;;  %3432 = vmatprep.subr.bf16.mxu0 %v3921_v23 }
 0x52b   : > { %v1114_v17 = vmul.f32 1.442695, %v1113_v12  ;;  %v3737_v12 = vld [vmem:[%s4095_s12 + $0x78] sm:$0xff]  }
 0x52c   : > { %v3792_v13 = vpop.eup %3791  ;;  %v1337_v14 = vpop.xlane.xlu1 %1336  ;;  %3433 = vmatpush3.bf16.msra.mxu0 %v3735_v54  ;;  %v1545_v54 = vsub.s32 5, %v4172_v42 }
 0x52d   : > { %v1338_v15 = vsub.f32 %v1334_v4, %v1337_v14  ;;  %v1229_v16 = vsel %vm996_vm2, %v3792_v13, 0.0  ;;  %3434 = vmatprep.subr.bf16.mxu0 %v3921_v23  ;;  %v3739_v14 = vld [vmem:[%s4095_s12 + $0x68] sm:$0xff]  }
 0x52e   : > { %1230 = vadd.xlane.f32.xlu0 %v1229_v16  ;;  %v3742_v16 = vld [vmem:[%s4095_s12 + $0x50] sm:$0xff]  }
 0x52f   : > { %v1339_v18 = vmul.f32 1.442695, %v1338_v15  ;;  %v3740_v15 = vld [vmem:[%s4095_s12 + $0x60] sm:$0xff]  }
 0x530   : > { %3435 = vmatpush3.bf16.msra.mxu0 %v3736_v57 }
 0x531   : > { %3793 = vpow2.f32 %v1339_v18  ;;  %3460 = vmatprep.subr.bf16.mxu0 %v3737_v12 }
 0x532   : > { %3795 = vpow2.f32 %v1114_v17  ;;  %v1519_v17 = vsub.s32 3, %v4172_v42 }
 0x534   : > { %v1520_v18 = vrot.slane %v4176_v44, %v1519_v17 }
 0x53e   : > { %v3794_v6 = vpop.eup %3793 }
 0x53f   : > { %v1341_v20 = vsel %vm996_vm2, %v3794_v6, 0.0  ;;  %v3796_v21 = vpop.eup %3795 }
 0x540   : > { %1342 = vadd.xlane.f32.xlu1 %v1341_v20  ;;  %v1116_v22 = vsel %vm996_vm2, %v3796_v21, 0.0 }
 0x544   : > { %1123 = vrot.lane.b32.xlu0 %v4233_v25, %s3923_s19  ;;  %1117 = vadd.xlane.f32.xlu1 %v1116_v22 }
 0x555   : > { %1235 = vrot.lane.b32.xlu1 %v4233_v25, %s3924_s23 }
 0x559   : > { %1347 = vrot.lane.b32.xlu1 %v4233_v25, %s3925_s29 }
 0x5b7   : > { %v1231_v24 = vpop.xlane.xlu0 %1230 }
 0x5bb   : > { %v1124_v26 = vpop.permute.xlu0 %1123 }
 0x5bc   : > { %v1129_v27 = vsel %vm1012_vm3, %v1124_v26, 0 }
 0x5bd   : > { %3391 = vmatpush3.bf16.msra.mxu1 %v1129_v27 }
 0x5be   : > { %3402 = vmatprep.subr.bf16.mxu1 %v3921_v23 }
 0x5c9   : > { %v1343_v28 = vpop.xlane.xlu1 %1342 }
 0x5cd   : > { %v1118_v29 = vpop.xlane.xlu1 %1117 }
 0x5ce   : > { %3797 = vrcp.f32 %v1118_v29  ;;  %v3743_v29 = vld [vmem:[%s4095_s12 + $0x38] sm:$0xff]  }
 0x5cf   : > { %3799 = vrcp.f32 %v1231_v24 }
 0x5d0   : > { %3801 = vrcp.f32 %v1343_v28  ;;  %v3744_v28 = vld [vmem:[%s4095_s12 + $0x48] sm:$0xff]  }
 0x5d1   : > { %v1236_v32 = vpop.permute.xlu1 %1235 }
 0x5d2   : > { %v1241_v35 = vsel %vm1012_vm3, %v1236_v32, 0  ;;  %v4331_v32 = vld [vmem:[%s4080_s17 + $0x8] ss:$0 sps:$4 sm:$0x11]  }
 0x5d5   : > { %v1348_v36 = vpop.permute.xlu1 %1347 }
 0x5d6   : > { %v1353_v40 = vsel %vm1012_vm3, %v1348_v36, 0  ;;  %v3753_v36 = vld [vmem:[%s4095_s12 + $0x8] sm:$0xff]  }
 0x5db   : > { %v3798_v30 = vpop.eup %3797 }
 0x5dc   : > { %v1120_v31 = vmul.f32 %v3798_v30, %v3796_v21  ;;  %v3800_v34 = vpop.eup %3799  ;;  %v3746_v30 = vld [vmem:[%s4095_s12 + $0x40] sm:$0xff]  }
 0x5dd   : > { %v1233_v25 = vmul.f32 %v3800_v34, %v3792_v13  ;;  %v3802_v39 = vpop.eup %3801  ;;  %v3738_v13 = vld [vmem:[%s4095_s12 + $0x70] sm:$0xff]   ;;  %v3750_v34 = vld [vmem:[%s4095_s12 + $0x20] sm:$0xff]  }
 0x5de   : > { %v1121_v33 = vpack.c.bf16 %v1120_v31, %v1120_v31  ;;  %v1345_v41 = vmul.f32 %v3802_v39, %v3794_v6  ;;  %v3745_v31 = vld [vmem:[%s4095_s12 + $0x30] sm:$0xff]   ;;  %v3755_v39 = vld [vmem:[%s4095_s12 + $0xb8] sm:$0xff]  }
 0x5df   : > { %v1234_v37 = vpack.c.bf16 %v1233_v25, %v1233_v25  ;;  %v3752_v25 = vld [vmem:[%s4095_s12 + $0x10] sm:$0xff]  }
 0x5e0   : > { %3393 = vmatmul.mubr.msk.bf16.vlgmr.msra.gmra.mxu1 %vm996_vm2, %v1121_v33  ;;  %v1346_v46 = vpack.c.bf16 %v1345_v41, %v1345_v41  ;;  %v3748_v33 = vld [vmem:[%s4095_s12 + $0x28] sm:$0xff]  }
 0x5e1   : > { %3403 = vmatpush3.bf16.msra.mxu1 %v1241_v35  ;;  %3404 = vmatprep.mubr.msk.bf16.mxu1 %vm3922_vm0, %v3921_v23  ;;  %v3751_v35 = vld [vmem:[%s4095_s12 + $0x18] sm:$0xff]  }
 0x5e2   : > { %3414 = vmatprep.subr.bf16.mxu1 %v3921_v23 }
 0x5e8   : > { %3405 = vmatmul.mubr.msk.bf16.vlgmr.msra.gmra.mxu1 %vm996_vm2, %v1234_v37  ;;  %v3754_v37 = vld [vmem:[%s4095_s12] sm:$0xff]  }
 0x5e9   : > { %3415 = vmatpush3.bf16.msra.mxu1 %v1353_v40  ;;  %3416 = vmatprep.mubr.msk.bf16.mxu1 %vm3922_vm0, %v3921_v23 }
 0x5ea   : > { %3440 = vmatprep.subr.bf16.mxu1 %v3921_v23 }
 0x5f0   : > { %3417 = vmatmul.mubr.msk.bf16.vlgmr.msra.gmra.mxu1 %vm996_vm2, %v1346_v46 }
 0x5f1   : > { %3456 = vmatprep.mubr.msk.bf16.mxu1 %vm3922_vm0, %v3921_v23  ;;  %3441 = vmatpush3.bf16.msra.mxu1 %v3743_v29 }
 0x5f2   : > { %3442 = vmatprep.subr.bf16.mxu1 %v3921_v23 }
 0x5f5   : > { %3443 = vmatpush3.bf16.msra.mxu1 %v3745_v31 }
 0x5f6   : > { %3444 = vmatprep.subr.bf16.mxu1 %v3921_v23 }
 0x5f9   : > { %3445 = vmatpush3.bf16.msra.mxu1 %v3748_v33  ;;  %v3926_v33 = vmov 0  }
 0x5fa   : > { %3446 = vmatprep.subr.bf16.mxu1 %v3921_v23 }
 0x5fd   : > { %3447 = vmatpush3.bf16.msra.mxu1 %v3750_v34  ;;  %v4402_v34 = vsel %vm1979_vm6, 65535, %v3926_v33 }
 0x5fe   : > { %3448 = vmatprep.subr.bf16.mxu1 %v3921_v23 }
 0x601   : > { %3449 = vmatpush3.bf16.msra.mxu1 %v3751_v35 }
 0x602   : > { %3450 = vmatprep.subr.bf16.mxu1 %v3921_v23 }
 0x605   : > { %3451 = vmatpush3.bf16.msra.mxu1 %v3752_v25 }
 0x606   : > { %3452 = vmatprep.subr.bf16.mxu1 %v3921_v23 }
 0x609   : > { %3453 = vmatpush3.bf16.msra.mxu1 %v3753_v36 }
 0x60a   : > { %3454 = vmatprep.subr.bf16.mxu1 %v3921_v23 }
 0x60d   : > { %3455 = vmatpush3.bf16.msra.mxu1 %v3754_v37 }
 0x60e   : > { %3480 = vmatprep.subr.bf16.mxu1 %v3755_v39 }
 0x6a0   : > { %v1165_v55 = vpop.f32.mrf.mxu1 }
 0x6a1   : > { %1396 = vrot.lane.b32.xlu0 %v1165_v55, %s3925_s29 }
 0x6a2   : > { %v3394_v56 = vpop.f32.mrf.mxu1 }
 0x6a3   : > { %v1541_v56 = vrot.slane %v4176_v44, %v1540_v53 }
 0x6a4   : > { %v1168_v58 = vpop.f32.mrf.mxu1 }
 0x6a6   : > { %v3395_v59 = vpop.f32.mrf.mxu1 }
 0x6a7   : > { %v1546_v59 = vrot.slane %v4176_v44, %v1545_v54 }
 0x6a8   : > { %v1277_v60 = vpop.f32.mrf.mxu1 }
 0x6a9   : > { %1400 = vrot.lane.b32.xlu1 %v1277_v60, %s3924_s23 }
 0x6aa   : > { %v3406_v61 = vpop.f32.mrf.mxu1 }
 0x6ac   : > { %v1280_v62 = vpop.f32.mrf.mxu1 }
 0x6ae   : > { %v3407_v63 = vpop.f32.mrf.mxu1 }
 0x6af   : > { %v3756_v63 = vld [vmem:[%s4095_s12 + $0xb0] sm:$0xff]  }
 0x6b0   : > { %v1389_v0 = vpop.f32.mrf.mxu1 }
 0x6b1   : > { %1404 = vrot.lane.b32.xlu0 %v1389_v0, %s3923_s19  ;;  %v3757_v0 = vld [vmem:[%s4095_s12 + $0xa8] sm:$0xff]  }
 0x6b2   : > { %v3418_v1 = vpop.f32.mrf.mxu1 }
 0x6b3   : > { %v3758_v1 = vld [vmem:[%s4095_s12 + $0xa0] sm:$0xff]  }
 0x6b4   : > { %v1392_v2 = vpop.f32.mrf.mxu1 }
 0x6b5   : > { %v3759_v2 = vld [vmem:[%s4095_s12 + $0x98] sm:$0xff]  }
 0x6b6   : > { %v3419_v3 = vpop.f32.mrf.mxu1 }
 0x6b7   : > { %v3760_v3 = vld [vmem:[%s4095_s12 + $0x90] sm:$0xff]  }
 0x713   : > { %v1397_v4 = vpop.permute.xlu0 %1396 }
 0x714   : > { %v1407_v7 = vsel %vm941_vm1, %v4260_v52, %v1397_v4  ;;  %v3741_v52 = vld [vmem:[%s4095_s12 + $0x58] sm:$0xff]   ;;  %v3761_v4 = vld [vmem:[%s4095_s12 + $0x88] sm:$0xff]  }
 0x71b   : > { %v1401_v5 = vpop.permute.xlu1 %1400 }
 0x71c   : > { %v1409_v8 = vsel %vm1408_vm4, %v1407_v7, %v1401_v5  ;;  %v3762_v5 = vld [vmem:[%s4095_s12 + $0x80] sm:$0xff]   ;;  %v1783_v7 = vsub.s32 7, %v4172_v42 }
 0x723   : > { %v1405_v9 = vpop.permute.xlu0 %1404 }
 0x724   : > { %v1411_v10 = vsel %vm1410_vm5, %v1409_v8, %v1405_v9  ;;  %v1784_v8 = vrot.slane %v4176_v44, %v1783_v7 }
 0x725   : > { %v1412_v11 = vpack.c.bf16 %v1411_v10, %v1411_v10 }
 0x727   : > { %3437 = vmatmul.mubr.bf16.vlgmr.msra.gmra.mxu0 %v1412_v11 }
 0x728   : > { %3461 = vmatpush3.bf16.msra.mxu0 %v3737_v12 }
 0x729   : > { %3462 = vmatprep.subr.bf16.mxu0 %v3738_v13 }
 0x72c   : > { %3463 = vmatpush3.bf16.msra.mxu0 %v3738_v13 }
 0x72d   : > { %3464 = vmatprep.subr.bf16.mxu0 %v3739_v14 }
 0x730   : > { %3465 = vmatpush3.bf16.msra.mxu0 %v3739_v14 }
 0x731   : > { %3466 = vmatprep.subr.bf16.mxu0 %v3740_v15 }
 0x734   : > { %3467 = vmatpush3.bf16.msra.mxu0 %v3740_v15 }
 0x735   : > { %3468 = vmatprep.subr.bf16.mxu0 %v3741_v52 }
 0x738   : > { %3469 = vmatpush3.bf16.msra.mxu0 %v3741_v52 }
 0x739   : > { %3470 = vmatprep.subr.bf16.mxu0 %v3742_v16 }
 0x73c   : > { %3471 = vmatpush3.bf16.msra.mxu0 %v3742_v16 }
 0x73d   : > { %3472 = vmatprep.subr.bf16.mxu0 %v3744_v28 }
 0x740   : > { %3473 = vmatpush3.bf16.msra.mxu0 %v3744_v28 }
 0x741   : > { %3474 = vmatprep.subr.bf16.mxu0 %v3746_v30 }
 0x744   : > { %3475 = vmatpush3.bf16.msra.mxu0 %v3746_v30  ;;  %v4397_v30 = vld [vmem:[%s4115_s24 + $0x8] sm:$0xff] }
 0x745   : > { %3524 = vmatprep.subr.bf16.mxu0 %v3921_v23  ;;  %v1904_v31 = vrot.slane %v4397_v30, %v715_v45 }
 0x7e7   : > { %v1511_v6 = vpop.f32.mrf.mxu0 }
 0x7e8   : > { %v1521_v20 = vadd.f32 %v1520_v18, %v1511_v6 }
 0x7e9   : > { %v3438_v21 = vpop.f32.mrf.mxu0 }
 0x7ea   : > { %v1522_v22 = vadd.f32 %v1521_v20, %v4155_v38  ;;  %v3747_v38 = vld [vmem:[%s4080_s17] sm:$0xff]   ;;  %v1655_v20 = vsub.s32 6, %v4172_v42 }
 0x7eb   : > { %v1514_v24 = vpop.f32.mrf.mxu0  ;;  %3476 = vmatprep.mubr.bf16.mxu0 %v3747_v38 }
 0x7ec   : > { %1523 = vadd.xlane.f32.xlu1 %v1522_v22  ;;  %v1525_v26 = vmul.f32 %v1522_v22, %v1522_v22  ;;  %3477 = vmatmul.mubr.bf16.vlgmr.msra.gmra.mxu0 %v4331_v32  ;;  %v1656_v21 = vrot.slane %v4176_v44, %v1655_v20 }
 0x7ed   : > { %v3439_v27 = vpop.f32.mrf.mxu0  ;;  %3528 = vmatprep.mubr.msk.bf16.mxu0 %vm3922_vm0, %v3921_v23 }
 0x7ee   : > { %1526 = vadd.xlane.f32.xlu0 %v1525_v26 }
 0x875   : > { %v1524_v40 = vpop.xlane.xlu1 %1523 }
 0x876   : > { %v1529_v41 = vmul.f32 0.03125, %v1524_v40 }
 0x877   : > { %v1527_v46 = vpop.xlane.xlu0 %1526 }
 0x878   : > { %v1531_v47 = vmul.f32 %v1529_v41, %v1529_v41  ;;  %v1530_v48 = vmul.f32 0.03125, %v1527_v46  ;;  %v1534_v55 = vsub.f32 %v1522_v22, %v1529_v41 }
 0x87a   : > { %v1532_v49 = vsub.f32 %v1530_v48, %v1531_v47 }
 0x87c   : > { %v1533_v50 = vmax.f32 %v1532_v49, 0.0 }
 0x87e   : > { %v1535_v51 = vadd.f32 1e-12, %v1533_v50 }
 0x880   : > { %3803 = vrsqrt.f32 %v1535_v51 }
 0x88d   : > { %v3804_v57 = vpop.eup %3803 }
 0x88e   : > { %v1537_v58 = vmul.f32 %v3804_v57, %v1534_v55 }
 0x890   : > { %v1542_v60 = vmul.f32 %v1541_v56, %v1537_v58 }
 0x892   : > { %v4357_v61 = vadd.f32 %v1546_v59, %v1542_v60 }
 0x894   : > { %v1548_v62 = vpack.c.bf16 %v4357_v61, %v4357_v61 }
 0x896   : > { %3457 = vmatmul.mubr.bf16.vlgmr.msra.gmra.mxu1 %v1548_v62 }
 0x897   : > { %3481 = vmatpush3.bf16.msra.mxu1 %v3755_v39  ;;  %3496 = vmatprep.mubr.bf16.mxu1 %v3747_v38 }
 0x898   : > { %3482 = vmatprep.subr.bf16.mxu1 %v3756_v63 }
 0x89b   : > { %3483 = vmatpush3.bf16.msra.mxu1 %v3756_v63 }
 0x89c   : > { %3484 = vmatprep.subr.bf16.mxu1 %v3757_v0 }
 0x89f   : > { %3485 = vmatpush3.bf16.msra.mxu1 %v3757_v0 }
 0x8a0   : > { %3486 = vmatprep.subr.bf16.mxu1 %v3758_v1 }
 0x8a3   : > { %3487 = vmatpush3.bf16.msra.mxu1 %v3758_v1 }
 0x8a4   : > { %3488 = vmatprep.subr.bf16.mxu1 %v3759_v2 }
 0x8a7   : > { %3489 = vmatpush3.bf16.msra.mxu1 %v3759_v2 }
 0x8a8   : > { %3490 = vmatprep.subr.bf16.mxu1 %v3760_v3 }
 0x8ab   : > { %3491 = vmatpush3.bf16.msra.mxu1 %v3760_v3 }
 0x8ac   : > { %3492 = vmatprep.subr.bf16.mxu1 %v3761_v4  ;;  %v3478_v9 = vpop.f32.mrf.mxu0 }
 0x8ad   : > { %v1787_v10 = vadd.f32 %v3478_v9, %v1784_v8 }
 0x8ae   : > { %v1767_v11 = vpop.f32.mrf.mxu0 }
 0x8af   : > { %3493 = vmatpush3.bf16.msra.mxu1 %v3761_v4  ;;  %v4376_v12 = vpack.c.bf16 %v1787_v10, %v1787_v10  ;;  %v1785_v14 = vadd.f32 %v1784_v8, %v1767_v11 }
 0x8b0   : > { %3494 = vmatprep.subr.bf16.mxu1 %v3762_v5  ;;  %v3479_v13 = vpop.f32.mrf.mxu0 }
 0x8b1   : > { %v1920_v15 = vsel %vm941_vm1, %v4376_v12, 0 }
 0x8b2   : > { %v1770_v52 = vpop.f32.mrf.mxu0 }
 0x8b3   : > { %3495 = vmatpush3.bf16.msra.mxu1 %v3762_v5  ;;  %v1786_v16 = vadd.f32 %v1784_v8, %v1770_v52 }
 0x8b4   : > { %3500 = vmatprep.subr.bf16.mxu1 %v3921_v23 }
 0x8b5   : > { %v4381_v18 = vpack.c.bf16 %v1786_v16, %v1785_v14 }
 0x8b6   : > { %3497 = vmatmul.mubr.bf16.vlgmr.msra.gmra.mxu1 %v4331_v32 }
 0x8b7   : > { %3504 = vmatprep.mubr.msk.bf16.mxu1 %vm3922_vm0, %v3921_v23  ;;  %3501 = vmatpush3.bf16.xpose.msra.mxu1 %v1920_v15  ;;  %v1917_v6 = vsel %vm941_vm1, %v4381_v18, 0 }
 0x8b8   : > { %3502 = vmatprep.subr.bf16.mxu1 %v3921_v23 }
 0x8bf   : > { %3503 = vmatpush3.bf16.xpose.msra.mxu1 %v1917_v6 }
 0x8c0   : > { %3508 = vmatprep.subr.bf16.mxu1 %v3921_v23 }
 0x956   : > { %v1647_v22 = vpop.f32.mrf.mxu1 }
 0x957   : > { %v1657_v24 = vadd.f32 %v1656_v21, %v1647_v22 }
 0x958   : > { %v3458_v26 = vpop.f32.mrf.mxu1 }
 0x959   : > { %v4390_v27 = vpack.c.bf16 %v1657_v24, %v1657_v24 }
 0x95a   : > { %v1650_v28 = vpop.f32.mrf.mxu1 }
 0x95b   : > { %3505 = vmatmul.mubr.msk.bf16.vlgmr.msra.gmra.mxu1 %vm941_vm1, %v4390_v27 }
 0x95c   : > { %v3459_v29 = vpop.f32.mrf.mxu1  ;;  %3512 = vmatprep.mubr.msk.bf16.mxu1 %vm3922_vm0, %v3921_v23 }
 0x976   : > { %v3498_v44 = vpop.f32.mrf.mxu1 }
 0x977   : > { %v1907_v38 = vadd.f32 %v3498_v44, %v1904_v31 }
 0x978   : > { %v1887_v32 = vpop.f32.mrf.mxu1 }
 0x979   : > { %v4404_v35 = vpack.c.bf16 %v1907_v38, %v1907_v38  ;;  %v1905_v36 = vadd.f32 %v1904_v31, %v1887_v32 }
 0x97a   : > { %v3499_v25 = vpop.f32.mrf.mxu1 }
 0x97b   : > { %v1983_v37 = vand.u32 %v4402_v34, %v4404_v35 }
 0x97c   : > { %v1890_v39 = vpop.f32.mrf.mxu1 }
 0x97d   : > { %v1906_v40 = vadd.f32 %v1904_v31, %v1890_v39  ;;  %3509 = vmatpush3.bf16.msra.mxu1 %v1983_v37 }
 0x97e   : > { %3510 = vmatprep.subr.bf16.mxu1 %v3921_v23 }
 0x97f   : > { %v4409_v45 = vpack.c.bf16 %v1906_v40, %v1905_v36 }
 0x981   : > { %3511 = vmatpush3.bf16.msra.mxu1 %v4409_v45 }
 0x982   : > { %3516 = vmatprep.subr.bf16.mxu1 %v3921_v23 }
 0xa1b   : > { %v1956_v41 = vpop.f32.mrf.mxu1 }
 0xa1c   : > { %v1962_v46 = vmul.f32 0.35355338, %v1956_v41 }
 0xa1d   : > { %v3506_v47 = vpop.f32.mrf.mxu1 }
 0xa1e   : > { %v1964_v48 = vsel %vm1963_vm7, %v1962_v46, -inf }
 0xa1f   : > { %1965 = vmax.xlane.f32.xlu0 %v1964_v48  ;;  %v1959_v49 = vpop.f32.mrf.mxu1 }
 0xa21   : > { %v3507_v50 = vpop.f32.mrf.mxu1 }
 0xa35   : > { %2032 = vrot.lane.b32.xlu0 %v4376_v12, %s3923_s19 }
 0xaa8   : > { %v1966_v51 = vpop.xlane.xlu0 %1965 }
 0xaa9   : > { %v1967_v55 = vsub.f32 %v1962_v46, %v1966_v51 }
 0xaab   : > { %v1968_v56 = vmul.f32 1.442695, %v1967_v55 }
 0xaac   : > { %v2033_v63 = vpop.permute.xlu0 %2032 }
 0xaad   : > { %3805 = vpow2.f32 %v1968_v56  ;;  %v2041_v1 = vsel %vm941_vm1, %v2033_v63, 0 }
 0xaba   : > { %v3806_v57 = vpop.eup %3805 }
 0xabb   : > { %v1970_v58 = vsel %vm1963_vm7, %v3806_v57, 0.0 }
 0xabc   : > { %1971 = vadd.xlane.f32.xlu1 %v1970_v58 }
 0xacd   : > { %2030 = vrot.lane.b32.xlu1 %v4381_v18, %s3923_s19 }
 0xad1   : > { %2026 = vrot.lane.b32.xlu1 %v4390_v27, %s3923_s19 }
 0xb45   : > { %v1972_v59 = vpop.xlane.xlu1 %1971 }
 0xb46   : > { %3807 = vrcp.f32 %v1972_v59 }
 0xb49   : > { %v2031_v2 = vpop.permute.xlu1 %2030 }
 0xb4a   : > { %v2038_v3 = vsel %vm941_vm1, %v2031_v2, 0 }
 0xb4d   : > { %v2027_v4 = vpop.permute.xlu1 %2026 }
 0xb53   : > { %v3808_v60 = vpop.eup %3807 }
 0xb54   : > { %v1974_v62 = vmul.f32 %v3808_v60, %v3806_v57 }
 0xb56   : > { %v1975_v0 = vpack.c.bf16 %v1974_v62, %v1974_v62 }
 0xb58   : > { %3513 = vmatmul.mubr.msk.bf16.vlgmr.msra.gmra.mxu1 %vm1963_vm7, %v1975_v0 }
 0xb59   : > { %3517 = vmatpush3.bf16.xpose.msra.mxu1 %v2041_v1  ;;  %3520 = vmatprep.mubr.msk.bf16.mxu1 %vm3922_vm0, %v3921_v23 }
 0xb5a   : > { %3518 = vmatprep.subr.bf16.mxu1 %v3921_v23 }
 0xb61   : > { %3519 = vmatpush3.bf16.xpose.msra.mxu1 %v2038_v3 }
 0xb62   : > { %3540 = vmatprep.subr.bf16.mxu1 %v3921_v23 }
 0xb68   : > { %3521 = vmatmul.mubr.msk.bf16.vlgmr.msra.gmra.mxu1 %vm941_vm1, %v2027_v4 }
 0xb69   : > { %3544 = vmatprep.mubr.msk.bf16.mxu1 %vm3922_vm0, %v3921_v23 }
 0xc18   : > { %v4431_v5 = vpop.f32.mrf.mxu1 }
 0xc1a   : > { %v3514_v8 = vpop.f32.mrf.mxu1 }
 0xc1c   : > { %v2022_v9 = vpop.f32.mrf.mxu1 }
 0xc1e   : > { %v3515_v10 = vpop.f32.mrf.mxu1 }
 0xc28   : > { %v2077_v11 = vpop.f32.mrf.mxu1 }
 0xc29   : > { %v2083_v13 = vmul.f32 0.35355338, %v2077_v11 }
 0xc2a   : > { %v3522_v14 = vpop.f32.mrf.mxu1 }
 0xc2b   : > { %v2084_v15 = vsel %vm1963_vm7, %v2083_v13, -inf }
 0xc2c   : > { %2085 = vmax.xlane.f32.xlu0 %v2084_v15  ;;  %v2080_v52 = vpop.f32.mrf.mxu1 }
 0xc2e   : > { %v3523_v16 = vpop.f32.mrf.mxu1 }
 0xc42   : > { %2100 = vrot.lane.b32.xlu0 %v4404_v35, %s3923_s19 }
 0xc46   : > { %2153 = vrot.lane.b32.xlu0 %v4376_v12, %s3924_s23 }
 0xc4a   : > { %2149 = vrot.lane.b32.xlu0 %v4390_v27, %s3924_s23 }
 0xcb5   : > { %v2086_v6 = vpop.xlane.xlu0 %2085 }
 0xcb6   : > { %v2087_v21 = vsub.f32 %v2083_v13, %v2086_v6 }
 0xcb8   : > { %v2088_v22 = vmul.f32 1.442695, %v2087_v21 }
 0xcb9   : > { %v2101_v24 = vpop.permute.xlu0 %2100 }
 0xcba   : > { %3809 = vpow2.f32 %v2088_v22  ;;  %v2107_v26 = vand.u32 %v2101_v24, %v4402_v34 }
 0xcbc   : > { %3525 = vmatpush3.bf16.msra.mxu0 %v2107_v26 }
 0xcbd   : > { %3526 = vmatprep.subr.bf16.mxu0 %v3921_v23  ;;  %v2154_v33 = vpop.permute.xlu0 %2153 }
 0xcbe   : > { %v2162_v36 = vsel %vm941_vm1, %v2154_v33, 0 }
 0xcc1   : > { %v2150_v40 = vpop.permute.xlu0 %2149 }
 0xcc7   : > { %v3810_v28 = vpop.eup %3809 }
 0xcc8   : > { %v2090_v29 = vsel %vm1963_vm7, %v3810_v28, 0.0 }
 0xcc9   : > { %2091 = vadd.xlane.f32.xlu1 %v2090_v29 }
 0xcda   : > { %2098 = vrot.lane.b32.xlu1 %v4409_v45, %s3923_s19 }
 0xcde   : > { %2151 = vrot.lane.b32.xlu1 %v4381_v18, %s3924_s23 }
 0xd52   : > { %v2092_v31 = vpop.xlane.xlu1 %2091 }
 0xd53   : > { %3811 = vrcp.f32 %v2092_v31 }
 0xd56   : > { %v2099_v44 = vpop.permute.xlu1 %2098 }
 0xd57   : > { %3527 = vmatpush3.bf16.msra.mxu0 %v2099_v44 }
 0xd58   : > { %3532 = vmatprep.subr.bf16.mxu0 %v3921_v23 }
 0xd5a   : > { %v2152_v37 = vpop.permute.xlu1 %2151 }
 0xd5b   : > { %v2159_v39 = vsel %vm941_vm1, %v2152_v37, 0 }
 0xd60   : > { %v3812_v38 = vpop.eup %3811 }
 0xd61   : > { %v2094_v32 = vmul.f32 %v3812_v38, %v3810_v28 }
 0xd63   : > { %v2095_v25 = vpack.c.bf16 %v2094_v32, %v2094_v32 }
 0xd65   : > { %3529 = vmatmul.mubr.msk.bf16.vlgmr.msra.gmra.mxu0 %vm1963_vm7, %v2095_v25 }
 0xd66   : > { %3533 = vmatpush3.bf16.xpose.msra.mxu0 %v2162_v36  ;;  %3536 = vmatprep.mubr.msk.bf16.mxu0 %vm3922_vm0, %v3921_v23 }
 0xd67   : > { %3534 = vmatprep.subr.bf16.mxu0 %v3921_v23 }
 0xd6e   : > { %3535 = vmatpush3.bf16.xpose.msra.mxu0 %v2159_v39  ;;  %v3764_v39 = vld [vmem:[%s4100_s13 + $0x30] sm:$0xff]  }
 0xd6f   : > { %3556 = vmatprep.subr.bf16.mxu0 %v3921_v23 }
 0xd75   : > { %3537 = vmatmul.mubr.msk.bf16.vlgmr.msra.gmra.mxu0 %vm941_vm1, %v2150_v40  ;;  %v3765_v40 = vld [vmem:[%s4100_s13 + $0x28] sm:$0xff]  }
 0xd76   : > { %3560 = vmatprep.mubr.msk.bf16.mxu0 %vm3922_vm0, %v3921_v23 }
 0xe25   : > { %v2143_v41 = vpop.f32.mrf.mxu0 }
 0xe27   : > { %v3530_v46 = vpop.f32.mrf.mxu0 }
 0xe28   : > { %v3767_v46 = vld [vmem:[%s4100_s13 + $0x18] sm:$0xff]  }
 0xe29   : > { %v2146_v47 = vpop.f32.mrf.mxu0 }
 0xe2a   : > { %v3768_v47 = vld [vmem:[%s4100_s13 + $0x10] sm:$0xff]  }
 0xe2b   : > { %v3531_v48 = vpop.f32.mrf.mxu0 }
 0xe2c   : > { %v3769_v48 = vld [vmem:[%s4100_s13 + $0x8] sm:$0xff]  }
 0xe35   : > { %v2198_v49 = vpop.f32.mrf.mxu0 }
 0xe36   : > { %v2204_v50 = vmul.f32 0.35355338, %v2198_v49  ;;  %v3770_v49 = vld [vmem:[%s4100_s13] sm:$0xff]  }
 0xe37   : > { %v3538_v51 = vpop.f32.mrf.mxu0 }
 0xe38   : > { %v2205_v55 = vsel %vm1963_vm7, %v2204_v50, -inf }
 0xe39   : > { %2206 = vmax.xlane.f32.xlu1 %v2205_v55  ;;  %v2201_v56 = vpop.f32.mrf.mxu0 }
 0xe3b   : > { %v3539_v57 = vpop.f32.mrf.mxu0 }
 0xe4a   : > { %2217 = vrot.lane.b32.xlu1 %v4409_v45, %s3924_s23 }
 0xe4e   : > { %2272 = vrot.lane.b32.xlu1 %v4376_v12, %s3925_s29 }
 0xe52   : > { %2268 = vrot.lane.b32.xlu1 %v4390_v27, %s3925_s29 }
 0xec2   : > { %v2207_v58 = vpop.xlane.xlu1 %2206 }
 0xec3   : > { %v2208_v59 = vsub.f32 %v2204_v50, %v2207_v58 }
 0xec5   : > { %v2209_v60 = vmul.f32 1.442695, %v2208_v59 }
 0xec6   : > { %v2218_v27 = vpop.permute.xlu1 %2217 }
 0xec7   : > { %3813 = vpow2.f32 %v2209_v60 }
 0xeca   : > { %v2273_v4 = vpop.permute.xlu1 %2272 }
 0xecb   : > { %v2281_v9 = vsel %vm941_vm1, %v2273_v4, 0 }
 0xece   : > { %v2269_v11 = vpop.permute.xlu1 %2268 }
 0xed4   : > { %v3814_v62 = vpop.eup %3813 }
 0xed5   : > { %v2211_v63 = vsel %vm1963_vm7, %v3814_v62, 0.0 }
 0xed6   : > { %2212 = vadd.xlane.f32.xlu0 %v2211_v63 }
 0xeec   : > { %2219 = vrot.lane.b32.xlu0 %v4404_v35, %s3924_s23 }
 0xef0   : > { %2270 = vrot.lane.b32.xlu0 %v4381_v18, %s3925_s29 }
 0xf5f   : > { %v2213_v0 = vpop.xlane.xlu0 %2212 }
 0xf60   : > { %3815 = vrcp.f32 %v2213_v0 }
 0xf63   : > { %v2220_v12 = vpop.permute.xlu0 %2219 }
 0xf64   : > { %v2226_v1 = vand.u32 %v2220_v12, %v4402_v34  ;;  %v2510_v12 = vrot.slane %v4397_v30, %v825_v43  ;;  %v3772_v43 = vld [vmem:[%s4105_s18 + $0x30] sm:$0xff]  }
 0xf66   : > { %3541 = vmatpush3.bf16.msra.mxu1 %v2226_v1 }
 0xf67   : > { %3542 = vmatprep.subr.bf16.mxu1 %v3921_v23  ;;  %v2271_v18 = vpop.permute.xlu0 %2270 }
 0xf68   : > { %v2278_v10 = vsel %vm941_vm1, %v2271_v18, 0  ;;  %v3773_v18 = vld [vmem:[%s4105_s18 + $0x28] sm:$0xff]  }
 0xf6a   : > { %3543 = vmatpush3.bf16.msra.mxu1 %v2218_v27 }
 0xf6b   : > { %3548 = vmatprep.subr.bf16.mxu1 %v3921_v23 }
 0xf6d   : > { %v3816_v2 = vpop.eup %3815 }
 0xf6e   : > { %v2215_v3 = vmul.f32 %v3816_v2, %v3814_v62 }
 0xf70   : > { %v2216_v8 = vpack.c.bf16 %v2215_v3, %v2215_v3 }
 0xf72   : > { %3545 = vmatmul.mubr.msk.bf16.vlgmr.msra.gmra.mxu1 %vm1963_vm7, %v2216_v8 }
 0xf73   : > { %3549 = vmatpush3.bf16.xpose.msra.mxu1 %v2281_v9  ;;  %3552 = vmatprep.mubr.msk.bf16.mxu1 %vm3922_vm0, %v3921_v23  ;;  %v3771_v9 = vld [vmem:[%s4105_s18 + $0x38] sm:$0xff]  }
 0xf74   : > { %3550 = vmatprep.subr.bf16.mxu1 %v3921_v23 }
 0xf7b   : > { %3551 = vmatpush3.bf16.xpose.msra.mxu1 %v2278_v10  ;;  %v3775_v10 = vld [vmem:[%s4105_s18 + $0x18] sm:$0xff]  }
 0xf7c   : > { %3584 = vmatprep.subr.bf16.mxu1 %v3921_v23 }
 0xf82   : > { %3553 = vmatmul.mubr.msk.bf16.vlgmr.msra.gmra.mxu1 %vm941_vm1, %v2269_v11  ;;  %v3776_v11 = vld [vmem:[%s4105_s18 + $0x10] sm:$0xff]  }
 0xf83   : > { %3600 = vmatprep.mubr.msk.bf16.mxu1 %vm3922_vm0, %v3921_v23  ;;  %3585 = vmatpush3.bf16.msra.mxu1 %v3771_v9 }
 0xf84   : > { %3586 = vmatprep.subr.bf16.mxu1 %v3921_v23 }
 0xf87   : > { %3587 = vmatpush3.bf16.msra.mxu1 %v3772_v43 }
 0xf88   : > { %3588 = vmatprep.subr.bf16.mxu1 %v3921_v23 }
 0xf8b   : > { %3589 = vmatpush3.bf16.msra.mxu1 %v3773_v18 }
 0xf8c   : > { %3590 = vmatprep.subr.bf16.mxu1 %v3921_v23 }
0x1032   : > { %v2262_v13 = vpop.f32.mrf.mxu1 }
0x1034   : > { %v3546_v14 = vpop.f32.mrf.mxu1 }
0x1035   : > { %v3778_v14 = vld [vmem:[%s4105_s18] sm:$0xff]  }
0x1036   : > { %v2265_v15 = vpop.f32.mrf.mxu1 }
0x1038   : > { %v3547_v52 = vpop.f32.mrf.mxu1 }
0x1042   : > { %v2317_v16 = vpop.f32.mrf.mxu1 }
0x1043   : > { %v2323_v6 = vmul.f32 0.35355338, %v2317_v16 }
0x1044   : > { %v3554_v21 = vpop.f32.mrf.mxu1 }
0x1045   : > { %v2324_v22 = vsel %vm1963_vm7, %v2323_v6, -inf }
0x1046   : > { %2325 = vmax.xlane.f32.xlu0 %v2324_v22  ;;  %v2320_v24 = vpop.f32.mrf.mxu1 }
0x1048   : > { %v3555_v26 = vpop.f32.mrf.mxu1 }
0x105c   : > { %2338 = vrot.lane.b32.xlu0 %v4404_v35, %s3925_s29 }
0x1060   : > { %2388 = vrot.lane.b32.xlu0 %v2143_v41, %s3925_s29  ;;  %v3766_v41 = vld [vmem:[%s4100_s13 + $0x20] sm:$0xff]  }
0x10cf   : > { %v2326_v28 = vpop.xlane.xlu0 %2325 }
0x10d0   : > { %v2327_v29 = vsub.f32 %v2323_v6, %v2326_v28  ;;  %v2530_v28 = vrot.slane %v4397_v30, %v935_v19  ;;  %v3780_v19 = vld [vmem:[%s4110_s20 + $0x30] sm:$0xff]  }
0x10d2   : > { %v2328_v31 = vmul.f32 1.442695, %v2327_v29 }
0x10d3   : > { %v2339_v44 = vpop.permute.xlu0 %2338 }
0x10d4   : > { %3817 = vpow2.f32 %v2328_v31  ;;  %v2345_v38 = vand.u32 %v2339_v44, %v4402_v34  ;;  %v2535_v44 = vrot.slane %v4397_v30, %v1519_v17  ;;  %v3782_v17 = vld [vmem:[%s4110_s20 + $0x20] sm:$0xff]  }
0x10d6   : > { %3557 = vmatpush3.bf16.msra.mxu0 %v2345_v38 }
0x10d7   : > { %3558 = vmatprep.subr.bf16.mxu0 %v3921_v23  ;;  %v2389_v57 = vpop.permute.xlu0 %2388 }
0x10d8   : > { %v2399_v59 = vsel %vm941_vm1, %v4431_v5, %v2389_v57 }
0x10e1   : > { %v3818_v32 = vpop.eup %3817 }
0x10e2   : > { %v2330_v33 = vsel %vm1963_vm7, %v3818_v32, 0.0 }
0x10e3   : > { %2331 = vadd.xlane.f32.xlu1 %v2330_v33 }
0x10f4   : > { %2336 = vrot.lane.b32.xlu1 %v4409_v45, %s3925_s29  ;;  %v3763_v45 = vld [vmem:[%s4100_s13 + $0x38] sm:$0xff]  }
0x10f8   : > { %2392 = vrot.lane.b32.xlu1 %v2262_v13, %s3924_s23  ;;  %v3777_v13 = vld [vmem:[%s4105_s18 + $0x8] sm:$0xff]  }
0x116c   : > { %v2332_v35 = vpop.xlane.xlu1 %2331 }
0x116d   : > { %3819 = vrcp.f32 %v2332_v35 }
0x1170   : > { %v2337_v25 = vpop.permute.xlu1 %2336 }
0x1171   : > { %3559 = vmatpush3.bf16.msra.mxu0 %v2337_v25  ;;  %v3779_v25 = vld [vmem:[%s4110_s20 + $0x38] sm:$0xff]  }
0x1172   : > { %3564 = vmatprep.subr.bf16.mxu0 %v3921_v23 }
0x1174   : > { %v2393_v58 = vpop.permute.xlu1 %2392 }
0x1175   : > { %v2400_v60 = vsel %vm1408_vm4, %v2399_v59, %v2393_v58 }
0x117a   : > { %v3820_v34 = vpop.eup %3819 }
0x117b   : > { %v2334_v36 = vmul.f32 %v3820_v34, %v3818_v32  ;;  %v3781_v34 = vld [vmem:[%s4110_s20 + $0x28] sm:$0xff]  }
0x117d   : > { %v2335_v37 = vpack.c.bf16 %v2334_v36, %v2334_v36  ;;  %v3783_v36 = vld [vmem:[%s4110_s20 + $0x18] sm:$0xff]  }
0x117f   : > { %3561 = vmatmul.mubr.msk.bf16.vlgmr.msra.gmra.mxu0 %vm1963_vm7, %v2335_v37  ;;  %v3784_v37 = vld [vmem:[%s4110_s20 + $0x10] sm:$0xff]  }
0x1180   : > { %3580 = vmatprep.mubr.msk.bf16.mxu0 %vm3922_vm0, %v3921_v23  ;;  %3565 = vmatpush3.bf16.msra.mxu0 %v3763_v45  ;;  %v3785_v45 = vld [vmem:[%s4110_s20 + $0x8] sm:$0xff]  }
0x1181   : > { %3566 = vmatprep.subr.bf16.mxu0 %v3921_v23 }
0x1184   : > { %3567 = vmatpush3.bf16.msra.mxu0 %v3764_v39  ;;  %v3786_v39 = vld [vmem:[%s4110_s20] sm:$0xff]  }
0x1185   : > { %3568 = vmatprep.subr.bf16.mxu0 %v3921_v23 }
0x1188   : > { %3569 = vmatpush3.bf16.msra.mxu0 %v3765_v40  ;;  %v2645_v40 = vrot.slane %v4397_v30, %v1540_v53  ;;  %v2764_v53 = vrot.slane %v4397_v30, %v1545_v54  ;;  %v2784_v54 = vrot.slane %v4397_v30, %v1655_v20 }
0x1189   : > { %3570 = vmatprep.subr.bf16.mxu0 %v3921_v23 }
0x118c   : > { %3571 = vmatpush3.bf16.msra.mxu0 %v3766_v41 }
0x118d   : > { %3572 = vmatprep.subr.bf16.mxu0 %v3921_v23 }
0x1190   : > { %3573 = vmatpush3.bf16.msra.mxu0 %v3767_v46 }
0x1191   : > { %3574 = vmatprep.subr.bf16.mxu0 %v3921_v23 }
0x1194   : > { %3575 = vmatpush3.bf16.msra.mxu0 %v3768_v47 }
0x1195   : > { %3576 = vmatprep.subr.bf16.mxu0 %v3921_v23 }
0x1198   : > { %3577 = vmatpush3.bf16.msra.mxu0 %v3769_v48 }
0x1199   : > { %3578 = vmatprep.subr.bf16.mxu0 %v3921_v23 }
0x119c   : > { %3579 = vmatpush3.bf16.msra.mxu0 %v3770_v49 }
0x119d   : > { %3604 = vmatprep.subr.bf16.mxu0 %v3921_v23 }
0x123f   : > { %v2381_v50 = vpop.f32.mrf.mxu0 }
0x1240   : > { %2396 = vrot.lane.b32.xlu0 %v2381_v50, %s3923_s19 }
0x1241   : > { %v3562_v51 = vpop.f32.mrf.mxu0 }
0x1243   : > { %v2384_v55 = vpop.f32.mrf.mxu0 }
0x1245   : > { %v3563_v56 = vpop.f32.mrf.mxu0 }
0x12b2   : > { %v2397_v62 = vpop.permute.xlu0 %2396 }
0x12b3   : > { %v2401_v63 = vsel %vm1410_vm5, %v2400_v60, %v2397_v62 }
0x12b4   : > { %v2402_v0 = vpack.c.bf16 %v2401_v63, %v2401_v63 }
0x12b6   : > { %3581 = vmatmul.mubr.bf16.vlgmr.msra.gmra.mxu0 %v2402_v0 }
0x12b7   : > { %3620 = vmatprep.mubr.msk.bf16.mxu0 %vm3922_vm0, %v3921_v23  ;;  %3605 = vmatpush3.bf16.msra.mxu0 %v3779_v25 }
0x12b8   : > { %3606 = vmatprep.subr.bf16.mxu0 %v3921_v23 }
0x12bb   : > { %3607 = vmatpush3.bf16.msra.mxu0 %v3780_v19 }
0x12bc   : > { %3608 = vmatprep.subr.bf16.mxu0 %v3921_v23 }
0x12bf   : > { %3609 = vmatpush3.bf16.msra.mxu0 %v3781_v34 }
0x12c0   : > { %3610 = vmatprep.subr.bf16.mxu0 %v3921_v23 }
0x12c3   : > { %3611 = vmatpush3.bf16.msra.mxu0 %v3782_v17 }
0x12c4   : > { %3612 = vmatprep.subr.bf16.mxu0 %v3921_v23 }
0x12c7   : > { %3613 = vmatpush3.bf16.msra.mxu0 %v3783_v36 }
0x12c8   : > { %3614 = vmatprep.subr.bf16.mxu0 %v3921_v23 }
0x12cb   : > { %3615 = vmatpush3.bf16.msra.mxu0 %v3784_v37 }
0x12cc   : > { %3616 = vmatprep.subr.bf16.mxu0 %v3921_v23 }
0x12cf   : > { %3617 = vmatpush3.bf16.msra.mxu0 %v3785_v45 }
0x12d0   : > { %3618 = vmatprep.subr.bf16.mxu0 %v3921_v23 }
0x12d3   : > { %3619 = vmatpush3.bf16.msra.mxu0 %v3786_v39 }
0x1376   : > { %v2501_v1 = vpop.f32.mrf.mxu0 }
0x1377   : > { %v2511_v27 = vadd.f32 %v2510_v12, %v2501_v1 }
0x1378   : > { %v3582_v5 = vpop.f32.mrf.mxu0 }
0x1379   : > { %v2512_v2 = vadd.f32 %v2511_v27, %v4357_v61  ;;  %v3774_v61 = vld [vmem:[%s4105_s18 + $0x20] sm:$0xff]  }
0x137a   : > { %v2504_v3 = vpop.f32.mrf.mxu0  ;;  %3591 = vmatpush3.bf16.msra.mxu1 %v3774_v61 }
0x137b   : > { %2513 = vadd.xlane.f32.xlu1 %v2512_v2  ;;  %v2515_v4 = vmul.f32 %v2512_v2, %v2512_v2  ;;  %3592 = vmatprep.subr.bf16.mxu1 %v3921_v23 }
0x137c   : > { %v3583_v8 = vpop.f32.mrf.mxu0 }
0x137d   : > { %2516 = vadd.xlane.f32.xlu0 %v2515_v4 }
0x137e   : > { %3593 = vmatpush3.bf16.msra.mxu1 %v3775_v10 }
0x137f   : > { %3594 = vmatprep.subr.bf16.mxu1 %v3921_v23 }
0x1382   : > { %3595 = vmatpush3.bf16.msra.mxu1 %v3776_v11 }
0x1383   : > { %3596 = vmatprep.subr.bf16.mxu1 %v3921_v23 }
0x1386   : > { %3597 = vmatpush3.bf16.msra.mxu1 %v3777_v13 }
0x1387   : > { %3598 = vmatprep.subr.bf16.mxu1 %v3921_v23 }
0x138a   : > { %3599 = vmatpush3.bf16.msra.mxu1 %v3778_v14  ;;  %v2789_v14 = vrot.slane %v4397_v30, %v1783_v7 }
0x1404   : > { %v2514_v15 = vpop.xlane.xlu1 %2513 }
0x1405   : > { %v2518_v52 = vmul.f32 0.03125, %v2514_v15 }
0x1406   : > { %v2517_v16 = vpop.xlane.xlu0 %2516 }
0x1407   : > { %v2520_v6 = vmul.f32 %v2518_v52, %v2518_v52  ;;  %v2519_v21 = vmul.f32 0.03125, %v2517_v16  ;;  %v2523_v29 = vsub.f32 %v2512_v2, %v2518_v52 }
0x1409   : > { %v2521_v22 = vsub.f32 %v2519_v21, %v2520_v6 }
0x140b   : > { %v2522_v24 = vmax.f32 %v2521_v22, 0.0 }
0x140d   : > { %v2524_v26 = vadd.f32 1e-12, %v2522_v24 }
0x140f   : > { %3821 = vrsqrt.f32 %v2524_v26 }
0x141c   : > { %v3822_v31 = vpop.eup %3821 }
0x141d   : > { %v2526_v38 = vmul.f32 %v3822_v31, %v2523_v29 }
0x141f   : > { %v2531_v32 = vmul.f32 %v2530_v28, %v2526_v38 }
0x1421   : > { %v2536_v33 = vadd.f32 %v2535_v44, %v2531_v32 }
0x1423   : > { %v2537_v35 = vpack.c.bf16 %v2536_v33, %v2536_v33 }
0x1425   : > { %3601 = vmatmul.mubr.bf16.vlgmr.msra.gmra.mxu1 %v2537_v35 }
0x14e5   : > { %v2636_v41 = vpop.f32.mrf.mxu1 }
0x14e6   : > { %v2646_v46 = vadd.f32 %v2645_v40, %v2636_v41 }
0x14e7   : > { %v3602_v47 = vpop.f32.mrf.mxu1 }
0x14e8   : > { %v2647_v48 = vmul.f32 %v2646_v46, %v2646_v46 }
0x14e9   : > { %v2639_v49 = vpop.f32.mrf.mxu1 }
0x14ea   : > { %v2648_v50 = vmul.f32 %v2647_v48, %v2646_v46 }
0x14eb   : > { %v3603_v51 = vpop.f32.mrf.mxu1 }
0x14ec   : > { %v2649_v55 = vmul.f32 0.044715, %v2648_v50 }
0x14ee   : > { %v2650_v56 = vadd.f32 %v2649_v55, %v2646_v46 }
0x14f0   : > { %v2651_v57 = vmul.f32 0.7978846, %v2650_v56 }
0x14f2   : > { %3823 = vtanh.f32 %v2651_v57 }
0x14ff   : > { %v3824_v58 = vpop.eup %3823 }
0x1500   : > { %v2653_v59 = vadd.f32 1.0, %v3824_v58 }
0x1502   : > { %v2654_v60 = vmul.f32 0.5, %v2653_v59 }
0x1504   : > { %v2655_v23 = vmul.f32 %v2654_v60, %v2646_v46 }
0x1506   : > { %v2656_v62 = vpack.c.bf16 %v2655_v23, %v2655_v23 }
0x1508   : > { %3621 = vmatmul.mubr.bf16.vlgmr.msra.gmra.mxu0 %v2656_v62 }
0x15c8   : > { %v2755_v63 = vpop.f32.mrf.mxu0 }
0x15c9   : > { %v2765_v0 = vadd.f32 %v2764_v53, %v2755_v63 }
0x15ca   : > { %v3622_v12 = vpop.f32.mrf.mxu0 }
0x15cb   : > { %v2766_v1 = vadd.f32 %v2765_v0, %v2536_v33 }
0x15cc   : > { %v2758_v27 = vpop.f32.mrf.mxu0 }
0x15cd   : > { %2767 = vadd.xlane.f32.xlu0 %v2766_v1  ;;  %v2769_v5 = vmul.f32 %v2766_v1, %v2766_v1 }
0x15ce   : > { %v3623_v2 = vpop.f32.mrf.mxu0 }
0x15cf   : > { %2770 = vadd.xlane.f32.xlu1 %v2769_v5 }
0x1656   : > { %v2768_v3 = vpop.xlane.xlu0 %2767 }
0x1657   : > { %v2772_v4 = vmul.f32 0.03125, %v2768_v3 }
0x1658   : > { %v2771_v8 = vpop.xlane.xlu1 %2770 }
0x1659   : > { %v2774_v9 = vmul.f32 %v2772_v4, %v2772_v4  ;;  %v2773_v43 = vmul.f32 0.03125, %v2771_v8  ;;  %v2777_v11 = vsub.f32 %v2766_v1, %v2772_v4 }
0x165b   : > { %v2775_v18 = vsub.f32 %v2773_v43, %v2774_v9 }
0x165d   : > { %v2776_v61 = vmax.f32 %v2775_v18, 0.0 }
0x165f   : > { %v2778_v10 = vadd.f32 1e-12, %v2776_v61 }
0x1661   : > { %3825 = vrsqrt.f32 %v2778_v10 }
0x166e   : > { %v3826_v13 = vpop.eup %3825 }
0x166f   : > { %v2780_v15 = vmul.f32 %v3826_v13, %v2777_v11 }
0x1671   : > { %v2785_v52 = vmul.f32 %v2784_v54, %v2780_v15  ;;  %2795 = sbr.rel (%p3170_p1) target bundleno = 5751 (0x1677), region = 72 }
0x1673   : > { %v2790_v16 = vadd.f32 %v2789_v14, %v2785_v52 }
0x1675   : > { %2791 = vst [vmem:[#allocation2] sm:$0xff] %v2790_v16 }
0x1676   : > { %2796 = vst [vmem:[%s520_s22] sm:$0xff] %v2790_v16 }
0x1677 PF: > { %s4675_s17 = sld [smem:[#allocation10_spill]]  ;;  %s2811_s24 = sshll.u32 %s520_s22, 4  ;;  %s2812_s24 = int_to_ptr.vmem [resolvable:$true] %s2811_s24 }
0x1678   : > { %s4676_s25 = sld [smem:[#allocation7_spill]]  ;;  %s3827_s1 = scalar_lea.vmem %s2812_s24, 128 }
0x1679   : > { %s4678_s21 = sld [smem:[#allocation22_spill]]  ;;  %p3828_p2 = scmp.ne.s32.totalorder %s2812_s24, %s3827_s1 }
0x167a   : > { %s3927_s11 = smov [#allocation3]  }
0x167b   : > { %p3829_p4 = pnand %p3828_p2, %p4037_p3  ;;  %s3831_s19 = sshll.u32 %s3927_s11, 4  ;;  %s3832_s19 = int_to_ptr.vmem [resolvable:$false] %s3831_s19 }
0x167c   : > { %s3833_s23 = scalar_lea.vmem %s3832_s19, 256  ;;  %p3834_p6 = scmp.lt.s32.totalorder %s2812_s24, %s3832_s19 }
0x167d   : > { %s3172_s12 = sshll.u32 %s4675_s17, 7  ;;  %p3830_p5 = pneg %p3829_p4 }
0x167e   : > { %s4680_s14 = sand.u32 1, %s4676_s25   ;;  %p3835_p7 = scmp.lt.s32.totalorder %s3833_s23, %s3827_s1 }
0x167f   : > { %s4679_s27 = smov %s4678_s21  ;;  %s2809_s20 = scalar_lea.hbm %s4678_s21, %s3172_s12 }
0x1680   : > { %s2798_s0 = scalar_lea.sflag [#allocation4], %s4680_s14  ;;  %p3836_p8 = por %p3835_p7, %p3834_p6 }
0x1682   : > { %p3837_p10 = pnand %p3836_p8, %p3830_p5 }
0x1684   : > { %3840 = shalt.err (!%p3837_p10)
}
0x1685   : > { %s3841_s29 = scalar_lea.hbm %s2809_s20, 128  ;;  %s3845_s30 = scalar_lea.hbm %s4679_s27, 256 }
0x1686   : > { %p3842_p11 = scmp.ne.s32.totalorder %s2809_s20, %s3841_s29  ;;  %p3846_p0 = scmp.lt.s32.totalorder %s2809_s20, %s4679_s27 }
0x1687   : > { %p3847_p1 = scmp.lt.s32.totalorder %s3845_s30, %s3841_s29 }
0x1688   : > { %p3843_p12 = pnand %p3842_p11, %p4037_p3 }
0x1689   : > { %p3848_p2 = por %p3847_p1, %p3846_p0 }
0x168a   : > { %p3844_p13 = pneg %p3843_p12 }
0x168c   : > { %p3849_p4 = pnand %p3848_p2, %p3844_p13 }
0x168e   : > { %3852 = shalt.err (!%p3849_p4)
}
0x168f   : > { %3626 = dma.vmem_to_hbm [thread:$0]  (%p4037_p3), %s2812_s24, 128, %s2809_s20, %s2798_s0  }
0x1690 PF: > { %s4681_s3 = sld [smem:[#allocation13_spill]] }
0x1691   : > { %s4682_s17 = sld [smem:[#allocation6_spill]] }
0x1696   : > { %p3632_p5 = scmp.ge.s32.totalorder %s4681_s3, 2 }
0x1697   : > { %s2823_s12 = sand.u32 1, %s4682_s17  }
0x1698   : > { %p3629_p6 = pnand %p3632_p5, %p4047_p9  ;;  %s2824_s13 = scalar_lea.sflag [#allocation4], %s2823_s12 }
0x169a   : > { %p3630_p7 = pneg %p3629_p6 }
0x169c   : > { %3886 = dma.done.wait (%p3630_p7), %s2824_s13, 128  }
0x169d   : > { %3888 = vsyncadd (%p3630_p7), %s2824_s13, 4294967168  ;;  %s24_s24 = sadd.s32 1, %s4681_s3   ;;  %s4684_s17 = sld [smem:[#allocation7_spill]] }
0x169e   : > { %p21_p8 = scmp.ge.s32.totalorder %s24_s24, 6   ;;  %s4685_s18 = sld [smem:[#allocation8_spill]] }
0x169f   : > { %s4686_s19 = sld [smem:[#allocation18_spill]] }
0x16a0   : > { %s4687_s20 = sld [smem:[#allocation11_spill]]  ;;  %23 = sbr.rel (!%p21_p8) target bundleno = 10 (0xa), region = 138 }
0x16a1   : > { %s4688_s21 = sld [smem:[#allocation12_spill]] }
0x16a2   : > { %s4689_s22 = sld [smem:[#allocation14_spill]] }
0x16a3   : > { %s4690_s23 = sld [smem:[#allocation16_spill]] }
0x16a5   :  { %2829 = vsyncpa [#allocation4], 1 }
0x16a6   :  { %2831 = vsyncpa [#allocation4 + $0x1], 1 }

</bundles_post_ra>
